<compile_context>
chip_gen: v5e
topology: v5e:2x2
jax: 0.10.0
libtpu: 0.0.40
codegen_flags: <defaults>
</compile_context>

<pallas_src>
import jax
import jax.numpy as jnp
from jax.experimental import pallas as pl
from jax.experimental.pallas import tpu as pltpu


# ----------------------------------------------------------------------------
# Fused Pallas kernel: PointTransformerConv + linear_up + residual
# ----------------------------------------------------------------------------
def _pt_layer_kernel(xj_ref, rel_ref, w_proj_ref, w_stk_ref, cst_ref, o_ref):
    K1, T, C = xj_ref.shape
    wdt = w_proj_ref.dtype                      # MXU operand dtype (f32 or bf16)

    # Packed constants: rows 0..2 = pos_nn weight, 3 = pos_nn bias,
    # 4 = attn lin1 bias (BN folded), 5 = attn lin2 bias, 6 = linear_up bias.
    cst = cst_ref[...]                          # [8, C] f32
    wp0, wp1, wp2 = cst[0:1, :], cst[1:2, :], cst[2:3, :]
    b_pos, b_a1, b_a2, b_up = cst[3:4, :], cst[4:5, :], cst[5:6, :], cst[6:7, :]

    # Packed MXU weights: rows 0..C-1 = attn lin1 (BN folded), C..2C-1 = attn
    # lin2, 2C..3C-1 = linear_up.
    w_stk = w_stk_ref[...]                      # [3C, C]
    w_a1, w_a2, w_up = w_stk[0:C, :], w_stk[C:2 * C, :], w_stk[2 * C:3 * C, :]

    # -- fused projections: [lin | lin_src | lin_dst](x_j) in ONE MXU matmul ----
    # Invariant: slab 0 of x_j is the self loop (x_j[0] == x_i); lin_dst and the
    # residual are read from that slab — do NOT reorder idx in the wrapper.
    xj = xj_ref[...]                            # [K1, T, C]
    proj = jnp.dot(xj.reshape(K1 * T, C), w_proj_ref[...],
                   preferred_element_type=jnp.float32).reshape(K1, T, 3 * C)
    xlin = proj[:, :, 0:C]                      # lin(x_j)      [K1, T, C] f32
    asrc = proj[:, :, C:2 * C]                  # lin_src(x_j)  [K1, T, C] f32
    adst = proj[0, :, 2 * C:3 * C]              # lin_dst(x_i)  [T, C]     f32

    # -- delta = pos_nn(pos_i - pos_j): K=3 contraction on the VPU, not MXU ------
    rel = rel_ref[...]                          # [K1, T, 3] f32
    delta = (rel[:, :, 0:1] * wp0 + rel[:, :, 1:2] * wp1
             + rel[:, :, 2:3] * wp2 + b_pos)    # [K1, T, C] f32

    # -- alpha logits = attn_nn(lin_dst(x_i) - lin_src(x_j) + delta) -------------
    # (eval-mode BatchNorm already folded into w_a1 / b_a1.)
    a = (adst[None, :, :] - asrc + delta).astype(wdt)
    h = jnp.dot(a.reshape(K1 * T, C), w_a1,
                preferred_element_type=jnp.float32) + b_a1
    h = jnp.maximum(h, 0.0)
    logits = (jnp.dot(h.astype(wdt), w_a2,
                      preferred_element_type=jnp.float32) + b_a2).reshape(K1, T, C)

    # -- per-target, per-channel softmax over the K+1 incoming edges -------------
    # K1 is the leading slab axis -> elementwise VPU running max/sum, no XLU.
    m = jnp.max(logits, axis=0, keepdims=True)
    e = jnp.exp(logits - m)
    inv = pl.reciprocal(jnp.sum(e, axis=0, keepdims=True), approx=True)   # EUP
    attn = e * inv

    # -- message = alpha * (lin(x_j) + delta); aggregate over edges --------------
    agg = jnp.sum(attn * (xlin + delta), axis=0)          # [T, C] f32

    # -- linear_up + residual (residual x_i == slab 0 of x_j) ---------------------
    out = jnp.dot(agg.astype(wdt), w_up,
                  preferred_element_type=jnp.float32) + b_up
    o_ref[...] = out + xj[0].astype(jnp.float32)


def point_trans_layer(x, pos, nbr, params, row_tile=32, mxu_bf16=True):
    """PointTrans_Layer forward.

    x   : [N, C]  node features (data.x)
    pos : [N, 3]  node positions (data.pos)
    nbr : [N, K]  int32 neighbour indices per target node (dense form of
                  data.edge_index for a KNN graph, flow='source_to_target');
                  the conv's self loop is added here (slab 0).
    mxu_bf16 : cast MXU operands (gathered features + weights) to bf16; all
               VPU / softmax math and accumulation stay f32 (safe on v5e too).
               Note: the residual is read back from the bf16 self-loop slab.
    Returns the updated node features (data.x after the layer).
    """
    N, C = x.shape
    K1 = nbr.shape[1] + 1
    assert row_tile % 8 == 0, "row_tile must be a multiple of 8 (sublane tile)"
    cdt = jnp.bfloat16 if mxu_bf16 else jnp.float32

    # self loop FIRST (slab 0) + K neighbours; kernel relies on x_j[0] == x.
    idx = jnp.concatenate([jnp.arange(N, dtype=nbr.dtype)[:, None], nbr], axis=1)
    x_j = x[idx.T].astype(cdt)                          # [K1, N, C] slab-major gather
    rel = (pos[None, :, :] - pos[idx.T])                # [K1, N, 3] f32 (VPU path)

    # Wrapper-side padding of N up to a row_tile multiple (keeps the kernel's
    # no-mask fast path; padded target rows are computed on zeros and sliced off).
    N_pad = ((N + row_tile - 1) // row_tile) * row_tile
    if N_pad != N:
        p = N_pad - N
        x_j = jnp.pad(x_j, ((0, 0), (0, p), (0, 0)))
        rel = jnp.pad(rel, ((0, 0), (0, p), (0, 0)))

    # Merged projection weight: [w_lin | w_src | w_dst] -> [C, 3C].
    w_proj = jnp.concatenate(
        [params["w_lin"], params["w_src"], params["w_dst"]], axis=1).astype(cdt)

    # Fold eval-mode BN into attn lin1 (per-output-channel scale on columns).
    w_a1_eff = params["w_a1"] * params["bn_a_scale"]
    b_a1_eff = params["b_a1"] * params["bn_a_scale"] + params["bn_a_shift"]

    # Packed MXU weights and packed tiny constants (one DMA stream each).
    w_stk = jnp.concatenate([w_a1_eff, params["w_a2"], params["w_up"]],
                            axis=0).astype(cdt)          # [3C, C]
    cst = jnp.concatenate([params["w_pos"], params["b_pos"], b_a1_eff,
                           params["b_a2"], params["b_up"],
                           jnp.zeros((1, C), jnp.float32)], axis=0)  # [8, C]

    row_map = lambda i: (0, i, 0)
    const2 = lambda i: (0, 0)

    out = pl.pallas_call(
        _pt_layer_kernel,
        out_shape=jax.ShapeDtypeStruct((N_pad, C), jnp.float32),
        grid=(N_pad // row_tile,),
        in_specs=[
            pl.BlockSpec((K1, row_tile, C), row_map),    # gathered x_j (slab-major)
            pl.BlockSpec((K1, row_tile, 3), row_map),    # pos_i - pos_j
            pl.BlockSpec((C, 3 * C), const2),            # [w_lin | w_src | w_dst]
            pl.BlockSpec((3 * C, C), const2),            # [w_a1' ; w_a2 ; w_up]
            pl.BlockSpec((8, C), const2),                # packed pos_nn weight + biases
        ],
        out_specs=pl.BlockSpec((row_tile, C), row_map.__class__ and (lambda i: (i, 0))),
        compiler_params=pltpu.CompilerParams(
            dimension_semantics=("parallel",),
            vmem_limit_bytes=32 * 1024 * 1024),
    )(x_j, rel, w_proj, w_stk, cst)
    return out[:N]


# ----------------------------------------------------------------------------
# Harness glue: KNN graph (dense edge_index), parameters, pure-JAX reference
# ----------------------------------------------------------------------------
def knn_indices(pos, k):
    # KNN graph, loop=False, flow='source_to_target': node i receives its k NN.
    d = jnp.sum((pos[:, None, :] - pos[None, :, :]) ** 2, axis=-1)
    d = d + jnp.eye(pos.shape[0], dtype=pos.dtype) * 1e10
    _, idx = jax.lax.top_k(-d, k)
    return idx.astype(jnp.int32)


def init_params(key, c):
    ks = jax.random.split(key, 12)
    f = lambda k, shp: 0.1 * jax.random.normal(k, shp, jnp.float32)
    eps = 1e-5
    # BatchNorm1d in eval mode with fresh running stats: mean=0, var=1, gamma=1, beta=0
    bn_scale = jnp.ones((1, c), jnp.float32) / jnp.sqrt(1.0 + eps)
    bn_shift = jnp.zeros((1, c), jnp.float32)
    return {
        # PointTransformerConv: lin / lin_src / lin_dst (bias=False)
        "w_lin": f(ks[0], (c, c)), "w_src": f(ks[1], (c, c)), "w_dst": f(ks[2], (c, c)),
        # pos_nn = MLP(3->C, num_layers=1) == Linear(3, C)
        "w_pos": f(ks[3], (3, c)), "b_pos": f(ks[4], (1, c)),
        # attn_nn = MLP(C->C, hidden=C, 2 layers): Lin -> BN -> ReLU -> Lin
        "w_a1": f(ks[5], (c, c)), "b_a1": f(ks[6], (1, c)),
        "bn_a_scale": bn_scale, "bn_a_shift": bn_shift,
        "w_a2": f(ks[7], (c, c)), "b_a2": f(ks[8], (1, c)),
        # linear_up = Linear(C, C)
        "w_up": f(ks[9], (c, c)), "b_up": f(ks[10], (1, c)),
    }


def point_trans_layer_ref(x, pos, nbr, params):
    # Pure-JAX reference of the same forward (unfused; for correctness check).
    N, C = x.shape
    idx = jnp.concatenate([jnp.arange(N, dtype=nbr.dtype)[:, None], nbr], axis=1)
    x_j, pos_j = x[idx], pos[idx]                       # [N, K1, C], [N, K1, 3]
    xlin_j = x_j @ params["w_lin"]
    asrc_j = x_j @ params["w_src"]
    adst_i = x @ params["w_dst"]
    delta = (pos[:, None, :] - pos_j) @ params["w_pos"] + params["b_pos"]
    a = adst_i[:, None, :] - asrc_j + delta
    h = jnp.maximum((a @ params["w_a1"] + params["b_a1"]) * params["bn_a_scale"]
                    + params["bn_a_shift"], 0.0)
    logits = h @ params["w_a2"] + params["b_a2"]
    attn = jax.nn.softmax(logits, axis=1)
    agg = jnp.sum(attn * (xlin_j + delta), axis=1)
    return agg @ params["w_up"] + params["b_up"] + x


# ----------------------------------------------------------------------------
if __name__ == "__main__":
    N, C, K = 64, 16, 8          # in_channels == out_channels (residual add requires it)

    key = jax.random.PRNGKey(0)
    k_pos, k_x, k_p = jax.random.split(key, 3)
    pos = jax.random.normal(k_pos, (N, 3), jnp.float32)
    x = jax.random.normal(k_x, (N, C), jnp.float32)
    nbr = knn_indices(pos, K)    # dense neighbour-list form of data.edge_index
    params = init_params(k_p, C)

    ref = point_trans_layer_ref(x, pos, nbr, params)

    # f32 everywhere (tight parity with the PyTorch module).
    out_f32 = point_trans_layer(x, pos, nbr, params, row_tile=32, mxu_bf16=False)
    jax.block_until_ready(out_f32)
    assert out_f32.shape == (N, C)
    assert jnp.allclose(out_f32, ref, rtol=1e-2, atol=1e-2), \
        float(jnp.max(jnp.abs(out_f32 - ref)))

    # Default fast path: bf16 MXU operands, f32 accumulation / softmax.
    out_bf16 = point_trans_layer(x, pos, nbr, params, row_tile=32, mxu_bf16=True)
    jax.block_until_ready(out_bf16)
    assert out_bf16.shape == (N, C)
    assert jnp.allclose(out_bf16, ref, rtol=5e-2, atol=5e-2), \
        float(jnp.max(jnp.abs(out_bf16 - ref)))

    print("KERNEL_OK")
</pallas_src>

<mosaic_0001>
module attributes {stable_mosaic.version = 11 : i64} {
  func.func @_pt_layer_kernel(%arg0: i32, %arg1: memref<9x32x16xf32, #tpu.memory_space<vmem>>, %arg2: memref<9x32x3xf32, #tpu.memory_space<vmem>>, %arg3: memref<16x48xf32, #tpu.memory_space<vmem>>, %arg4: memref<48x16xf32, #tpu.memory_space<vmem>>, %arg5: memref<8x16xf32, #tpu.memory_space<vmem>>, %arg6: memref<32x16xf32, #tpu.memory_space<vmem>>) attributes {dimension_semantics = [#tpu.dimension_semantics<parallel>], iteration_bounds = array<i64: 2>, scalar_prefetch = 0 : i64, scratch_operands = 0 : i64, tpu.core_type = #tpu.core_type<tc>, window_params = [{transform_indices = @transform_0, window_bounds = array<i64: 9, 32, 16>}, {transform_indices = @transform_1, window_bounds = array<i64: 9, 32, 3>}, {pipeline_mode = #tpu.pipeline_mode<synchronous>, transform_indices = @transform_2, window_bounds = array<i64: 16, 48>}, {pipeline_mode = #tpu.pipeline_mode<synchronous>, transform_indices = @transform_3, window_bounds = array<i64: 48, 16>}, {pipeline_mode = #tpu.pipeline_mode<synchronous>, transform_indices = @transform_4, window_bounds = array<i64: 8, 16>}, {transform_indices = @transform_5, window_bounds = array<i64: 32, 16>}]} {
    %c0 = arith.constant 0 : index
    %c0_0 = arith.constant 0 : index
    %0 = vector.load %arg5[%c0, %c0_0] : memref<8x16xf32, #tpu.memory_space<vmem>>, vector<8x16xf32>
    %1 = vector.extract_strided_slice %0 {offsets = [0, 0], sizes = [1, 16], strides = [1, 1]} : vector<8x16xf32> to vector<1x16xf32>
    %2 = vector.extract_strided_slice %0 {offsets = [1, 0], sizes = [1, 16], strides = [1, 1]} : vector<8x16xf32> to vector<1x16xf32>
    %3 = vector.extract_strided_slice %0 {offsets = [2, 0], sizes = [1, 16], strides = [1, 1]} : vector<8x16xf32> to vector<1x16xf32>
    %4 = vector.extract_strided_slice %0 {offsets = [3, 0], sizes = [1, 16], strides = [1, 1]} : vector<8x16xf32> to vector<1x16xf32>
    %5 = vector.extract_strided_slice %0 {offsets = [4, 0], sizes = [1, 16], strides = [1, 1]} : vector<8x16xf32> to vector<1x16xf32>
    %6 = vector.extract_strided_slice %0 {offsets = [5, 0], sizes = [1, 16], strides = [1, 1]} : vector<8x16xf32> to vector<1x16xf32>
    %7 = vector.extract_strided_slice %0 {offsets = [6, 0], sizes = [1, 16], strides = [1, 1]} : vector<8x16xf32> to vector<1x16xf32>
    %c0_1 = arith.constant 0 : index
    %c0_2 = arith.constant 0 : index
    %8 = vector.load %arg4[%c0_1, %c0_2] : memref<48x16xf32, #tpu.memory_space<vmem>>, vector<48x16xf32>
    %9 = vector.extract_strided_slice %8 {offsets = [0, 0], sizes = [16, 16], strides = [1, 1]} : vector<48x16xf32> to vector<16x16xf32>
    %10 = vector.extract_strided_slice %8 {offsets = [16, 0], sizes = [16, 16], strides = [1, 1]} : vector<48x16xf32> to vector<16x16xf32>
    %11 = vector.extract_strided_slice %8 {offsets = [32, 0], sizes = [16, 16], strides = [1, 1]} : vector<48x16xf32> to vector<16x16xf32>
    %c0_3 = arith.constant 0 : index
    %c0_4 = arith.constant 0 : index
    %c0_5 = arith.constant 0 : index
    %12 = vector.load %arg1[%c0_3, %c0_4, %c0_5] : memref<9x32x16xf32, #tpu.memory_space<vmem>>, vector<9x32x16xf32>
    %13 = vector.shape_cast %12 : vector<9x32x16xf32> to vector<288x16xf32>
    %c0_6 = arith.constant 0 : index
    %c0_7 = arith.constant 0 : index
    %14 = vector.load %arg3[%c0_6, %c0_7] : memref<16x48xf32, #tpu.memory_space<vmem>>, vector<16x48xf32>
    %cst = arith.constant dense<0.000000e+00> : vector<288x48xf32>
    %15 = tpu.matmul %13, %14, %cst {dimension_numbers = #tpu.dot_dimension_numbers<[1], [0], [0], [1], [0, 0, 1, 1], [], []>} : vector<288x16xf32>, vector<16x48xf32>, vector<288x48xf32> -> vector<288x48xf32>
    %16 = vector.shape_cast %15 : vector<288x48xf32> to vector<9x32x48xf32>
    %17 = vector.extract_strided_slice %16 {offsets = [0, 0, 0], sizes = [9, 32, 16], strides = [1, 1, 1]} : vector<9x32x48xf32> to vector<9x32x16xf32>
    %18 = vector.extract_strided_slice %16 {offsets = [0, 0, 16], sizes = [9, 32, 16], strides = [1, 1, 1]} : vector<9x32x48xf32> to vector<9x32x16xf32>
    %19 = vector.extract_strided_slice %16 {offsets = [0, 0, 32], sizes = [1, 32, 16], strides = [1, 1, 1]} : vector<9x32x48xf32> to vector<1x32x16xf32>
    %20 = vector.shape_cast %19 : vector<1x32x16xf32> to vector<32x16xf32>
    %c0_8 = arith.constant 0 : index
    %c0_9 = arith.constant 0 : index
    %c0_10 = arith.constant 0 : index
    %21 = vector.load %arg2[%c0_8, %c0_9, %c0_10] : memref<9x32x3xf32, #tpu.memory_space<vmem>>, vector<9x32x3xf32>
    %22 = vector.extract_strided_slice %21 {offsets = [0, 0, 0], sizes = [9, 32, 1], strides = [1, 1, 1]} : vector<9x32x3xf32> to vector<9x32x1xf32>
    %23 = vector.shape_cast %1 : vector<1x16xf32> to vector<1x1x16xf32>
    %24 = vector.broadcast %22 : vector<9x32x1xf32> to vector<9x32x16xf32>
    %25 = vector.broadcast %23 : vector<1x1x16xf32> to vector<9x32x16xf32>
    %26 = arith.mulf %24, %25 : vector<9x32x16xf32>
    %27 = vector.extract_strided_slice %21 {offsets = [0, 0, 1], sizes = [9, 32, 1], strides = [1, 1, 1]} : vector<9x32x3xf32> to vector<9x32x1xf32>
    %28 = vector.shape_cast %2 : vector<1x16xf32> to vector<1x1x16xf32>
    %29 = vector.broadcast %27 : vector<9x32x1xf32> to vector<9x32x16xf32>
    %30 = vector.broadcast %28 : vector<1x1x16xf32> to vector<9x32x16xf32>
    %31 = arith.mulf %29, %30 : vector<9x32x16xf32>
    %32 = arith.addf %26, %31 : vector<9x32x16xf32>
    %33 = vector.extract_strided_slice %21 {offsets = [0, 0, 2], sizes = [9, 32, 1], strides = [1, 1, 1]} : vector<9x32x3xf32> to vector<9x32x1xf32>
    %34 = vector.shape_cast %3 : vector<1x16xf32> to vector<1x1x16xf32>
    %35 = vector.broadcast %33 : vector<9x32x1xf32> to vector<9x32x16xf32>
    %36 = vector.broadcast %34 : vector<1x1x16xf32> to vector<9x32x16xf32>
    %37 = arith.mulf %35, %36 : vector<9x32x16xf32>
    %38 = arith.addf %32, %37 : vector<9x32x16xf32>
    %39 = vector.shape_cast %4 : vector<1x16xf32> to vector<1x1x16xf32>
    %40 = vector.broadcast %39 : vector<1x1x16xf32> to vector<9x32x16xf32>
    %41 = arith.addf %38, %40 : vector<9x32x16xf32>
    %42 = vector.shape_cast %20 : vector<32x16xf32> to vector<1x32x16xf32>
    %43 = vector.broadcast %42 : vector<1x32x16xf32> to vector<9x32x16xf32>
    %44 = arith.subf %43, %18 : vector<9x32x16xf32>
    %45 = arith.addf %44, %41 : vector<9x32x16xf32>
    %46 = vector.shape_cast %45 : vector<9x32x16xf32> to vector<288x16xf32>
    %cst_11 = arith.constant dense<0.000000e+00> : vector<288x16xf32>
    %47 = tpu.matmul %46, %9, %cst_11 {dimension_numbers = #tpu.dot_dimension_numbers<[1], [0], [0], [1], [0, 0, 1, 1], [], []>} : vector<288x16xf32>, vector<16x16xf32>, vector<288x16xf32> -> vector<288x16xf32>
    %48 = vector.broadcast %5 : vector<1x16xf32> to vector<288x16xf32>
    %49 = arith.addf %47, %48 : vector<288x16xf32>
    %cst_12 = arith.constant 0.000000e+00 : f32
    %50 = vector.broadcast %cst_12 : f32 to vector<288x16xf32>
    %51 = arith.maximumf %49, %50 : vector<288x16xf32>
    %cst_13 = arith.constant dense<0.000000e+00> : vector<288x16xf32>
    %52 = tpu.matmul %51, %10, %cst_13 {dimension_numbers = #tpu.dot_dimension_numbers<[1], [0], [0], [1], [0, 0, 1, 1], [], []>} : vector<288x16xf32>, vector<16x16xf32>, vector<288x16xf32> -> vector<288x16xf32>
    %53 = vector.broadcast %6 : vector<1x16xf32> to vector<288x16xf32>
    %54 = arith.addf %52, %53 : vector<288x16xf32>
    %55 = vector.shape_cast %54 : vector<288x16xf32> to vector<9x32x16xf32>
    %cst_14 = arith.constant dense<0xFF800000> : vector<32x16xf32>
    %56 = vector.multi_reduction <maximumf>, %55, %cst_14 [0] : vector<9x32x16xf32> to vector<32x16xf32>
    %57 = vector.shape_cast %56 : vector<32x16xf32> to vector<1x32x16xf32>
    %58 = vector.broadcast %57 : vector<1x32x16xf32> to vector<9x32x16xf32>
    %59 = arith.subf %55, %58 : vector<9x32x16xf32>
    %60 = math.exp %59 : vector<9x32x16xf32>
    %cst_15 = arith.constant dense<0.000000e+00> : vector<32x16xf32>
    %61 = vector.multi_reduction <add>, %60, %cst_15 [0] : vector<9x32x16xf32> to vector<32x16xf32>
    %62 = vector.shape_cast %61 : vector<32x16xf32> to vector<1x32x16xf32>
    %63 = tpu.reciprocal %62 {approx = true} : vector<1x32x16xf32> -> vector<1x32x16xf32>
    %64 = vector.broadcast %63 : vector<1x32x16xf32> to vector<9x32x16xf32>
    %65 = arith.mulf %60, %64 : vector<9x32x16xf32>
    %66 = arith.addf %17, %41 : vector<9x32x16xf32>
    %67 = arith.mulf %65, %66 : vector<9x32x16xf32>
    %cst_16 = arith.constant dense<0.000000e+00> : vector<32x16xf32>
    %68 = vector.multi_reduction <add>, %67, %cst_16 [0] : vector<9x32x16xf32> to vector<32x16xf32>
    %cst_17 = arith.constant dense<0.000000e+00> : vector<32x16xf32>
    %69 = tpu.matmul %68, %11, %cst_17 {dimension_numbers = #tpu.dot_dimension_numbers<[1], [0], [0], [1], [0, 0, 1, 1], [], []>} : vector<32x16xf32>, vector<16x16xf32>, vector<32x16xf32> -> vector<32x16xf32>
    %70 = vector.broadcast %7 : vector<1x16xf32> to vector<32x16xf32>
    %71 = arith.addf %69, %70 : vector<32x16xf32>
    %72 = vector.extract_strided_slice %12 {offsets = [0, 0, 0], sizes = [1, 32, 16], strides = [1, 1, 1]} : vector<9x32x16xf32> to vector<1x32x16xf32>
    %73 = vector.shape_cast %72 : vector<1x32x16xf32> to vector<32x16xf32>
    %74 = arith.addf %71, %73 : vector<32x16xf32>
    %c0_18 = arith.constant 0 : index
    %c0_19 = arith.constant 0 : index
    %75 = vector.load %arg6[%c0_18, %c0_19] : memref<32x16xf32, #tpu.memory_space<vmem>>, vector<32x16xf32>
    tpu.vector_store %arg6[%c0_18, %c0_19], %74 {strides = array<i32>} : memref<32x16xf32, #tpu.memory_space<vmem>>, vector<32x16xf32>,
    return
  }
  func.func @transform_0(%arg0: i32) -> (i32, i32, i32) {
    %c0_i32 = arith.constant 0 : i32
    %c0_i32_0 = arith.constant 0 : i32
    %c0_i32_1 = arith.constant 0 : i32
    return %c0_i32, %arg0, %c0_i32_0 : i32, i32, i32
  }
  func.func @transform_1(%arg0: i32) -> (i32, i32, i32) {
    %c0_i32 = arith.constant 0 : i32
    %c0_i32_0 = arith.constant 0 : i32
    %c0_i32_1 = arith.constant 0 : i32
    return %c0_i32, %arg0, %c0_i32_0 : i32, i32, i32
  }
  func.func @transform_2(%arg0: i32) -> (i32, i32) {
    %c0_i32 = arith.constant 0 : i32
    %c0_i32_0 = arith.constant 0 : i32
    %c0_i32_1 = arith.constant 0 : i32
    return %c0_i32, %c0_i32_0 : i32, i32
  }
  func.func @transform_3(%arg0: i32) -> (i32, i32) {
    %c0_i32 = arith.constant 0 : i32
    %c0_i32_0 = arith.constant 0 : i32
    %c0_i32_1 = arith.constant 0 : i32
    return %c0_i32, %c0_i32_0 : i32, i32
  }
  func.func @transform_4(%arg0: i32) -> (i32, i32) {
    %c0_i32 = arith.constant 0 : i32
    %c0_i32_0 = arith.constant 0 : i32
    %c0_i32_1 = arith.constant 0 : i32
    return %c0_i32, %c0_i32_0 : i32, i32
  }
  func.func @transform_5(%arg0: i32) -> (i32, i32) {
    %c0_i32 = arith.constant 0 : i32
    %c0_i32_0 = arith.constant 0 : i32
    return %arg0, %c0_i32 : i32, i32
  }
}

</mosaic_0001>

<bundles_post_ra>
// kernel: tpu_custom_call.1
= control target key start
LH: loop header
LB: loop body
LE: loop exit
PB: predicated region body
PF: predicated region fallthrough
CT: control target
= control target key end

     0   :  { %s3453_s18 = smov 0   ;;  %s3455_s19 = smov 0   ;;  %s5401_s0 = inlined_call_operand.vmem [shape: f32[9,64,16], index: 0, kind: input, shape index: {}]   ;;  %s5402_s1 = inlined_call_operand.vmem [shape: f32[9,64,3], index: 1, kind: input, shape index: {}]   ;;  %s5403_s2 = inlined_call_operand.vmem [shape: f32[16,48], index: 2, kind: input, shape index: {}]   ;;  %s5404_s3 = inlined_call_operand.vmem [shape: f32[48,16], index: 3, kind: input, shape index: {}]   ;;  %s5405_s4 = inlined_call_operand.vmem [shape: f32[8,16], index: 4, kind: input, shape index: {}]   ;;  %s5406_s5 = inlined_call_operand.vmem [shape: f32[64,16], index: 5, kind: output, shape index: {}]  }
   0x1   :  { %s3457_s20 = smov 0  }
   0x2 LB: > { %s3093_s21 = sadd.s32 4294967295, %s3415_s20   ;;  %s3470_s22 = sadd.s32 1, %s3415_s20   ;;  %s3415_s20 = sphi %s3457_s20, %s5570_s20   ;;  %s3411_s19 = sphi %s3455_s19, %s5569_s19   ;;  %s3407_s18 = sphi %s3453_s18, %s5568_s18  }
   0x3   : > { %s19_s23 = ssub.s32 %s3415_s20, %s3470_s22  ;;  %s22_s24 = sadd.s32 1, %s3411_s19 }
   0x4   : > { %p20_p0 = scmp.eq.s32.totalorder %s19_s23, 0  ;;  %p29_p1 = scmp.ne.s32.totalorder %s3411_s19, %s3407_s18 }
   0x5   : > { %p30_p2 = scmp.eq.s32.totalorder %s3415_s20, 0  ;;  %p3096_p4 = scmp.ge.s32.totalorder %s3415_s20, 2 }
   0x6   : > { %s3479_s25 = scalar_select %p20_p0, %s3411_s19, %s22_s24  }
   0x7   : > { %p3481_p3 = por %p30_p2, %p29_p1  ;;  %179 = sbr.rel (%p3096_p4) target bundleno = 92 (0x5c), region = 28 }
   0xc   : > { %182 = sbr.rel (!%p3481_p3) target bundleno = 52 (0x34), region = 32  ;;  %s184_s27 = sand.u32 (%p3481_p3), 1, %s3411_s19  }
   0xd   : > { %s3218_s28 = sshll.u32 (%p3481_p3), %s3415_s20, 5  ;;  %s3226_s29 = smul.u32 (%p3481_p3), 288, %s184_s27 }
   0xe   : > { %s3493_s7 = scalar_lea.vmem (%p3481_p3), %s5401_s0, %s3218_s28 }
   0xf   : > { %v288_v0 = vld [vmem:[%s3493_s7] sm:$0xff] (%p3481_p3)  ;;  %v290_v1 = vld [vmem:[%s3493_s7 + $0x8] sm:$0xff] (%p3481_p3)  ;;  %v292_v2 = vld [vmem:[%s3493_s7 + $0x10] sm:$0xff] (%p3481_p3)  ;;  %s3498_s8 = scalar_lea.vmem (%p3481_p3), [#allocation2], %s3226_s29 }
  0x10   : > { %289 = vst [vmem:[%s3498_s8] sm:$0xff] (%p3481_p3), %v288_v0  ;;  %v294_v3 = vld [vmem:[%s3493_s7 + $0x18] sm:$0xff] (%p3481_p3)  ;;  %v296_v4 = vld [vmem:[%s3493_s7 + $0x40] sm:$0xff] (%p3481_p3)  ;;  %v298_v5 = vld [vmem:[%s3493_s7 + $0x48] sm:$0xff] (%p3481_p3) }
  0x11   : > { %291 = vst [vmem:[%s3498_s8 + $0x8] sm:$0xff] %v290_v1  ;;  %v300_v6 = vld [vmem:[%s3493_s7 + $0x50] sm:$0xff]  ;;  %v302_v7 = vld [vmem:[%s3493_s7 + $0x58] sm:$0xff]  ;;  %v304_v8 = vld [vmem:[%s3493_s7 + $0x80] sm:$0xff] }
  0x12   : > { %293 = vst [vmem:[%s3498_s8 + $0x10] sm:$0xff] %v292_v2  ;;  %v306_v9 = vld [vmem:[%s3493_s7 + $0x88] sm:$0xff]  ;;  %v308_v10 = vld [vmem:[%s3493_s7 + $0x90] sm:$0xff]  ;;  %v310_v11 = vld [vmem:[%s3493_s7 + $0x98] sm:$0xff] }
  0x13   : > { %295 = vst [vmem:[%s3498_s8 + $0x18] sm:$0xff] %v294_v3  ;;  %v312_v12 = vld [vmem:[%s3493_s7 + $0xc0] sm:$0xff]  ;;  %v314_v13 = vld [vmem:[%s3493_s7 + $0xc8] sm:$0xff]  ;;  %v316_v14 = vld [vmem:[%s3493_s7 + $0xd0] sm:$0xff] }
  0x14   : > { %297 = vst [vmem:[%s3498_s8 + $0x20] sm:$0xff] %v296_v4  ;;  %v318_v15 = vld [vmem:[%s3493_s7 + $0xd8] sm:$0xff]  ;;  %v320_v16 = vld [vmem:[%s3493_s7 + $0x100] sm:$0xff]  ;;  %v322_v17 = vld [vmem:[%s3493_s7 + $0x108] sm:$0xff] }
  0x15   : > { %299 = vst [vmem:[%s3498_s8 + $0x28] sm:$0xff] %v298_v5  ;;  %v324_v18 = vld [vmem:[%s3493_s7 + $0x110] sm:$0xff]  ;;  %v326_v19 = vld [vmem:[%s3493_s7 + $0x118] sm:$0xff]  ;;  %v328_v20 = vld [vmem:[%s3493_s7 + $0x140] sm:$0xff] }
  0x16   : > { %301 = vst [vmem:[%s3498_s8 + $0x30] sm:$0xff] %v300_v6  ;;  %v330_v21 = vld [vmem:[%s3493_s7 + $0x148] sm:$0xff]  ;;  %v332_v22 = vld [vmem:[%s3493_s7 + $0x150] sm:$0xff]  ;;  %v334_v23 = vld [vmem:[%s3493_s7 + $0x158] sm:$0xff] }
  0x17   : > { %303 = vst [vmem:[%s3498_s8 + $0x38] sm:$0xff] %v302_v7  ;;  %v336_v24 = vld [vmem:[%s3493_s7 + $0x180] sm:$0xff]  ;;  %v338_v25 = vld [vmem:[%s3493_s7 + $0x188] sm:$0xff]  ;;  %v340_v26 = vld [vmem:[%s3493_s7 + $0x190] sm:$0xff] }
  0x18   : > { %305 = vst [vmem:[%s3498_s8 + $0x40] sm:$0xff] %v304_v8  ;;  %v342_v27 = vld [vmem:[%s3493_s7 + $0x198] sm:$0xff]  ;;  %v344_v28 = vld [vmem:[%s3493_s7 + $0x1c0] sm:$0xff]  ;;  %v346_v29 = vld [vmem:[%s3493_s7 + $0x1c8] sm:$0xff] }
  0x19   : > { %307 = vst [vmem:[%s3498_s8 + $0x48] sm:$0xff] %v306_v9  ;;  %v348_v30 = vld [vmem:[%s3493_s7 + $0x1d0] sm:$0xff]  ;;  %v350_v31 = vld [vmem:[%s3493_s7 + $0x1d8] sm:$0xff]  ;;  %v352_v32 = vld [vmem:[%s3493_s7 + $0x200] sm:$0xff] }
  0x1a   : > { %309 = vst [vmem:[%s3498_s8 + $0x50] sm:$0xff] %v308_v10  ;;  %v354_v33 = vld [vmem:[%s3493_s7 + $0x208] sm:$0xff]  ;;  %v356_v34 = vld [vmem:[%s3493_s7 + $0x210] sm:$0xff]  ;;  %v358_v35 = vld [vmem:[%s3493_s7 + $0x218] sm:$0xff] }
  0x1b   : > { %311 = vst [vmem:[%s3498_s8 + $0x58] sm:$0xff] %v310_v11 }
  0x1c   : > { %313 = vst [vmem:[%s3498_s8 + $0x60] sm:$0xff] %v312_v12 }
  0x1d   : > { %315 = vst [vmem:[%s3498_s8 + $0x68] sm:$0xff] %v314_v13 }
  0x1e   : > { %317 = vst [vmem:[%s3498_s8 + $0x70] sm:$0xff] %v316_v14 }
  0x1f   : > { %319 = vst [vmem:[%s3498_s8 + $0x78] sm:$0xff] %v318_v15 }
  0x20   : > { %321 = vst [vmem:[%s3498_s8 + $0x80] sm:$0xff] %v320_v16 }
  0x21   : > { %323 = vst [vmem:[%s3498_s8 + $0x88] sm:$0xff] %v322_v17 }
  0x22   : > { %325 = vst [vmem:[%s3498_s8 + $0x90] sm:$0xff] %v324_v18 }
  0x23   : > { %327 = vst [vmem:[%s3498_s8 + $0x98] sm:$0xff] %v326_v19 }
  0x24   : > { %329 = vst [vmem:[%s3498_s8 + $0xa0] sm:$0xff] %v328_v20 }
  0x25   : > { %331 = vst [vmem:[%s3498_s8 + $0xa8] sm:$0xff] %v330_v21 }
  0x26   : > { %333 = vst [vmem:[%s3498_s8 + $0xb0] sm:$0xff] %v332_v22 }
  0x27   : > { %335 = vst [vmem:[%s3498_s8 + $0xb8] sm:$0xff] %v334_v23 }
  0x28   : > { %337 = vst [vmem:[%s3498_s8 + $0xc0] sm:$0xff] %v336_v24 }
  0x29   : > { %339 = vst [vmem:[%s3498_s8 + $0xc8] sm:$0xff] %v338_v25 }
  0x2a   : > { %341 = vst [vmem:[%s3498_s8 + $0xd0] sm:$0xff] %v340_v26 }
  0x2b   : > { %343 = vst [vmem:[%s3498_s8 + $0xd8] sm:$0xff] %v342_v27 }
  0x2c   : > { %345 = vst [vmem:[%s3498_s8 + $0xe0] sm:$0xff] %v344_v28 }
  0x2d   : > { %347 = vst [vmem:[%s3498_s8 + $0xe8] sm:$0xff] %v346_v29 }
  0x2e   : > { %349 = vst [vmem:[%s3498_s8 + $0xf0] sm:$0xff] %v348_v30 }
  0x2f   : > { %351 = vst [vmem:[%s3498_s8 + $0xf8] sm:$0xff] %v350_v31 }
  0x30   : > { %353 = vst [vmem:[%s3498_s8 + $0x100] sm:$0xff] %v352_v32 }
  0x31   : > { %355 = vst [vmem:[%s3498_s8 + $0x108] sm:$0xff] %v354_v33 }
  0x32   : > { %357 = vst [vmem:[%s3498_s8 + $0x110] sm:$0xff] %v356_v34 }
  0x33   : > { %359 = vst [vmem:[%s3498_s8 + $0x118] sm:$0xff] %v358_v35 }
  0x34 PF: > { %365 = sbr.rel (!%p3481_p3) target bundleno = 92 (0x5c), region = 70  ;;  %s367_s9 = sand.u32 (%p3481_p3), 1, %s3411_s19  }
  0x35   : > { %s3219_s10 = sshll.u32 (%p3481_p3), %s3415_s20, 5  ;;  %s3227_s11 = smul.u32 (%p3481_p3), 288, %s367_s9 }
  0x36   : > { %s3576_s14 = scalar_lea.vmem (%p3481_p3), %s5402_s1, %s3219_s10 }
  0x37   : > { %v471_v36 = vld [vmem:[%s3576_s14] sm:$0xff] (%p3481_p3)  ;;  %v473_v37 = vld [vmem:[%s3576_s14 + $0x8] sm:$0xff] (%p3481_p3)  ;;  %v475_v38 = vld [vmem:[%s3576_s14 + $0x10] sm:$0xff] (%p3481_p3)  ;;  %s3581_s15 = scalar_lea.vmem (%p3481_p3), [#allocation3], %s3227_s11 }
  0x38   : > { %472 = vst [vmem:[%s3581_s15] sm:$0xff] (%p3481_p3), %v471_v36  ;;  %v477_v39 = vld [vmem:[%s3576_s14 + $0x18] sm:$0xff] (%p3481_p3)  ;;  %v479_v40 = vld [vmem:[%s3576_s14 + $0x40] sm:$0xff] (%p3481_p3)  ;;  %v481_v41 = vld [vmem:[%s3576_s14 + $0x48] sm:$0xff] (%p3481_p3) }
  0x39   : > { %474 = vst [vmem:[%s3581_s15 + $0x8] sm:$0xff] %v473_v37  ;;  %v483_v42 = vld [vmem:[%s3576_s14 + $0x50] sm:$0xff]  ;;  %v485_v43 = vld [vmem:[%s3576_s14 + $0x58] sm:$0xff]  ;;  %v487_v44 = vld [vmem:[%s3576_s14 + $0x80] sm:$0xff] }
  0x3a   : > { %476 = vst [vmem:[%s3581_s15 + $0x10] sm:$0xff] %v475_v38  ;;  %v489_v45 = vld [vmem:[%s3576_s14 + $0x88] sm:$0xff]  ;;  %v491_v46 = vld [vmem:[%s3576_s14 + $0x90] sm:$0xff]  ;;  %v493_v47 = vld [vmem:[%s3576_s14 + $0x98] sm:$0xff] }
  0x3b   : > { %478 = vst [vmem:[%s3581_s15 + $0x18] sm:$0xff] %v477_v39  ;;  %v495_v48 = vld [vmem:[%s3576_s14 + $0xc0] sm:$0xff]  ;;  %v497_v49 = vld [vmem:[%s3576_s14 + $0xc8] sm:$0xff]  ;;  %v499_v50 = vld [vmem:[%s3576_s14 + $0xd0] sm:$0xff] }
  0x3c   : > { %480 = vst [vmem:[%s3581_s15 + $0x20] sm:$0xff] %v479_v40  ;;  %v501_v51 = vld [vmem:[%s3576_s14 + $0xd8] sm:$0xff]  ;;  %v503_v52 = vld [vmem:[%s3576_s14 + $0x100] sm:$0xff]  ;;  %v505_v53 = vld [vmem:[%s3576_s14 + $0x108] sm:$0xff] }
  0x3d   : > { %482 = vst [vmem:[%s3581_s15 + $0x28] sm:$0xff] %v481_v41  ;;  %v507_v54 = vld [vmem:[%s3576_s14 + $0x110] sm:$0xff]  ;;  %v509_v55 = vld [vmem:[%s3576_s14 + $0x118] sm:$0xff]  ;;  %v511_v56 = vld [vmem:[%s3576_s14 + $0x140] sm:$0xff] }
  0x3e   : > { %484 = vst [vmem:[%s3581_s15 + $0x30] sm:$0xff] %v483_v42  ;;  %v513_v57 = vld [vmem:[%s3576_s14 + $0x148] sm:$0xff]  ;;  %v515_v58 = vld [vmem:[%s3576_s14 + $0x150] sm:$0xff]  ;;  %v517_v59 = vld [vmem:[%s3576_s14 + $0x158] sm:$0xff] }
  0x3f   : > { %486 = vst [vmem:[%s3581_s15 + $0x38] sm:$0xff] %v485_v43  ;;  %v519_v60 = vld [vmem:[%s3576_s14 + $0x180] sm:$0xff]  ;;  %v521_v61 = vld [vmem:[%s3576_s14 + $0x188] sm:$0xff]  ;;  %v523_v62 = vld [vmem:[%s3576_s14 + $0x190] sm:$0xff] }
  0x40   : > { %488 = vst [vmem:[%s3581_s15 + $0x40] sm:$0xff] %v487_v44  ;;  %v525_v63 = vld [vmem:[%s3576_s14 + $0x198] sm:$0xff]  ;;  %v527_v0 = vld [vmem:[%s3576_s14 + $0x1c0] sm:$0xff]  ;;  %v529_v1 = vld [vmem:[%s3576_s14 + $0x1c8] sm:$0xff] }
  0x41   : > { %490 = vst [vmem:[%s3581_s15 + $0x48] sm:$0xff] %v489_v45  ;;  %v531_v2 = vld [vmem:[%s3576_s14 + $0x1d0] sm:$0xff]  ;;  %v533_v3 = vld [vmem:[%s3576_s14 + $0x1d8] sm:$0xff]  ;;  %v535_v4 = vld [vmem:[%s3576_s14 + $0x200] sm:$0xff] }
  0x42   : > { %492 = vst [vmem:[%s3581_s15 + $0x50] sm:$0xff] %v491_v46  ;;  %v537_v5 = vld [vmem:[%s3576_s14 + $0x208] sm:$0xff]  ;;  %v539_v6 = vld [vmem:[%s3576_s14 + $0x210] sm:$0xff]  ;;  %v541_v7 = vld [vmem:[%s3576_s14 + $0x218] sm:$0xff] }
  0x43   : > { %494 = vst [vmem:[%s3581_s15 + $0x58] sm:$0xff] %v493_v47 }
  0x44   : > { %496 = vst [vmem:[%s3581_s15 + $0x60] sm:$0xff] %v495_v48 }
  0x45   : > { %498 = vst [vmem:[%s3581_s15 + $0x68] sm:$0xff] %v497_v49 }
  0x46   : > { %500 = vst [vmem:[%s3581_s15 + $0x70] sm:$0xff] %v499_v50 }
  0x47   : > { %502 = vst [vmem:[%s3581_s15 + $0x78] sm:$0xff] %v501_v51 }
  0x48   : > { %504 = vst [vmem:[%s3581_s15 + $0x80] sm:$0xff] %v503_v52 }
  0x49   : > { %506 = vst [vmem:[%s3581_s15 + $0x88] sm:$0xff] %v505_v53 }
  0x4a   : > { %508 = vst [vmem:[%s3581_s15 + $0x90] sm:$0xff] %v507_v54 }
  0x4b   : > { %510 = vst [vmem:[%s3581_s15 + $0x98] sm:$0xff] %v509_v55 }
  0x4c   : > { %512 = vst [vmem:[%s3581_s15 + $0xa0] sm:$0xff] %v511_v56 }
  0x4d   : > { %514 = vst [vmem:[%s3581_s15 + $0xa8] sm:$0xff] %v513_v57 }
  0x4e   : > { %516 = vst [vmem:[%s3581_s15 + $0xb0] sm:$0xff] %v515_v58 }
  0x4f   : > { %518 = vst [vmem:[%s3581_s15 + $0xb8] sm:$0xff] %v517_v59 }
  0x50   : > { %520 = vst [vmem:[%s3581_s15 + $0xc0] sm:$0xff] %v519_v60 }
  0x51   : > { %522 = vst [vmem:[%s3581_s15 + $0xc8] sm:$0xff] %v521_v61 }
  0x52   : > { %524 = vst [vmem:[%s3581_s15 + $0xd0] sm:$0xff] %v523_v62 }
  0x53   : > { %526 = vst [vmem:[%s3581_s15 + $0xd8] sm:$0xff] %v525_v63 }
  0x54   : > { %528 = vst [vmem:[%s3581_s15 + $0xe0] sm:$0xff] %v527_v0 }
  0x55   : > { %530 = vst [vmem:[%s3581_s15 + $0xe8] sm:$0xff] %v529_v1 }
  0x56   : > { %532 = vst [vmem:[%s3581_s15 + $0xf0] sm:$0xff] %v531_v2 }
  0x57   : > { %534 = vst [vmem:[%s3581_s15 + $0xf8] sm:$0xff] %v533_v3 }
  0x58   : > { %536 = vst [vmem:[%s3581_s15 + $0x100] sm:$0xff] %v535_v4 }
  0x59   : > { %538 = vst [vmem:[%s3581_s15 + $0x108] sm:$0xff] %v537_v5 }
  0x5a   : > { %540 = vst [vmem:[%s3581_s15 + $0x110] sm:$0xff] %v539_v6 }
  0x5b   : > { %542 = vst [vmem:[%s3581_s15 + $0x118] sm:$0xff] %v541_v7 }
  0x5c PF: > { %p3101_p5 = scmp.ge.s32.totalorder %s3415_s20, 1  ;;  %p547_p6 = scmp.lt.s32.totalorder %s3415_s20, 3 }
  0x5e   : > { %p548_p7 = pnand %p3101_p5, %p547_p6 }
  0x60   : > { %551 = sbr.rel (%p548_p7) target bundleno = 1615 (0x64f), region = 108 }
  0x65   : > { %v644_v8 = vld [vmem:[%s5403_s2 + $0x8] sm:$0xff]  ;;  %v643_v9 = vld [vmem:[%s5403_s2] sm:$0xff]  ;;  %s554_s26 = sand.u32 1, %s3407_s18   ;;  %v5407_v10 = vmov 0   ;;  %vm645_vm0 = vcmask 130048   ;;  %v5411_v34 = vmov 1  }
  0x66   : > { %768 = vmatpush.msra.mxu0 %v644_v8  ;;  %3261 = vset.pattern.permute.xlu2 %v5407_v10  ;;  %s3228_s27 = smul.u32 288, %s554_s26  ;;  %v5409_v38 = vmov 2   ;;  %s3420_s29 = smov 16  }
  0x67   : > { %3260 = vset.pattern.permute.xlu1 %v5407_v10  ;;  %3259 = vset.pattern.permute.xlu0 %v5407_v10  ;;  %s3421_s7 = smov 32   ;;  %s3422_s8 = smov 96  }
  0x68   : > { %769 = vmatpush.msra.mxu0 %v643_v9  ;;  %3220 = vmatpush.msra.mxu3 %v644_v8  ;;  %s3664_s28 = scalar_lea.vmem [#allocation3], %s3228_s27  ;;  %s3672_s18 = scalar_lea.vmem [#allocation2], %s3228_s27 }
  0x69   : > { %v3667_v11 = vld [vmem:[%s3664_s28 + $0x20] sm:$0xff]  ;;  %v3670_v12 = vld [vmem:[%s3664_s28 + $0x10] sm:$0xff]  ;;  %v3683_v15 = vld [vmem:[%s3664_s28 + $0x28] sm:$0xff] }
  0x6a   : > { %v607_v13 = vld [vmem:[%s3672_s18] sm:$0xff]  ;;  %937 = vperm.xlu2 %3261, %v3667_v11   ;;  %927 = vperm.xlu1 %3260, %v3670_v12   ;;  %v3686_v16 = vld [vmem:[%s3664_s28 + $0x18] sm:$0xff]  ;;  %v608_v17 = vld [vmem:[%s3672_s18 + $0x8] sm:$0xff] }
  0x6b   : > { %3104 = vmatmul.msk.f32.vlgmr.msra.gmra.mxu0 %vm645_vm0, %v607_v13  ;;  %v3679_v14 = vld [vmem:[%s3664_s28] sm:$0xff]  ;;  %3221 = vmatpush.msra.mxu3 %v643_v9  ;;  %v3690_v18 = vld [vmem:[%s3664_s28 + $0x8] sm:$0xff]  ;;  %v3700_v20 = vld [vmem:[%s3664_s28 + $0x38] sm:$0xff] }
  0x6c   : > { %917 = vperm.xlu0 %3259, %v3679_v14   ;;  %v3697_v19 = vld [vmem:[%s3664_s28 + $0x40] sm:$0xff]  ;;  %v609_v21 = vld [vmem:[%s3672_s18 + $0x10] sm:$0xff]  ;;  %v3711_v23 = vld [vmem:[%s3664_s28 + $0x58] sm:$0xff] }
  0x6d   : > { %v3704_v22 = vld [vmem:[%s3664_s28 + $0x30] sm:$0xff]  ;;  %v610_v25 = vld [vmem:[%s3672_s18 + $0x18] sm:$0xff]  ;;  %v3718_v26 = vld [vmem:[%s3664_s28 + $0x48] sm:$0xff] }
  0x6e   : > { %v3714_v24 = vld [vmem:[%s3664_s28 + $0x50] sm:$0xff]  ;;  %v3728_v28 = vld [vmem:[%s3664_s28 + $0x68] sm:$0xff]  ;;  %v611_v29 = vld [vmem:[%s3672_s18 + $0x20] sm:$0xff] }
  0x6f   : > { %v3725_v27 = vld [vmem:[%s3664_s28 + $0x70] sm:$0xff]  ;;  %v3732_v30 = vld [vmem:[%s3664_s28 + $0x60] sm:$0xff]  ;;  %v3739_v31 = vld [vmem:[%s3664_s28 + $0x88] sm:$0xff] }
  0x70   : > { %v3742_v32 = vld [vmem:[%s3664_s28 + $0x80] sm:$0xff]  ;;  %v612_v33 = vld [vmem:[%s3672_s18 + $0x28] sm:$0xff]  ;;  %v3754_v36 = vld [vmem:[%s3664_s28 + $0x98] sm:$0xff] }
  0x71   : > { %v3751_v35 = vld [vmem:[%s3664_s28 + $0xa0] sm:$0xff]  ;;  %v613_v37 = vld [vmem:[%s3672_s18 + $0x30] sm:$0xff]  ;;  %v3763_v39 = vld [vmem:[%s3664_s28 + $0xb8] sm:$0xff] }
  0x72   : > { %942 = vperm.xlu2 %3261, %v3683_v15   ;;  %932 = vperm.xlu1 %3260, %v3686_v16   ;;  %v3766_v40 = vld [vmem:[%s3664_s28 + $0xb0] sm:$0xff]  ;;  %v614_v41 = vld [vmem:[%s3672_s18 + $0x38] sm:$0xff]  ;;  %v904_v43 = vld [vmem:[%s3664_s28 + $0xc8] sm:$0xff] }
  0x73   : > { %3105 = vmatmul.msk.f32.gmra.mxu0 %vm645_vm0, %v608_v17  ;;  %v905_v42 = vld [vmem:[%s3664_s28 + $0xd0] sm:$0xff]  ;;  %v615_v44 = vld [vmem:[%s3672_s18 + $0x40] sm:$0xff]  ;;  %v616_v45 = vld [vmem:[%s3672_s18 + $0x48] sm:$0xff] }
  0x74   : > { %922 = vperm.xlu0 %3259, %v3690_v18   ;;  %v617_v47 = vld [vmem:[%s3672_s18 + $0x50] sm:$0xff]  ;;  %v618_v49 = vld [vmem:[%s3672_s18 + $0x58] sm:$0xff]  ;;  %v619_v51 = vld [vmem:[%s3672_s18 + $0x60] sm:$0xff] }
  0x7a   : > { %957 = vperm.xlu2 %3261, %v3697_v19   ;;  %952 = vperm.xlu1 %3260, %v3700_v20  }
  0x7b   : > { %3106 = vmatmul.msk.f32.gmra.mxu0 %vm645_vm0, %v609_v21 }
  0x7c   : > { %947 = vperm.xlu0 %3259, %v3704_v22  }
  0x82   : > { %972 = vperm.xlu2 %3261, %v3711_v23   ;;  %967 = vperm.xlu1 %3260, %v3714_v24  }
  0x83   : > { %3107 = vmatmul.msk.f32.gmra.mxu0 %vm645_vm0, %v610_v25 }
  0x84   : > { %962 = vperm.xlu0 %3259, %v3718_v26  }
  0x8a   : > { %987 = vperm.xlu2 %3261, %v3725_v27   ;;  %982 = vperm.xlu1 %3260, %v3728_v28  }
  0x8b   : > { %3108 = vmatmul.msk.f32.gmra.mxu0 %vm645_vm0, %v611_v29 }
  0x8c   : > { %977 = vperm.xlu0 %3259, %v3732_v30  }
  0x92   : > { %1002 = vperm.xlu2 %3261, %v3739_v31   ;;  %997 = vperm.xlu1 %3260, %v3742_v32  }
  0x93   : > { %3109 = vmatmul.msk.f32.gmra.mxu0 %vm645_vm0, %v612_v33 }
  0x94   : > { %3264 = vset.pattern.permute.xlu0 %v5411_v34 }
  0x95   : > { %1137 = vperm.xlu0 %3264, %v3690_v18  }
  0x9a   : > { %1017 = vperm.xlu2 %3261, %v3751_v35   ;;  %1012 = vperm.xlu1 %3260, %v3754_v36  }
  0x9b   : > { %3110 = vmatmul.msk.f32.gmra.mxu0 %vm645_vm0, %v613_v37 }
  0x9d   : > { %3267 = vset.pattern.permute.xlu0 %v5409_v38 }
  0x9e   : > { %1362 = vperm.xlu0 %3267, %v3686_v16  }
  0xa2   : > { %1032 = vperm.xlu2 %3261, %v3763_v39   ;;  %1027 = vperm.xlu1 %3260, %v3766_v40  }
  0xa3   : > { %3111 = vmatmul.msk.f32.gmra.mxu0 %vm645_vm0, %v614_v41 }
  0xa6   : > { %1374 = vperm.xlu0 %3267, %v3704_v22  }
  0xaa   : > { %1047 = vperm.xlu2 %3261, %v905_v42   ;;  %1042 = vperm.xlu1 %3260, %v904_v43  }
  0xab   : > { %3112 = vmatmul.msk.f32.gmra.mxu0 %vm645_vm0, %v615_v44 }
  0xae   : > { %1382 = vperm.xlu0 %3267, %v3697_v19  }
  0xb2   : > { %3263 = vset.pattern.permute.xlu2 %v5409_v38  ;;  %3262 = vset.pattern.permute.xlu1 %v5411_v34 }
  0xb3   : > { %1350 = vperm.xlu2 %3263, %v3679_v14   ;;  %1133 = vperm.xlu1 %3262, %v3679_v14  }
  0xb4   : > { %3113 = vmatmul.msk.f32.gmra.mxu0 %vm645_vm0, %v616_v45 }
  0xbb   : > { %3266 = vset.pattern.permute.xlu2 %v5411_v34  ;;  %3265 = vset.pattern.permute.xlu1 %v5409_v38 }
  0xbc   : > { %1141 = vperm.xlu2 %3266, %v3670_v12   ;;  %1354 = vperm.xlu1 %3265, %v3690_v18  }
  0xbd   : > { %3114 = vmatmul.msk.f32.gmra.mxu0 %vm645_vm0, %v617_v47 }
  0xc4   : > { %v3788_v46 = vpop.permute.xlu2 %937  ;;  %1145 = vperm.xlu2 %3266, %v3686_v16   ;;  %1358 = vperm.xlu1 %3265, %v3670_v12  }
  0xc5   : > { %3115 = vmatmul.msk.f32.gmra.mxu0 %vm645_vm0, %v618_v49 }
  0xcc   : > { %v3794_v48 = vpop.permute.xlu2 %942  ;;  %3269 = vset.pattern.permute.xlu2 %v5409_v38  ;;  %3268 = vset.pattern.permute.xlu1 %v5411_v34 }
  0xcd   : > { %1366 = vperm.xlu2 %3269, %v3667_v11   ;;  %1149 = vperm.xlu1 %3268, %v3667_v11  }
  0xce   : > { %3116 = vmatmul.msk.f32.gmra.mxu0 %vm645_vm0, %v619_v51 }
  0xd4   : > { %v3802_v50 = vpop.permute.xlu2 %957 }
  0xd5   : > { %1370 = vperm.xlu2 %3269, %v3683_v15   ;;  %1153 = vperm.xlu1 %3268, %v3683_v15  }
  0xdc   : > { %v3808_v52 = vpop.permute.xlu2 %972  ;;  %v3810_v53 = vpop.permute.xlu1 %927 }
  0xdd   : > { %3270 = vset.pattern.permute.xlu2 %v5411_v34  ;;  %3271 = vset.pattern.permute.xlu1 %v5409_v38 }
  0xde   : > { %1157 = vperm.xlu2 %3270, %v3704_v22   ;;  %1378 = vperm.xlu1 %3271, %v3700_v20   ;;  %v918_v60 = vpop.permute.xlu0 %917 }
  0xe4   : > { %v3816_v54 = vpop.permute.xlu2 %987  ;;  %v3818_v55 = vpop.permute.xlu1 %932 }
  0xe6   : > { %1165 = vperm.xlu2 %3270, %v3697_v19   ;;  %3272 = vset.pattern.permute.xlu1 %v5411_v34  ;;  %v923_v0 = vpop.permute.xlu0 %922 }
  0xe8   : > { %v3822_v56 = vpop.f32.mrf.mxu0 }
  0xe9   : > { %1639 = vrot.lane.b32.xlu0 %v3822_v56, %s3420_s29 }
  0xec   : > { %v3826_v57 = vpop.permute.xlu2 %1002  ;;  %v3828_v58 = vpop.permute.xlu1 %952 }
  0xee   : > { %3273 = vset.pattern.permute.xlu2 %v5409_v38  ;;  %v3853_v6 = vpop.permute.xlu0 %947 }
  0xf0   : > { %v3831_v59 = vpop.f32.mrf.mxu0 }
  0xf1   : > { %1390 = vperm.xlu0 %3267, %v3714_v24  }
  0xf4   : > { %v3834_v61 = vpop.permute.xlu2 %1017  ;;  %v3836_v62 = vpop.permute.xlu1 %967 }
  0xf6   : > { %v3860_v11 = vpop.permute.xlu0 %962 }
  0xf8   : > { %v3838_v63 = vpop.f32.mrf.mxu0 }
  0xf9   : > { %5459 = vst [vmem:[#allocation4_spill] sm:$0xff] %v3838_v63  ;;  %3275 = vset.pattern.permute.xlu0 %v5411_v34 }
  0xfa   : > { %1161 = vperm.xlu0 %3275, %v3700_v20   ;;  %v3879_v20 = vld [vmem:[%s5405_s4] sm:$0xff] }
  0xfb   : > { %v3884_v21 = vperm.slane %v3879_v20, 0  ;;  %v3887_v22 = vperm.slane %v3879_v20, 2  ;;  %v3890_v25 = vperm.slane %v3879_v20, 1  ;;  %v3896_v47 = vperm.slane %v3879_v20, 3 }
  0xfc   : > { %v3842_v1 = vpop.permute.xlu2 %1032  ;;  %v3844_v2 = vpop.permute.xlu1 %982 }
  0xfd   : > { %v1096_v37 = vmul.f32 %v3884_v21, %v918_v60  ;;  %v1097_v49 = vmul.f32 %v3884_v21, %v923_v0  ;;  %v1099_v0 = vmul.f32 %v3884_v21, %v3818_v55 }
  0xfe   : > { %v3870_v16 = vpop.permute.xlu0 %977 }
 0x100   : > { %v3846_v3 = vpop.f32.mrf.mxu0 }
 0x101   : > { %5460 = vst [vmem:[#allocation5_spill] sm:$0xff] %v3846_v3 }
 0x102   : > { %1177 = vperm.xlu0 %3275, %v3711_v23  }
 0x104   : > { %v3849_v4 = vpop.permute.xlu1 %997  ;;  %v3851_v5 = vpop.permute.xlu2 %1047 }
 0x107   : > { %v1138_v29 = vpop.permute.xlu0 %1137 }
 0x108   : > { %v3855_v7 = vpop.f32.mrf.mxu0  ;;  %v1278_v51 = vmul.f32 %v3890_v25, %v1138_v29 }
 0x10a   : > { %1181 = vperm.xlu0 %3275, %v3732_v30   ;;  %v1314_v60 = vadd.f32 %v1278_v51, %v1097_v49 }
 0x10c   : > { %v3858_v8 = vpop.permute.xlu1 %1012 }
 0x10d   : > { %v1351_v9 = vpop.permute.xlu2 %1350 }
 0x10e   : > { %v1494_v41 = vmul.f32 %v3887_v22, %v1351_v9 }
 0x110   : > { %v3862_v12 = vpop.f32.mrf.mxu0  ;;  %v1363_v10 = vpop.permute.xlu0 %1362 }
 0x111   : > { %5461 = vst [vmem:[#allocation6_spill] sm:$0xff] %v3862_v12 }
 0x112   : > { %1647 = vrot.lane.b32.xlu0 %v3855_v7, %s3420_s29 }
 0x114   : > { %v3866_v13 = vpop.permute.xlu1 %1027 }
 0x116   : > { %v1142_v14 = vpop.permute.xlu2 %1141 }
 0x117   : > { %v1279_v29 = vmul.f32 %v3890_v25, %v1142_v14 }
 0x118   : > { %v3868_v15 = vpop.f32.mrf.mxu0 }
 0x119   : > { %5462 = vst [vmem:[#allocation7_spill] sm:$0xff] %v3868_v15 }
 0x11c   : > { %v3872_v17 = vpop.permute.xlu1 %1042 }
 0x11e   : > { %v1146_v18 = vpop.permute.xlu2 %1145 }
 0x11f   : > { %v1280_v9 = vmul.f32 %v3890_v25, %v1146_v18  ;;  %v1098_v18 = vmul.f32 %v3884_v21, %v3810_v53 }
 0x120   : > { %v3874_v19 = vpop.f32.mrf.mxu0 }
 0x121   : > { %5463 = vst [vmem:[#allocation8_spill] sm:$0xff] %v3874_v19  ;;  %1653 = vrot.lane.b32.xlu0 %v3874_v19, %s3420_s29  ;;  %v3914_v19 = vpop.permute.xlu0 %1374  ;;  %v1315_v49 = vadd.f32 %v1279_v29, %v1098_v18 }
 0x125   : > { %v1134_v33 = vpop.permute.xlu1 %1133 }
 0x126   : > { %v1277_v42 = vmul.f32 %v3890_v25, %v1134_v33 }
 0x127   : > { %v1367_v43 = vpop.permute.xlu2 %1366 }
 0x128   : > { %v1313_v44 = vadd.f32 %v1277_v42, %v1096_v37  ;;  %v1316_v42 = vadd.f32 %v1280_v9, %v1099_v0  ;;  %v1100_v0 = vmul.f32 %v3884_v21, %v3788_v46 }
 0x129   : > { %v1383_v53 = vpop.permute.xlu0 %1382 }
 0x12a   : > { %v1530_v45 = vadd.f32 %v1494_v41, %v1313_v44  ;;  %v1497_v44 = vmul.f32 %v3887_v22, %v1363_v10 }
 0x12c   : > { %v3901_v38 = vadd.f32 %v3896_v47, %v1530_v45  ;;  %v1533_v55 = vadd.f32 %v1497_v44, %v1316_v42  ;;  %v1104_v44 = vmul.f32 %v3884_v21, %v3802_v50 }
 0x12e   : > { %v1355_v34 = vpop.permute.xlu1 %1354  ;;  %1819 = vrot.lane.b32.xlu1 %v3901_v38, %s3421_s7  ;;  %v3925_v9 = vadd.f32 %v3896_v47, %v1533_v55 }
 0x12f   : > { %v1495_v33 = vmul.f32 %v3887_v22, %v1355_v34  ;;  %v1371_v37 = vpop.permute.xlu2 %1370 }
 0x130   : > { %5466 = vst [vmem:[#allocation11_spill] sm:$0xff] %v3925_v9 }
 0x131   : > { %v1531_v41 = vadd.f32 %v1495_v33, %v1314_v60 }
 0x133   : > { %v3912_v45 = vadd.f32 %v3896_v47, %v1531_v41  ;;  %v1498_v41 = vmul.f32 %v3887_v22, %v1367_v43 }
 0x135   : > { %5464 = vst [vmem:[#allocation9_spill] sm:$0xff] %v3912_v45  ;;  %1821 = vrot.lane.b32.xlu2 %v3912_v45, %s3421_s7 }
 0x136   : > { %v1359_v34 = vpop.permute.xlu1 %1358 }
 0x137   : > { %v1496_v51 = vmul.f32 %v3887_v22, %v1359_v34  ;;  %v1502_v34 = vmul.f32 %v3887_v22, %v1383_v53  ;;  %v3950_v53 = vpop.f32.mrf.mxu0 }
 0x138   : > { %v1158_v14 = vpop.permute.xlu2 %1157 }
 0x139   : > { %v1532_v60 = vadd.f32 %v1496_v51, %v1315_v49 }
 0x13b   : > { %v3922_v10 = vadd.f32 %v3896_v47, %v1532_v60 }
 0x13d   : > { %5465 = vst [vmem:[#allocation10_spill] sm:$0xff] %v3922_v10  ;;  %1823 = vrot.lane.b32.xlu1 %v3922_v10, %s3421_s7  ;;  %1825 = vrot.lane.b32.xlu2 %v3925_v9, %s3421_s7 }
 0x13f   : > { %v1150_v33 = vpop.permute.xlu1 %1149 }
 0x140   : > { %v1281_v29 = vmul.f32 %v3890_v25, %v1150_v33  ;;  %v1166_v42 = vpop.permute.xlu2 %1165 }
 0x141   : > { %v1285_v18 = vmul.f32 %v3890_v25, %v1166_v42 }
 0x142   : > { %v1317_v49 = vadd.f32 %v1281_v29, %v1100_v0  ;;  %v1499_v29 = vmul.f32 %v3887_v22, %v1371_v37 }
 0x143   : > { %v1321_v55 = vadd.f32 %v1285_v18, %v1104_v44  ;;  %v5469_v44 = vmov 1   ;;  %v620_v18 = vld [vmem:[%s3672_s18 + $0x68] sm:$0xff] }
 0x144   : > { %v1534_v51 = vadd.f32 %v1498_v41, %v1317_v49  ;;  %v3958_v41 = vpop.f32.mrf.mxu0  ;;  %3117 = vmatmul.msk.f32.gmra.mxu0 %vm645_vm0, %v620_v18 }
 0x145   : > { %v1538_v60 = vadd.f32 %v1502_v34, %v1321_v55  ;;  %1641 = vrot.lane.b32.xlu1 %v3831_v59, %s3420_s29  ;;  %1643 = vrot.lane.b32.xlu2 %v3838_v63, %s3420_s29  ;;  %5468 = vst [vmem:[#allocation13_spill] sm:$0xff] %v3958_v41  ;;  %v1283_v55 = vmul.f32 %v3890_v25, %v1158_v14  ;;  %v3999_v14 = vld [vmem:[%s3664_s28 + $0x78] sm:$0xff] }
 0x146   : > { %v1571_v46 = vadd.f32 %v3896_v47, %v1534_v51  ;;  %v1102_v51 = vmul.f32 %v3884_v21, %v3853_v6 }
 0x147   : > { %v3945_v43 = vadd.f32 %v3896_v47, %v1538_v60  ;;  %v1154_v33 = vpop.permute.xlu1 %1153 }
 0x148   : > { %v3948_v50 = vadd.f32 %v1571_v46, %v3855_v7  ;;  %v1282_v0 = vmul.f32 %v3890_v25, %v1154_v33  ;;  %v1101_v7 = vmul.f32 %v3884_v21, %v3794_v48  ;;  %v1500_v33 = vmul.f32 %v3887_v22, %v3914_v19 }
 0x149   : > { %1835 = vrot.lane.b32.xlu0 %v3945_v43, %s3421_s7  ;;  %v1103_v19 = vmul.f32 %v3884_v21, %v3828_v58  ;;  %v622_v58 = vld [vmem:[%s3672_s18 + $0x78] sm:$0xff] }
 0x14a   : > { %5467 = vst [vmem:[#allocation12_spill] sm:$0xff] %v3948_v50  ;;  %v1318_v42 = vadd.f32 %v1282_v0, %v1101_v7 }
 0x14c   : > { %v1535_v34 = vadd.f32 %v1499_v29, %v1318_v42  ;;  %v3973_v37 = vpop.f32.mrf.mxu0 }
 0x14d   : > { %1169 = vperm.xlu1 %3272, %v3718_v26   ;;  %1386 = vperm.xlu2 %3273, %v3718_v26   ;;  %v5470_v26 = vmov 2   ;;  %5471 = vst [vmem:[#allocation14_spill] sm:$0xff] %v3973_v37 }
 0x14e   : > { %v3976_v49 = vadd.f32 %v3896_v47, %v1535_v34 }
 0x150   : > { %5472 = vst [vmem:[#allocation15_spill] sm:$0xff] %v3976_v49  ;;  %v1379_v6 = vpop.permute.xlu1 %1378 }
 0x151   : > { %1197 = vperm.xlu0 %3275, %v3742_v32   ;;  %v1501_v34 = vmul.f32 %v3887_v22, %v1379_v6  ;;  %v624_v6 = vld [vmem:[%s3672_s18 + $0x88] sm:$0xff] }
 0x154   : > { %v3995_v0 = vpop.f32.mrf.mxu0 }
 0x155   : > { %3274 = vset.pattern.permute.xlu2 %v5469_v44  ;;  %1645 = vrot.lane.b32.xlu1 %v3846_v3, %s3420_s29  ;;  %5473 = vst [vmem:[#allocation16_spill] sm:$0xff] %v3995_v0 }
 0x156   : > { %1173 = vperm.xlu2 %3274, %v3714_v24   ;;  %3278 = vset.pattern.permute.xlu1 %v5470_v26  ;;  %v621_v24 = vld [vmem:[%s3672_s18 + $0x70] sm:$0xff] }
 0x157   : > { %3118 = vmatmul.msk.f32.gmra.mxu0 %vm645_vm0, %v621_v24 }
 0x159   : > { %1201 = vperm.xlu0 %3275, %v3739_v31  }
 0x15b   : > { %v3971_v48 = vpop.permute.xlu0 %1639 }
 0x15c   : > { %v4013_v24 = vpop.f32.mrf.mxu0 }
 0x15d   : > { %1827 = vrot.lane.b32.xlu1 %v1571_v46, %s3421_s7  ;;  %v1319_v46 = vadd.f32 %v1283_v55, %v1102_v51 }
 0x15e   : > { %1829 = vrot.lane.b32.xlu2 %v3976_v49, %s3421_s7 }
 0x15f   : > { %3276 = vset.pattern.permute.xlu2 %v5470_v26  ;;  %v1536_v7 = vadd.f32 %v1500_v33, %v1319_v46  ;;  %3119 = vmatmul.msk.f32.gmra.mxu0 %vm645_vm0, %v622_v58  ;;  %v623_v46 = vld [vmem:[%s3672_s18 + $0x80] sm:$0xff]  ;;  %v1105_v58 = vmul.f32 %v3884_v21, %v3860_v11 }
 0x161   : > { %3281 = vset.pattern.permute.xlu0 %v5470_v26  ;;  %v4003_v42 = vadd.f32 %v3896_v47, %v1536_v7 }
 0x162   : > { %1406 = vperm.xlu0 %3281, %v3725_v27  }
 0x163   : > { %v3989_v60 = vpop.permute.xlu0 %1390  ;;  %5474 = vst [vmem:[#allocation17_spill] sm:$0xff] %v4003_v42 }
 0x164   : > { %v1504_v11 = vmul.f32 %v3887_v22, %v3989_v60 }
 0x165   : > { %1649 = vrot.lane.b32.xlu1 %v3862_v12, %s3420_s29 }
 0x166   : > { %1394 = vperm.xlu2 %3276, %v3711_v23  }
 0x167   : > { %3120 = vmatmul.msk.f32.gmra.mxu0 %vm645_vm0, %v623_v46 }
 0x16a   : > { %1410 = vperm.xlu0 %3281, %v3999_v14  }
 0x16c   : > { %v1162_v29 = vpop.permute.xlu0 %1161 }
 0x16d   : > { %v1284_v18 = vmul.f32 %v3890_v25, %v1162_v29  ;;  %1651 = vrot.lane.b32.xlu1 %v3868_v15, %s3420_s29 }
 0x16e   : > { %1831 = vrot.lane.b32.xlu2 %v4003_v42, %s3421_s7  ;;  %v1106_v42 = vmul.f32 %v3884_v21, %v3836_v62 }
 0x16f   : > { %v1320_v23 = vadd.f32 %v1284_v18, %v1103_v19  ;;  %3121 = vmatmul.msk.f32.gmra.mxu0 %vm645_vm0, %v624_v6 }
 0x171   : > { %v1537_v55 = vadd.f32 %v1501_v34, %v1320_v23 }
 0x172   : > { %1663 = vrot.lane.b32.xlu0 %v4013_v24, %s3420_s29 }
 0x173   : > { %v4018_v51 = vadd.f32 %v3896_v47, %v1537_v55 }
 0x174   : > { %v1178_v18 = vpop.permute.xlu0 %1177 }
 0x175   : > { %5475 = vst [vmem:[#allocation18_spill] sm:$0xff] %v4018_v51  ;;  %1833 = vrot.lane.b32.xlu1 %v4018_v51, %s3421_s7 }
 0x176   : > { %1398 = vperm.xlu2 %3276, %v3732_v30  }
 0x17c   : > { %v1182_v46 = vpop.permute.xlu0 %1181 }
 0x17d   : > { %1402 = vperm.xlu1 %3278, %v3728_v28   ;;  %v1289_v62 = vmul.f32 %v3890_v25, %v1182_v46 }
 0x17e   : > { %3277 = vset.pattern.permute.xlu2 %v5469_v44 }
 0x17f   : > { %1185 = vperm.xlu2 %3277, %v3728_v28  }
 0x185   : > { %3279 = vset.pattern.permute.xlu1 %v5469_v44 }
 0x186   : > { %1189 = vperm.xlu1 %3279, %v3725_v27  }
 0x187   : > { %1655 = vrot.lane.b32.xlu2 %v3950_v53, %s3420_s29 }
 0x188   : > { %3280 = vset.pattern.permute.xlu2 %v5470_v26 }
 0x18e   : > { %1657 = vrot.lane.b32.xlu1 %v3958_v41, %s3420_s29 }
 0x18f   : > { %v4035_v30 = vpop.permute.xlu2 %1821 }
 0x196   : > { %1193 = vperm.xlu1 %3279, %v3999_v14  }
 0x197   : > { %v4038_v28 = vpop.permute.xlu2 %1825 }
 0x19e   : > { %1659 = vrot.lane.b32.xlu1 %v3973_v37, %s3420_s29 }
 0x19f   : > { %v4044_v27 = vpop.permute.xlu2 %1643  ;;  %3283 = vset.pattern.permute.xlu1 %v5470_v26 }
 0x1a0   : > { %v1820_v33 = vpop.permute.xlu1 %1819 }
 0x1a6   : > { %1661 = vrot.lane.b32.xlu1 %v3995_v0, %s3420_s29 }
 0x1a7   : > { %v1387_v7 = vpop.permute.xlu2 %1386 }
 0x1a8   : > { %v1503_v9 = vmul.f32 %v3887_v22, %v1387_v7 }
 0x1af   : > { %v4051_v29 = vpop.permute.xlu1 %1823 }
 0x1b0   : > { %v1174_v19 = vpop.permute.xlu2 %1173 }
 0x1b1   : > { %v1287_v37 = vmul.f32 %v3890_v25, %v1174_v19 }
 0x1b3   : > { %v1323_v10 = vadd.f32 %v1287_v37, %v1106_v42 }
 0x1b5   : > { %v1540_v7 = vadd.f32 %v1504_v11, %v1323_v10  ;;  %v1107_v11 = vmul.f32 %v3884_v21, %v3808_v52  ;;  %v1747_v52 = vsub.f32 %v3822_v56, %v3971_v48 }
 0x1b7   : > { %v1642_v34 = vpop.permute.xlu1 %1641 }
 0x1b8   : > { %v4053_v23 = vpop.permute.xlu2 %1829 }
 0x1bf   : > { %v1170_v55 = vpop.permute.xlu1 %1169 }
 0x1c0   : > { %v1286_v51 = vmul.f32 %v3890_v25, %v1170_v55  ;;  %v1395_v0 = vpop.permute.xlu2 %1394 }
 0x1c2   : > { %v1322_v6 = vadd.f32 %v1286_v51, %v1105_v58  ;;  %v4073_v51 = vpop.permute.xlu0 %1647  ;;  %v625_v58 = vld [vmem:[%s3672_s18 + $0x90] sm:$0xff] }
 0x1c3   : > { %3122 = vmatmul.msk.f32.gmra.mxu0 %vm645_vm0, %v625_v58 }
 0x1c4   : > { %v1539_v15 = vadd.f32 %v1503_v9, %v1322_v6  ;;  %v4077_v9 = vadd.f32 %v3896_v47, %v1540_v7  ;;  %v1288_v6 = vmul.f32 %v3890_v25, %v1178_v18  ;;  %v1505_v7 = vmul.f32 %v3887_v22, %v1395_v0 }
 0x1c6   : > { %v4063_v41 = vadd.f32 %v3896_v47, %v1539_v15  ;;  %5477 = vst [vmem:[#allocation20_spill] sm:$0xff] %v4077_v9  ;;  %v1108_v15 = vmul.f32 %v3884_v21, %v3870_v16 }
 0x1c7   : > { %v4065_v49 = vpop.permute.xlu1 %1645 }
 0x1c8   : > { %5476 = vst [vmem:[#allocation19_spill] sm:$0xff] %v4063_v41  ;;  %v4069_v55 = vpop.permute.xlu2 %1831  ;;  %1837 = vrot.lane.b32.xlu2 %v4063_v41, %s3421_s7  ;;  %v1325_v60 = vadd.f32 %v1289_v62, %v1108_v15  ;;  %v1324_v62 = vadd.f32 %v1288_v6, %v1107_v11  ;;  %v626_v15 = vld [vmem:[%s3672_s18 + $0x98] sm:$0xff]  ;;  %v897_v11 = vld [vmem:[%s3664_s28 + $0x90] sm:$0xff] }
 0x1ca   : > { %v4087_v10 = vpop.permute.xlu0 %1653  ;;  %v1541_v18 = vadd.f32 %v1505_v7, %v1324_v62  ;;  %v1109_v7 = vmul.f32 %v3884_v21, %v3844_v2 }
 0x1cb   : > { %3123 = vmatmul.msk.f32.gmra.mxu0 %vm645_vm0, %v626_v15 }
 0x1cc   : > { %v4109_v0 = vadd.f32 %v3896_v47, %v1541_v18 }
 0x1ce   : > { %5478 = vst [vmem:[#allocation21_spill] sm:$0xff] %v4109_v0 }
 0x1cf   : > { %v4081_v37 = vpop.permute.xlu1 %1827 }
 0x1d0   : > { %v1399_v42 = vpop.permute.xlu2 %1398  ;;  %1839 = vrot.lane.b32.xlu2 %v4077_v9, %s3421_s7 }
 0x1d1   : > { %v1506_v19 = vmul.f32 %v3887_v22, %v1399_v42 }
 0x1d2   : > { %v4103_v42 = vpop.permute.xlu0 %1835 }
 0x1d3   : > { %v1542_v46 = vadd.f32 %v1506_v19, %v1325_v60  ;;  %v1927_v60 = vadd.f32 %v1820_v33, %v1747_v52 }
 0x1d5   : > { %v4092_v16 = vadd.f32 %v3896_v47, %v1542_v46 }
 0x1d7   : > { %v4097_v9 = vpop.permute.xlu1 %1649  ;;  %1843 = vrot.lane.b32.xlu1 %v4092_v16, %s3421_s7 }
 0x1d8   : > { %1414 = vperm.xlu2 %3280, %v3742_v32   ;;  %v1748_v32 = vsub.f32 %v3831_v59, %v1642_v34 }
 0x1d9   : > { %v1186_v48 = vpop.permute.xlu2 %1185 }
 0x1da   : > { %v4115_v58 = vpop.permute.xlu0 %1197  ;;  %v1928_v46 = vadd.f32 %v4035_v30, %v1748_v32  ;;  %v1290_v33 = vmul.f32 %v3890_v25, %v1186_v48 }
 0x1dc   : > { %v1326_v15 = vadd.f32 %v1290_v33, %v1109_v7  ;;  %v627_v7 = vld [vmem:[%s3672_s18 + $0xa0] sm:$0xff] }
 0x1dd   : > { %3124 = vmatmul.msk.f32.gmra.mxu0 %vm645_vm0, %v627_v7 }
 0x1df   : > { %v1652_v19 = vpop.permute.xlu1 %1651  ;;  %2000 = vrot.lane.b32.xlu1 %v1927_v60, %s3422_s8 }
 0x1e0   : > { %1841 = vrot.lane.b32.xlu2 %v4109_v0, %s3421_s7 }
 0x1e2   : > { %v4126_v62 = vpop.permute.xlu0 %1201 }
 0x1e7   : > { %v4118_v6 = vpop.permute.xlu1 %1833  ;;  %2002 = vrot.lane.b32.xlu1 %v1928_v46, %s3422_s8  ;;  %v1110_v46 = vmul.f32 %v3884_v21, %v3816_v54 }
 0x1e8   : > { %1418 = vperm.xlu2 %3280, %v3739_v31   ;;  %v810_v31 = vpop.f32.mrf.mxu0 }
 0x1ea   : > { %v1407_v2 = vpop.permute.xlu0 %1406 }
 0x1eb   : > { %v1508_v48 = vmul.f32 %v3887_v22, %v1407_v2 }
 0x1ef   : > { %v1403_v34 = vpop.permute.xlu1 %1402  ;;  %1422 = vperm.xlu1 %3283, %v897_v11  }
 0x1f0   : > { %v1507_v30 = vmul.f32 %v3887_v22, %v1403_v34  ;;  %3282 = vset.pattern.permute.xlu2 %v5469_v44  ;;  %v5480_v34 = vmov 0  }
 0x1f1   : > { %1205 = vperm.xlu2 %3282, %v897_v11  }
 0x1f2   : > { %v1543_v18 = vadd.f32 %v1507_v30, %v1326_v15  ;;  %v1750_v15 = vsub.f32 %v3846_v3, %v4065_v49  ;;  %v635_v49 = vld [vmem:[%s3672_s18 + $0xe0] sm:$0xff] }
 0x1f3   : > { %3132 = vmatmul.msk.f32.vlgmr.msra.gmra.mxu3 %vm645_vm0, %v635_v49  ;;  %v602_v49 = vld [vmem:[%s5404_s3 + $0x8] sm:$0xff] }
 0x1f4   : > { %v1580_v52 = vadd.f32 %v3896_v47, %v1543_v18  ;;  %v813_v18 = vpop.f32.mrf.mxu0  ;;  %v1930_v54 = vadd.f32 %v4038_v28, %v1750_v15  ;;  %2158 = vmatpush.msra.mxu1 %v602_v49  ;;  %3222 = vmatpush.msrb.mxu3 %v602_v49 }
 0x1f6   : > { %v4131_v60 = vadd.f32 %v1580_v52, %v810_v31  ;;  %1845 = vrot.lane.b32.xlu0 %v1580_v52, %s3421_s7 }
 0x1f7   : > { %3284 = vset.pattern.permute.xlu1 %v5469_v44 }
 0x1f8   : > { %5479 = vst [vmem:[#allocation22_spill] sm:$0xff] %v4131_v60  ;;  %v1190_v32 = vpop.permute.xlu1 %1189  ;;  %1209 = vperm.xlu1 %3284, %v3754_v36  }
 0x1f9   : > { %v1291_v33 = vmul.f32 %v3890_v25, %v1190_v32  ;;  %1665 = vrot.lane.b32.xlu2 %v810_v31, %s3420_s29  ;;  %v1752_v32 = vsub.f32 %v3831_v59, %v4097_v9  ;;  %v1753_v9 = vsub.f32 %v3838_v63, %v1652_v19  ;;  %v636_v19 = vld [vmem:[%s3672_s18 + $0xe8] sm:$0xff] }
 0x1fa   : > { %3286 = vset.pattern.permute.xlu2 %v5480_v34 }
 0x1fb   : > { %v1327_v30 = vadd.f32 %v1291_v33, %v1110_v46  ;;  %v1932_v28 = vadd.f32 %v4053_v23, %v1752_v32  ;;  %v1933_v23 = vadd.f32 %v4069_v55, %v1753_v9  ;;  %v907_v33 = vld [vmem:[%s3664_s28 + $0xe0] sm:$0xff]  ;;  %3133 = vmatmul.msk.f32.gmra.mxu3 %vm645_vm0, %v636_v19  ;;  %v4198_v32 = vld [vmem:[%s3664_s28 + $0xd8] sm:$0xff] }
 0x1fc   : > { %v4178_v55 = vpop.f32.mrf.mxu0  ;;  %v601_v9 = vld [vmem:[%s5404_s3] sm:$0xff] }
 0x1fd   : > { %v1544_v52 = vadd.f32 %v1508_v48, %v1327_v30  ;;  %v1749_v48 = vsub.f32 %v3838_v63, %v4044_v27  ;;  %v628_v27 = vld [vmem:[%s3672_s18 + $0xa8] sm:$0xff]  ;;  %5482 = vst [vmem:[#allocation24_spill] sm:$0xff] %v4178_v55  ;;  %v4189_v30 = vld [vmem:[%s3664_s28 + $0xc0] sm:$0xff]  ;;  %2159 = vmatpush.msra.mxu1 %v601_v9  ;;  %3223 = vmatpush.msrb.mxu3 %v601_v9 }
 0x1fe   : > { %1426 = vperm.xlu0 %3281, %v3754_v36   ;;  %v1751_v36 = vsub.f32 %v3822_v56, %v4073_v51  ;;  %3125 = vmatmul.msk.f32.gmra.mxu0 %vm645_vm0, %v628_v27 }
 0x1ff   : > { %v1581_v2 = vadd.f32 %v3896_v47, %v1544_v52  ;;  %v1929_v51 = vadd.f32 %v4051_v29, %v1749_v48  ;;  %v900_v29 = vld [vmem:[%s3664_s28 + $0xa8] sm:$0xff]  ;;  %v1112_v48 = vmul.f32 %v3884_v21, %v3849_v4 }
 0x200   : > { %1667 = vrot.lane.b32.xlu1 %v813_v18, %s3420_s29  ;;  %v1931_v46 = vadd.f32 %v4081_v37, %v1751_v36  ;;  %v1656_v37 = vpop.permute.xlu2 %1655  ;;  %v1293_v36 = vmul.f32 %v3890_v25, %v4115_v58  ;;  %v1754_v58 = vsub.f32 %v3846_v3, %v4087_v10  ;;  %v1294_v10 = vmul.f32 %v3890_v25, %v4126_v62 }
 0x201   : > { %v4150_v31 = vadd.f32 %v1581_v2, %v813_v18  ;;  %2006 = vrot.lane.b32.xlu2 %v1930_v54, %s3422_s8  ;;  %v1755_v15 = vsub.f32 %v3822_v56, %v1656_v37  ;;  %v637_v54 = vld [vmem:[%s3672_s18 + $0xf0] sm:$0xff] }
 0x203   : > { %5481 = vst [vmem:[#allocation23_spill] sm:$0xff] %v4150_v31  ;;  %v1935_v18 = vadd.f32 %v4103_v42, %v1755_v15  ;;  %3134 = vmatmul.msk.f32.gmra.mxu3 %vm645_vm0, %v637_v54 }
 0x206   : > { %3285 = vset.pattern.permute.xlu0 %v5480_v34 }
 0x207   : > { %992 = vperm.xlu0 %3285, %v3999_v14   ;;  %v1658_v14 = vpop.permute.xlu1 %1657 }
 0x208   : > { %2010 = vrot.lane.b32.xlu1 %v1932_v28, %s3422_s8  ;;  %v1756_v42 = vsub.f32 %v3831_v59, %v1658_v14  ;;  %v1934_v14 = vadd.f32 %v4118_v6, %v1754_v58  ;;  %v1113_v6 = vmul.f32 %v3884_v21, %v3826_v57  ;;  %v629_v57 = vld [vmem:[%s3672_s18 + $0xb0] sm:$0xff] }
 0x209   : > { %2008 = vrot.lane.b32.xlu2 %v1931_v46, %s3422_s8  ;;  %v4208_v46 = vld [vmem:[%s3664_s28 + $0xe8] sm:$0xff]  ;;  %3126 = vmatmul.msk.f32.gmra.mxu0 %vm645_vm0, %v629_v57  ;;  %v1115_v57 = vmul.f32 %v3884_v21, %v3858_v8 }
 0x20f   : > { %2004 = vrot.lane.b32.xlu0 %v1929_v51, %s3422_s8 }
 0x210   : > { %2012 = vrot.lane.b32.xlu1 %v1933_v23, %s3422_s8  ;;  %v1329_v23 = vadd.f32 %v1293_v36, %v1112_v48  ;;  %v638_v48 = vld [vmem:[%s3672_s18 + $0xf8] sm:$0xff] }
 0x211   : > { %1057 = vperm.xlu2 %3286, %v907_v33   ;;  %3135 = vmatmul.msk.f32.gmra.mxu3 %vm645_vm0, %v638_v48 }
 0x217   : > { %1007 = vperm.xlu0 %3285, %v897_v11   ;;  %v4185_v11 = vpop.permute.xlu1 %1193 }
 0x218   : > { %1245 = vperm.xlu1 %3284, %v907_v33  }
 0x219   : > { %1847 = vrot.lane.b32.xlu2 %v1581_v2, %s3421_s7 }
 0x21a   : > { %3289 = vset.pattern.permute.xlu2 %v5470_v26 }
 0x21f   : > { %1022 = vperm.xlu0 %3285, %v900_v29   ;;  %v1660_v2 = vpop.permute.xlu1 %1659 }
 0x220   : > { %3287 = vset.pattern.permute.xlu1 %v5470_v26  ;;  %v1757_v54 = vsub.f32 %v3838_v63, %v1660_v2  ;;  %v1411_v2 = vpop.permute.xlu0 %1410 }
 0x221   : > { %1462 = vperm.xlu1 %3287, %v907_v33   ;;  %1669 = vrot.lane.b32.xlu2 %v4178_v55, %s3420_s29 }
 0x222   : > { %v1838_v7 = vpop.permute.xlu2 %1837 }
 0x223   : > { %v1936_v28 = vadd.f32 %v1838_v7, %v1756_v42 }
 0x227   : > { %1037 = vperm.xlu0 %3285, %v4189_v30   ;;  %v1662_v27 = vpop.permute.xlu1 %1661 }
 0x228   : > { %v1758_v4 = vsub.f32 %v3846_v3, %v1662_v27  ;;  %v639_v27 = vld [vmem:[%s3672_s18 + $0x100] sm:$0xff] }
 0x229   : > { %1430 = vperm.xlu1 %3287, %v3751_v35   ;;  %2016 = vrot.lane.b32.xlu2 %v1935_v18, %s3422_s8  ;;  %v1330_v18 = vadd.f32 %v1294_v10, %v1113_v6  ;;  %v911_v10 = vld [vmem:[%s3664_s28 + $0x100] sm:$0xff] }
 0x22a   : > { %v1840_v52 = vpop.permute.xlu2 %1839  ;;  %3136 = vmatmul.msk.f32.gmra.mxu3 %vm645_vm0, %v639_v27  ;;  %v1292_v27 = vmul.f32 %v3890_v25, %v4185_v11 }
 0x22b   : > { %v1937_v42 = vadd.f32 %v1840_v52, %v1757_v54  ;;  %v4248_v52 = vld [vmem:[%s3664_s28 + $0xf8] sm:$0xff] }
 0x22f   : > { %1052 = vperm.xlu0 %3285, %v4198_v32  }
 0x231   : > { %3288 = vset.pattern.permute.xlu1 %v5469_v44  ;;  %2018 = vrot.lane.b32.xlu2 %v1936_v28, %s3422_s8  ;;  %v909_v28 = vld [vmem:[%s3664_s28 + $0xf0] sm:$0xff] }
 0x232   : > { %v1415_v51 = vpop.permute.xlu2 %1414  ;;  %1249 = vperm.xlu1 %3288, %v4208_v46  }
 0x233   : > { %v1510_v33 = vmul.f32 %v3887_v22, %v1415_v51  ;;  %v1664_v51 = vpop.permute.xlu0 %1663 }
 0x235   : > { %v4222_v37 = vadd.f32 %v1510_v33, %v1329_v23  ;;  %v1759_v33 = vsub.f32 %v3822_v56, %v1664_v51 }
 0x237   : > { %2014 = vrot.lane.b32.xlu0 %v1934_v14, %s3422_s8 }
 0x23a   : > { %v1842_v19 = vpop.permute.xlu2 %1841  ;;  %1217 = vperm.xlu1 %3288, %v900_v29  }
 0x23b   : > { %v4226_v7 = vadd.f32 %v1842_v19, %v1758_v4 }
 0x23f   : > { %1062 = vperm.xlu0 %3285, %v4208_v46  }
 0x242   : > { %v1419_v15 = vpop.permute.xlu2 %1418  ;;  %3290 = vset.pattern.permute.xlu1 %v5470_v26 }
 0x243   : > { %v1511_v49 = vmul.f32 %v3887_v22, %v1419_v15  ;;  %1434 = vperm.xlu1 %3290, %v900_v29   ;;  %v630_v29 = vld [vmem:[%s3672_s18 + $0xb8] sm:$0xff] }
 0x244   : > { %3127 = vmatmul.msk.f32.gmra.mxu0 %vm645_vm0, %v630_v29 }
 0x245   : > { %v4236_v36 = vadd.f32 %v1511_v49, %v1330_v18  ;;  %v4266_v49 = vld [vmem:[%s3664_s28 + $0x108] sm:$0xff] }
 0x247   : > { %2020 = vrot.lane.b32.xlu0 %v1937_v42, %s3422_s8  ;;  %v631_v42 = vld [vmem:[%s3672_s18 + $0xc0] sm:$0xff] }
 0x249   : > { %v1844_v62 = vpop.permute.xlu1 %1843 }
 0x24a   : > { %v1939_v14 = vadd.f32 %v1844_v62, %v1759_v33 }
 0x24b   : > { %3291 = vset.pattern.permute.xlu1 %v5469_v44  ;;  %v1206_v58 = vpop.permute.xlu2 %1205 }
 0x24c   : > { %1253 = vperm.xlu1 %3291, %v909_v28   ;;  %3128 = vmatmul.msk.f32.gmra.mxu0 %vm645_vm0, %v631_v42 }
 0x24f   : > { %1067 = vperm.xlu0 %3285, %v909_v28  }
 0x251   : > { %v2001_v9 = vpop.permute.xlu1 %2000 }
 0x252   : > { %3140 = vmatmul.msk.f32.vlgmr.msra.gmra.mxu1 %vm645_vm0, %v2001_v9 }
 0x253   : > { %v1666_v19 = vpop.permute.xlu2 %1665 }
 0x254   : > { %3292 = vset.pattern.permute.xlu1 %v5470_v26  ;;  %v1760_v6 = vsub.f32 %v3831_v59, %v1666_v19 }
 0x255   : > { %1470 = vperm.xlu1 %3292, %v909_v28  }
 0x257   : > { %1072 = vperm.xlu0 %3285, %v4248_v52  }
 0x259   : > { %v2003_v23 = vpop.permute.xlu1 %2002 }
 0x25a   : > { %3141 = vmatmul.msk.f32.gmra.mxu1 %vm645_vm0, %v2003_v23  ;;  %v4276_v23 = vpop.f32.mrf.mxu0 }
 0x25b   : > { %v2007_v62 = vpop.permute.xlu2 %2006 }
 0x25d   : > { %1438 = vperm.xlu1 %3292, %v3766_v40  }
 0x25f   : > { %2024 = vrot.lane.b32.xlu0 %v1939_v14, %s3422_s8 }
 0x261   : > { %v1423_v4 = vpop.permute.xlu1 %1422 }
 0x263   : > { %v2009_v14 = vpop.permute.xlu2 %2008 }
 0x265   : > { %3293 = vset.pattern.permute.xlu1 %v5469_v44 }
 0x266   : > { %1257 = vperm.xlu1 %3293, %v4248_v52  }
 0x267   : > { %1077 = vperm.xlu0 %3285, %v911_v10  }
 0x268   : > { %v1846_v15 = vpop.permute.xlu0 %1845 }
 0x269   : > { %v4263_v18 = vadd.f32 %v1846_v15, %v1760_v6  ;;  %v4287_v15 = vpop.f32.mrf.mxu0 }
 0x26a   : > { %v1210_v54 = vpop.permute.xlu1 %1209  ;;  %5483 = vst [vmem:[#allocation25_spill] sm:$0xff] %v4287_v15 }
 0x26b   : > { %v1296_v28 = vmul.f32 %v3890_v25, %v1210_v54  ;;  %v1509_v54 = vmul.f32 %v3887_v22, %v1411_v2  ;;  %v632_v2 = vld [vmem:[%s3672_s18 + $0xc8] sm:$0xff] }
 0x26c   : > { %3129 = vmatmul.msk.f32.gmra.mxu0 %vm645_vm0, %v632_v2  ;;  %v3385_v2 = vld [vmem:[%s3664_s28 + $0xc8] sm:$0xff] }
 0x26d   : > { %v1332_v29 = vadd.f32 %v1296_v28, %v1115_v57 }
 0x26e   : > { %1225 = vperm.xlu1 %3293, %v3763_v39  }
 0x26f   : > { %1082 = vperm.xlu0 %3285, %v4266_v49  }
 0x270   : > { %v1427_v9 = vpop.permute.xlu0 %1426 }
 0x271   : > { %v1513_v48 = vmul.f32 %v3887_v22, %v1427_v9  ;;  %v4298_v9 = vpop.f32.mrf.mxu0 }
 0x272   : > { %v1668_v51 = vpop.permute.xlu1 %1667  ;;  %5485 = vst [vmem:[#allocation27_spill] sm:$0xff] %v4298_v9 }
 0x273   : > { %v4278_v33 = vadd.f32 %v1513_v48, %v1332_v29  ;;  %v1295_v29 = vmul.f32 %v3890_v25, %v1206_v58  ;;  %v1512_v48 = vmul.f32 %v3887_v22, %v1423_v4 }
 0x276   : > { %3294 = vset.pattern.permute.xlu1 %v5470_v26  ;;  %v4468_v41 = vpop.f32.mrf.mxu3 }
 0x277   : > { %3297 = vset.pattern.permute.xlu0 %v5469_v44  ;;  %1442 = vperm.xlu1 %3294, %v3763_v39   ;;  %v1058_v39 = vpop.permute.xlu2 %1057  ;;  %5493 = vst [vmem:[#allocation35_spill] sm:$0xff] %v4468_v41 }
 0x278   : > { %1213 = vperm.xlu0 %3297, %v3751_v35  }
 0x279   : > { %v993_v8 = vpop.permute.xlu0 %992  ;;  %v4310_v58 = vpop.f32.mrf.mxu0 }
 0x27a   : > { %v1111_v19 = vmul.f32 %v3884_v21, %v993_v8  ;;  %v2011_v6 = vpop.permute.xlu1 %2010  ;;  %v1761_v8 = vsub.f32 %v3838_v63, %v1668_v51  ;;  %5486 = vst [vmem:[#allocation28_spill] sm:$0xff] %v4310_v58 }
 0x27c   : > { %v1328_v42 = vadd.f32 %v1292_v27, %v1111_v19 }
 0x27e   : > { %v1545_v28 = vadd.f32 %v1509_v54, %v1328_v42 }
 0x27f   : > { %3295 = vset.pattern.permute.xlu1 %v5469_v44  ;;  %v1848_v54 = vpop.permute.xlu2 %1847 }
 0x280   : > { %1221 = vperm.xlu0 %3297, %v3766_v40   ;;  %1261 = vperm.xlu1 %3295, %v911_v10   ;;  %v4293_v35 = vadd.f32 %v3896_v47, %v1545_v28  ;;  %v1941_v28 = vadd.f32 %v1848_v54, %v1761_v8  ;;  %v4357_v54 = vld [vmem:[%s3664_s28 + $0x118] sm:$0xff] }
 0x281   : > { %v2005_v11 = vpop.permute.xlu0 %2004 }
 0x282   : > { %5484 = vst [vmem:[#allocation26_spill] sm:$0xff] %v4293_v35  ;;  %3142 = vmatmul.msk.f32.gmra.mxu1 %vm645_vm0, %v2005_v11  ;;  %v2013_v57 = vpop.permute.xlu1 %2012  ;;  %1849 = vrot.lane.b32.xlu2 %v4293_v35, %s3421_s7  ;;  %v641_v35 = vld [vmem:[%s3672_s18 + $0x110] sm:$0xff] }
 0x287   : > { %v4353_v8 = vpop.permute.xlu2 %1669 }
 0x288   : > { %1229 = vperm.xlu0 %3297, %v4189_v30   ;;  %3296 = vset.pattern.permute.xlu1 %v5470_v26 }
 0x289   : > { %v1008_v40 = vpop.permute.xlu0 %1007  ;;  %1478 = vperm.xlu1 %3296, %v911_v10   ;;  %v4321_v10 = vpop.f32.mrf.mxu0 }
 0x28a   : > { %v1114_v27 = vmul.f32 %v3884_v21, %v1008_v40  ;;  %3143 = vmatmul.msk.f32.gmra.mxu1 %vm645_vm0, %v2007_v62  ;;  %1466 = vperm.xlu2 %3289, %v4208_v46   ;;  %v1246_v19 = vpop.permute.xlu1 %1245  ;;  %5487 = vst [vmem:[#allocation29_spill] sm:$0xff] %v4321_v10  ;;  %v4327_v62 = vadd.f32 %v3896_v47, %v4222_v37  ;;  %v640_v40 = vld [vmem:[%s3672_s18 + $0x108] sm:$0xff] }
 0x28b   : > { %3137 = vmatmul.msk.f32.gmra.mxu3 %vm645_vm0, %v640_v40 }
 0x28c   : > { %v1331_v42 = vadd.f32 %v1295_v29, %v1114_v27  ;;  %v633_v29 = vld [vmem:[%s3672_s18 + $0xd0] sm:$0xff]  ;;  %v1305_v27 = vmul.f32 %v3890_v25, %v1246_v19 }
 0x28d   : > { %3130 = vmatmul.msk.f32.gmra.mxu0 %vm645_vm0, %v633_v29  ;;  %v4372_v29 = vadd.f32 %v3896_v47, %v4236_v36 }
 0x28e   : > { %v4312_v11 = vadd.f32 %v1512_v48, %v1331_v42  ;;  %v1124_v48 = vmul.f32 %v3884_v21, %v1058_v39 }
 0x28f   : > { %5488 = vst [vmem:[#allocation30_spill] sm:$0xff] %v4372_v29 }
 0x290   : > { %2028 = vrot.lane.b32.xlu0 %v1941_v28, %s3422_s8  ;;  %v2017_v28 = vpop.permute.xlu2 %2016 }
 0x291   : > { %v4315_v4 = vpop.permute.xlu0 %1022  ;;  %1446 = vperm.xlu1 %3296, %v4189_v30  }
 0x292   : > { %3144 = vmatmul.msk.f32.gmra.mxu1 %vm645_vm0, %v2009_v14  ;;  %1671 = vrot.lane.b32.xlu2 %v4276_v23, %s3420_s29  ;;  %v4339_v14 = vld [vmem:[%s3664_s28 + $0x110] sm:$0xff] }
 0x293   : > { %v1463_v46 = vpop.permute.xlu1 %1462  ;;  %3138 = vmatmul.msk.f32.gmra.mxu3 %vm645_vm0, %v641_v35 }
 0x298   : > { %1679 = vrot.lane.b32.xlu0 %v4321_v10, %s3420_s29 }
 0x299   : > { %v4329_v51 = vpop.permute.xlu0 %1037  ;;  %3298 = vset.pattern.permute.xlu1 %v5469_v44 }
 0x29a   : > { %1265 = vperm.xlu1 %3298, %v4266_v49   ;;  %3145 = vmatmul.msk.f32.gmra.mxu1 %vm645_vm0, %v2011_v6  ;;  %v1120_v10 = vmul.f32 %v3884_v21, %v4329_v51 }
 0x29b   : > { %1851 = vrot.lane.b32.xlu2 %v4327_v62, %s3421_s7  ;;  %v4336_v30 = vpop.permute.xlu1 %1430 }
 0x2a0   : > { %1269 = vperm.xlu0 %3297, %v4339_v14  }
 0x2a1   : > { %v4342_v37 = vpop.permute.xlu0 %1052 }
 0x2a2   : > { %1233 = vperm.xlu1 %3298, %v3385_v2   ;;  %3146 = vmatmul.msk.f32.gmra.mxu1 %vm645_vm0, %v2013_v57  ;;  %v1522_v57 = vmul.f32 %v3887_v22, %v1463_v46 }
 0x2a3   : > { %2022 = vrot.lane.b32.xlu2 %v4226_v7, %s3422_s8  ;;  %v1341_v7 = vadd.f32 %v1305_v27, %v1124_v48  ;;  %v604_v48 = vld [vmem:[%s5404_s3 + $0x18] sm:$0xff]  ;;  %v2019_v27 = vpop.permute.xlu2 %2018 }
 0x2a4   : > { %v4348_v6 = vpop.permute.xlu1 %1249  ;;  %2428 = vmatpush.msra.mxu2 %v604_v48  ;;  %3224 = vmatpush.msra.mxu3 %v604_v48 }
 0x2a5   : > { %v1558_v19 = vadd.f32 %v1522_v57, %v1341_v7 }
 0x2a7   : > { %v4375_v46 = vadd.f32 %v3896_v47, %v1558_v19 }
 0x2a8   : > { %1273 = vperm.xlu0 %3297, %v4357_v54  }
 0x2a9   : > { %v2015_v42 = vpop.permute.xlu0 %2014  ;;  %5489 = vst [vmem:[#allocation31_spill] sm:$0xff] %v4375_v46 }
 0x2aa   : > { %3299 = vset.pattern.permute.xlu1 %v5470_v26  ;;  %3147 = vmatmul.msk.f32.gmra.mxu1 %vm645_vm0, %v2015_v42 }
 0x2ab   : > { %1673 = vrot.lane.b32.xlu2 %v4287_v15, %s3420_s29  ;;  %1450 = vperm.xlu1 %3299, %v3385_v2   ;;  %v4383_v2 = vld [vmem:[%s3664_s28 + $0xd0] sm:$0xff] }
 0x2ac   : > { %v4367_v39 = vpop.permute.xlu1 %1217 }
 0x2b0   : > { %3303 = vset.pattern.permute.xlu0 %v5470_v26  ;;  %v603_v26 = vld [vmem:[%s5404_s3 + $0x10] sm:$0xff] }
 0x2b1   : > { %v4377_v40 = vpop.permute.xlu0 %1062  ;;  %1454 = vperm.xlu0 %3303, %v4383_v2   ;;  %2429 = vmatpush.msra.mxu2 %v603_v26 }
 0x2b2   : > { %3148 = vmatmul.msk.f32.gmra.mxu1 %vm645_vm0, %v2017_v28  ;;  %3225 = vmatpush.msra.mxu3 %v603_v26 }
 0x2b3   : > { %1853 = vrot.lane.b32.xlu2 %v4372_v29, %s3421_s7  ;;  %1875 = vrot.lane.b32.xlu1 %v4375_v46, %s3421_s7  ;;  %v1514_v29 = vmul.f32 %v3887_v22, %v4336_v30  ;;  %v4499_v46 = vpop.f32.mrf.mxu3 }
 0x2b5   : > { %v4394_v36 = vpop.permute.xlu1 %1434 }
 0x2b9   : > { %v2021_v7 = vpop.permute.xlu0 %2020  ;;  %1458 = vperm.xlu0 %3303, %v4198_v32  }
 0x2ba   : > { %3149 = vmatmul.msk.f32.gmra.mxu1 %vm645_vm0, %v2019_v27 }
 0x2bb   : > { %1474 = vperm.xlu2 %3289, %v4248_v52   ;;  %v4411_v52 = vadd.f32 %v3896_v47, %v4312_v11 }
 0x2bd   : > { %5490 = vst [vmem:[#allocation32_spill] sm:$0xff] %v4411_v52 }
 0x2be   : > { %v1254_v57 = vpop.permute.xlu1 %1253 }
 0x2bf   : > { %v1307_v42 = vmul.f32 %v3890_v25, %v1254_v57 }
 0x2c1   : > { %v1068_v19 = vpop.permute.xlu0 %1067 }
 0x2c2   : > { %v1126_v28 = vmul.f32 %v3884_v21, %v1068_v19  ;;  %3150 = vmatmul.msk.f32.gmra.mxu1 %vm645_vm0, %v2021_v7  ;;  %v4419_v7 = vperm.slane %v3879_v20, 4 }
 0x2c3   : > { %1675 = vrot.lane.b32.xlu2 %v4298_v9, %s3420_s29 }
 0x2c4   : > { %v4404_v48 = vadd.f32 %v1307_v42, %v1126_v28  ;;  %v634_v28 = vld [vmem:[%s3672_s18 + $0xd8] sm:$0xff] }
 0x2c5   : > { %3131 = vmatmul.msk.f32.gmra.mxu0 %vm645_vm0, %v634_v28 }
 0x2c7   : > { %v4406_v26 = vpop.permute.xlu1 %1470 }
 0x2c9   : > { %v4413_v27 = vpop.permute.xlu0 %1072 }
 0x2cb   : > { %1855 = vrot.lane.b32.xlu2 %v4411_v52, %s3421_s7  ;;  %v1116_v52 = vmul.f32 %v3884_v21, %v3834_v61 }
 0x2cf   : > { %v2161_v57 = vpop.f32.mrf.mxu1  ;;  %v4421_v42 = vpop.permute.xlu1 %1438 }
 0x2d0   : > { %v2162_v19 = vadd.f32 %v2161_v57, %v4419_v7 }
 0x2d1   : > { %v4425_v55 = vpop.permute.xlu0 %2024 }
 0x2d2   : > { %v2269_v11 = vmax.f32 %v2162_v19, 0.0 }
 0x2d3   : > { %2026 = vrot.lane.b32.xlu2 %v4263_v18, %s3422_s8  ;;  %v4445_v18 = vadd.f32 %v3896_v47, %v4278_v33 }
 0x2d4   : > { %3176 = vmatmul.msk.f32.vlgmr.msra.gmra.mxu2 %vm645_vm0, %v2269_v11 }
 0x2d5   : > { %5491 = vst [vmem:[#allocation33_spill] sm:$0xff] %v4445_v18 }
 0x2d7   : > { %v2164_v35 = vpop.f32.mrf.mxu1 }
 0x2d8   : > { %v2165_v20 = vadd.f32 %v2164_v35, %v4419_v7  ;;  %v4432_v0 = vpop.permute.xlu1 %1257 }
 0x2d9   : > { %v4434_v31 = vpop.permute.xlu0 %1077 }
 0x2da   : > { %v2270_v57 = vmax.f32 %v2165_v20, 0.0  ;;  %v642_v20 = vld [vmem:[%s3672_s18 + $0x118] sm:$0xff] }
 0x2db   : > { %1677 = vrot.lane.b32.xlu2 %v4310_v58, %s3420_s29  ;;  %3139 = vmatmul.msk.f32.gmra.mxu3 %vm645_vm0, %v642_v20 }
 0x2dc   : > { %3177 = vmatmul.msk.f32.gmra.mxu2 %vm645_vm0, %v2270_v57  ;;  %v4439_v19 = vpop.permute.xlu2 %1849 }
 0x2e0   : > { %v4441_v28 = vpop.permute.xlu1 %1225 }
 0x2e1   : > { %v4447_v11 = vpop.permute.xlu0 %1082 }
 0x2e3   : > { %1857 = vrot.lane.b32.xlu2 %v4445_v18, %s3421_s7  ;;  %v4463_v18 = vpop.f32.mrf.mxu0 }
 0x2e4   : > { %v1467_v35 = vpop.permute.xlu2 %1466 }
 0x2e9   : > { %v4453_v58 = vpop.permute.xlu1 %1442 }
 0x2ea   : > { %v1214_v57 = vpop.permute.xlu0 %1213 }
 0x2eb   : > { %v1297_v9 = vmul.f32 %v3890_v25, %v1214_v57  ;;  %1482 = vperm.xlu2 %3289, %v4266_v49   ;;  %v4479_v49 = vpop.f32.mrf.mxu0 }
 0x2ec   : > { %v4459_v33 = vpop.permute.xlu2 %1671  ;;  %5494 = vst [vmem:[#allocation36_spill] sm:$0xff] %v4479_v49 }
 0x2ed   : > { %v1333_v15 = vadd.f32 %v1297_v9, %v1116_v52  ;;  %v1125_v52 = vmul.f32 %v3884_v21, %v4377_v40 }
 0x2ef   : > { %v1550_v60 = vadd.f32 %v1514_v29, %v1333_v15  ;;  %v1306_v29 = vmul.f32 %v3890_v25, %v4348_v6 }
 0x2f1   : > { %v4466_v20 = vadd.f32 %v3896_v47, %v1550_v60 }
 0x2f2   : > { %v4470_v12 = vpop.permute.xlu1 %1261  ;;  %v4472_v61 = vpop.permute.xlu0 %1221 }
 0x2f3   : > { %5492 = vst [vmem:[#allocation34_spill] sm:$0xff] %v4466_v20  ;;  %1695 = vrot.lane.b32.xlu2 %v4468_v41, %s3420_s29  ;;  %1859 = vrot.lane.b32.xlu1 %v4466_v20, %s3421_s7  ;;  %v4492_v57 = vpop.f32.mrf.mxu0  ;;  %v1342_v41 = vadd.f32 %v1306_v29, %v1125_v52 }
 0x2f4   : > { %3300 = vset.pattern.permute.xlu2 %v5480_v34  ;;  %5495 = vst [vmem:[#allocation37_spill] sm:$0xff] %v4492_v57 }
 0x2f5   : > { %v4481_v15 = vpop.permute.xlu2 %1851 }
 0x2fa   : > { %v1230_v9 = vpop.permute.xlu0 %1229 }
 0x2fb   : > { %1087 = vperm.xlu2 %3300, %v4339_v14   ;;  %1486 = vperm.xlu1 %3299, %v4339_v14   ;;  %v4485_v60 = vpop.permute.xlu1 %1478  ;;  %v1301_v50 = vmul.f32 %v3890_v25, %v1230_v9  ;;  %v1523_v14 = vmul.f32 %v3887_v22, %v1467_v35  ;;  %v4511_v52 = vpop.f32.mrf.mxu0 }
 0x2fd   : > { %v2023_v30 = vpop.permute.xlu2 %2022  ;;  %v1337_v40 = vadd.f32 %v1301_v50, %v1120_v10  ;;  %v1762_v50 = vsub.f32 %v3846_v3, %v4353_v8 }
 0x2fe   : > { %3151 = vmatmul.msk.f32.gmra.mxu1 %vm645_vm0, %v2023_v30 }
 0x2ff   : > { %v2167_v45 = vpop.f32.mrf.mxu1 }
 0x300   : > { %v2168_v20 = vadd.f32 %v2167_v45, %v4419_v7  ;;  %v1559_v45 = vadd.f32 %v1523_v14, %v1342_v41  ;;  %v1117_v41 = vmul.f32 %v3884_v21, %v4315_v4 }
 0x302   : > { %v2271_v30 = vmax.f32 %v2168_v20, 0.0  ;;  %v1298_v20 = vmul.f32 %v3890_v25, %v4367_v39  ;;  %v4524_v14 = vadd.f32 %v3896_v47, %v1559_v45  ;;  %v1942_v39 = vadd.f32 %v4439_v19, %v1762_v50 }
 0x303   : > { %3301 = vset.pattern.permute.xlu2 %v5469_v44  ;;  %1697 = vrot.lane.b32.xlu1 %v4499_v46, %s3420_s29  ;;  %v1447_v6 = vpop.permute.xlu1 %1446 }
 0x304   : > { %v1518_v9 = vmul.f32 %v3887_v22, %v1447_v6  ;;  %1237 = vperm.xlu2 %3301, %v4383_v2   ;;  %3178 = vmatmul.msk.f32.gmra.mxu2 %vm645_vm0, %v2271_v30  ;;  %v1334_v6 = vadd.f32 %v1298_v20, %v1117_v41 }
 0x305   : > { %v1674_v35 = vpop.permute.xlu2 %1673 }
 0x306   : > { %v1554_v51 = vadd.f32 %v1518_v9, %v1337_v40  ;;  %3152 = vmatmul.msk.f32.gmra.mxu1 %vm645_vm0, %v4425_v55  ;;  %v1515_v55 = vmul.f32 %v3887_v22, %v4394_v36  ;;  %v1764_v40 = vsub.f32 %v3831_v59, %v1674_v35  ;;  %v4544_v35 = vpop.f32.mrf.mxu3 }
 0x307   : > { %v2170_v29 = vpop.f32.mrf.mxu1  ;;  %5496 = vst [vmem:[#allocation38_spill] sm:$0xff] %v4544_v35 }
 0x308   : > { %v2171_v10 = vadd.f32 %v2170_v29, %v4419_v7  ;;  %v4517_v2 = vadd.f32 %v3896_v47, %v1554_v51  ;;  %v1551_v36 = vadd.f32 %v1515_v55, %v1334_v6  ;;  %v1308_v29 = vmul.f32 %v3890_v25, %v4432_v0 }
 0x30a   : > { %v2272_v30 = vmax.f32 %v2171_v10, 0.0  ;;  %v4529_v8 = vadd.f32 %v4517_v2, %v4511_v52  ;;  %v4542_v20 = vadd.f32 %v3896_v47, %v1551_v36 }
 0x30b   : > { %1877 = vrot.lane.b32.xlu1 %v4524_v14, %s3421_s7 }
 0x30c   : > { %2030 = vrot.lane.b32.xlu2 %v1942_v39, %s3422_s8  ;;  %3179 = vmatmul.msk.f32.gmra.mxu2 %vm645_vm0, %v2272_v30  ;;  %v4536_v4 = vpop.permute.xlu1 %1265 }
 0x30d   : > { %v1854_v9 = vpop.permute.xlu2 %1853  ;;  %3302 = vset.pattern.permute.xlu2 %v5480_v34  ;;  %v1127_v34 = vmul.f32 %v3884_v21, %v4413_v27 }
 0x30e   : > { %v1944_v19 = vadd.f32 %v1854_v9, %v1764_v40  ;;  %v4557_v40 = vpop.f32.mrf.mxu3 }
 0x30f   : > { %v2173_v45 = vpop.f32.mrf.mxu1  ;;  %v1344_v55 = vadd.f32 %v1308_v29, %v1127_v34  ;;  %5497 = vst [vmem:[#allocation39_spill] sm:$0xff] %v4557_v40 }
 0x310   : > { %v2174_v51 = vadd.f32 %v2173_v45, %v4419_v7  ;;  %2034 = vrot.lane.b32.xlu0 %v1944_v19, %s3422_s8  ;;  %v1121_v19 = vmul.f32 %v3884_v21, %v3872_v17  ;;  %v1524_v17 = vmul.f32 %v3887_v22, %v4406_v26 }
 0x312   : > { %v2273_v50 = vmax.f32 %v2174_v51, 0.0 }
 0x313   : > { %1861 = vrot.lane.b32.xlu1 %v4542_v20, %s3421_s7 }
 0x314   : > { %1681 = vrot.lane.b32.xlu2 %v4463_v18, %s3420_s29  ;;  %3180 = vmatmul.msk.f32.gmra.mxu2 %vm645_vm0, %v2273_v50  ;;  %v1234_v10 = vpop.permute.xlu1 %1233 }
 0x315   : > { %v1475_v41 = vpop.permute.xlu2 %1474  ;;  %v1302_v36 = vmul.f32 %v3890_v25, %v1234_v10 }
 0x316   : > { %v1525_v39 = vmul.f32 %v3887_v22, %v1475_v41 }
 0x317   : > { %v2176_v30 = vpop.f32.mrf.mxu1  ;;  %v1338_v29 = vadd.f32 %v1302_v36, %v1121_v19 }
 0x318   : > { %v1561_v6 = vadd.f32 %v1525_v39, %v1344_v55  ;;  %v2177_v0 = vadd.f32 %v2176_v30, %v4419_v7  ;;  %v846_v55 = vpop.f32.mrf.mxu0 }
 0x31a   : > { %v2274_v9 = vmax.f32 %v2177_v0, 0.0  ;;  %v4561_v27 = vadd.f32 %v3896_v47, %v1561_v6  ;;  %v1560_v0 = vadd.f32 %v1524_v17, %v4404_v48  ;;  %v1300_v48 = vmul.f32 %v3890_v25, %v4441_v28 }
 0x31b   : > { %1490 = vperm.xlu1 %3299, %v4357_v54   ;;  %v1516_v17 = vmul.f32 %v3887_v22, %v4421_v42 }
 0x31c   : > { %5498 = vst [vmem:[#allocation40_spill] sm:$0xff] %v4561_v27  ;;  %1881 = vrot.lane.b32.xlu0 %v4561_v27, %s3421_s7  ;;  %1092 = vperm.xlu2 %3302, %v4357_v54   ;;  %v4577_v54 = vpop.f32.mrf.mxu3  ;;  %v4593_v19 = vadd.f32 %v3896_v47, %v1560_v0  ;;  %v2029_v0 = vpop.permute.xlu0 %2028 }
 0x31d   : > { %3181 = vmatmul.msk.f32.gmra.mxu2 %vm645_vm0, %v2274_v9  ;;  %v4570_v45 = vpop.permute.xlu2 %1675  ;;  %v1451_v51 = vpop.permute.xlu1 %1450 }
 0x31e   : > { %v1519_v50 = vmul.f32 %v3887_v22, %v1451_v51  ;;  %5499 = vst [vmem:[#allocation41_spill] sm:$0xff] %v4593_v19  ;;  %v1763_v51 = vsub.f32 %v3822_v56, %v4459_v33  ;;  %v1299_v33 = vmul.f32 %v3890_v25, %v4472_v61 }
 0x31f   : > { %v2179_v34 = vpop.f32.mrf.mxu1 }
 0x320   : > { %v1555_v10 = vadd.f32 %v1519_v50, %v1338_v29  ;;  %v2180_v41 = vadd.f32 %v2179_v34, %v4419_v7  ;;  %v1943_v29 = vadd.f32 %v4481_v15, %v1763_v51  ;;  %v1119_v34 = vmul.f32 %v3884_v21, %v3842_v1 }
 0x322   : > { %v2275_v39 = vmax.f32 %v2180_v41, 0.0  ;;  %v1592_v30 = vadd.f32 %v3896_v47, %v1555_v10  ;;  %v1517_v10 = vmul.f32 %v3887_v22, %v4453_v58  ;;  %v1336_v28 = vadd.f32 %v1300_v48, %v1119_v34  ;;  %v849_v48 = vpop.f32.mrf.mxu0 }
 0x323   : > { %1699 = vrot.lane.b32.xlu1 %v4544_v35, %s3420_s29 }
 0x324   : > { %1703 = vrot.lane.b32.xlu0 %v4577_v54, %s3420_s29  ;;  %3304 = vset.pattern.permute.xlu2 %v5469_v44  ;;  %v4584_v6 = vadd.f32 %v1592_v30, %v846_v55  ;;  %v1553_v61 = vadd.f32 %v1517_v10, %v1336_v28 }
 0x325   : > { %3182 = vmatmul.msk.f32.gmra.mxu2 %vm645_vm0, %v2275_v39  ;;  %v4588_v26 = vpop.permute.xlu2 %1855  ;;  %1241 = vperm.xlu2 %3304, %v4198_v32  }
 0x327   : > { %v2182_v36 = vpop.f32.mrf.mxu1 }
 0x328   : > { %v2183_v9 = vadd.f32 %v2182_v36, %v4419_v7  ;;  %v4627_v36 = vadd.f32 %v3896_v47, %v1553_v61  ;;  %v1128_v61 = vmul.f32 %v3884_v21, %v4434_v31 }
 0x32a   : > { %v2276_v44 = vmax.f32 %v2183_v9, 0.0  ;;  %5500 = vst [vmem:[#allocation42_spill] sm:$0xff] %v4627_v36 }
 0x32b   : > { %1879 = vrot.lane.b32.xlu1 %v4593_v19, %s3421_s7 }
 0x32c   : > { %1867 = vrot.lane.b32.xlu0 %v4517_v2, %s3421_s7  ;;  %v1118_v2 = vmul.f32 %v3884_v21, %v3866_v13 }
 0x32d   : > { %3183 = vmatmul.msk.f32.gmra.mxu2 %vm645_vm0, %v2276_v44  ;;  %v2027_v32 = vpop.permute.xlu2 %2026  ;;  %2032 = vrot.lane.b32.xlu2 %v1943_v29, %s3422_s8  ;;  %v1680_v29 = vpop.permute.xlu0 %1679 }
 0x32e   : > { %3153 = vmatmul.msk.f32.gmra.mxu1 %vm645_vm0, %v2027_v32  ;;  %v1335_v39 = vadd.f32 %v1299_v33, %v1118_v2  ;;  %v1310_v33 = vmul.f32 %v3890_v25, %v4536_v4 }
 0x32f   : > { %v2185_v15 = vpop.f32.mrf.mxu1 }
 0x330   : > { %v2186_v50 = vadd.f32 %v2185_v15, %v4419_v7  ;;  %v1552_v13 = vadd.f32 %v1516_v17, %v1335_v39  ;;  %v870_v17 = vpop.f32.mrf.mxu3 }
 0x332   : > { %v2277_v41 = vmax.f32 %v2186_v50, 0.0 }
 0x333   : > { %1701 = vrot.lane.b32.xlu1 %v4557_v40, %s3420_s29 }
 0x334   : > { %1689 = vrot.lane.b32.xlu0 %v846_v55, %s3420_s29  ;;  %v4630_v55 = vadd.f32 %v3896_v47, %v1552_v13 }
 0x335   : > { %3184 = vmatmul.msk.f32.gmra.mxu2 %vm645_vm0, %v2277_v41  ;;  %v1678_v1 = vpop.permute.xlu2 %1677  ;;  %1683 = vrot.lane.b32.xlu2 %v4479_v49, %s3420_s29  ;;  %v1270_v28 = vpop.permute.xlu0 %1269 }
 0x336   : > { %3154 = vmatmul.msk.f32.gmra.mxu1 %vm645_vm0, %v2029_v0  ;;  %5501 = vst [vmem:[#allocation43_spill] sm:$0xff] %v4630_v55  ;;  %v1766_v4 = vsub.f32 %v3846_v3, %v1678_v1  ;;  %v1526_v0 = vmul.f32 %v3887_v22, %v4485_v60 }
 0x337   : > { %v2188_v58 = vpop.f32.mrf.mxu1 }
 0x338   : > { %v2189_v42 = vadd.f32 %v2188_v58, %v4419_v7 }
 0x33a   : > { %v2278_v9 = vmax.f32 %v2189_v42, 0.0 }
 0x33b   : > { %1865 = vrot.lane.b32.xlu1 %v4627_v36, %s3421_s7 }
 0x33c   : > { %1869 = vrot.lane.b32.xlu0 %v1592_v30, %s3421_s7  ;;  %v1129_v30 = vmul.f32 %v3884_v21, %v4447_v11  ;;  %v1765_v11 = vsub.f32 %v3838_v63, %v4570_v45 }
 0x33d   : > { %3185 = vmatmul.msk.f32.gmra.mxu2 %vm645_vm0, %v2278_v9  ;;  %v1858_v51 = vpop.permute.xlu2 %1857  ;;  %1863 = vrot.lane.b32.xlu2 %v4630_v55, %s3421_s7  ;;  %v4669_v31 = vpop.permute.xlu0 %1273 }
 0x33e   : > { %v1346_v34 = vadd.f32 %v1310_v33, %v1129_v30  ;;  %v1946_v41 = vadd.f32 %v1858_v51, %v1766_v4  ;;  %v1945_v1 = vadd.f32 %v4588_v26, %v1765_v11  ;;  %v1876_v26 = vpop.permute.xlu1 %1875 }
 0x33f   : > { %v2191_v44 = vpop.f32.mrf.mxu1 }
 0x340   : > { %v2192_v32 = vadd.f32 %v2191_v44, %v4419_v7  ;;  %v1122_v44 = vmul.f32 %v3884_v21, %v3851_v5 }
 0x342   : > { %v2279_v15 = vmax.f32 %v2192_v32, 0.0 }
 0x343   : > { %1687 = vrot.lane.b32.xlu1 %v4511_v52, %s3420_s29  ;;  %v1309_v52 = vmul.f32 %v3890_v25, %v4470_v12 }
 0x344   : > { %1691 = vrot.lane.b32.xlu0 %v849_v48, %s3420_s29 }
 0x345   : > { %3186 = vmatmul.msk.f32.gmra.mxu2 %vm645_vm0, %v2279_v15  ;;  %v1483_v50 = vpop.permute.xlu2 %1482  ;;  %1685 = vrot.lane.b32.xlu2 %v4492_v57, %s3420_s29  ;;  %v1345_v12 = vadd.f32 %v1309_v52, %v1128_v61  ;;  %v1455_v60 = vpop.permute.xlu0 %1454 }
 0x346   : > { %v1527_v2 = vmul.f32 %v3887_v22, %v1483_v50  ;;  %v1520_v15 = vmul.f32 %v3887_v22, %v1455_v60 }
 0x347   : > { %v1562_v45 = vadd.f32 %v1526_v0, %v1345_v12 }
 0x348   : > { %v1563_v10 = vadd.f32 %v1527_v2, %v1346_v34  ;;  %v1767_v2 = vsub.f32 %v3822_v56, %v1680_v29  ;;  %v1311_v29 = vmul.f32 %v3890_v25, %v1270_v28 }
 0x349   : > { %v4666_v42 = vadd.f32 %v3896_v47, %v1562_v45 }
 0x34a   : > { %v1600_v39 = vadd.f32 %v3896_v47, %v1563_v10 }
 0x34b   : > { %2038 = vrot.lane.b32.xlu1 %v1946_v41, %s3422_s8 }
 0x34c   : > { %v4662_v13 = vadd.f32 %v1600_v39, %v870_v17 }
 0x34d   : > { %v1696_v58 = vpop.permute.xlu2 %1695  ;;  %2036 = vrot.lane.b32.xlu2 %v1945_v1, %s3422_s8 }
 0x34e   : > { %v1775_v32 = vsub.f32 %v3822_v56, %v1696_v58 }
 0x350   : > { %v1955_v50 = vadd.f32 %v1876_v26, %v1775_v32 }
 0x353   : > { %1885 = vrot.lane.b32.xlu1 %v1600_v39, %s3421_s7  ;;  %v852_v39 = vpop.f32.mrf.mxu0 }
 0x355   : > { %v1088_v9 = vpop.permute.xlu2 %1087  ;;  %1883 = vrot.lane.b32.xlu2 %v4666_v42, %s3421_s7 }
 0x356   : > { %v1130_v5 = vmul.f32 %v3884_v21, %v1088_v9 }
 0x357   : > { %v4696_v9 = vpop.f32.mrf.mxu2 }
 0x358   : > { %v1347_v0 = vadd.f32 %v1311_v29, %v1130_v5 }
 0x35d   : > { %1705 = vrot.lane.b32.xlu2 %v870_v17, %s3420_s29  ;;  %v873_v17 = vpop.f32.mrf.mxu3 }
 0x35e   : > { %v1238_v51 = vpop.permute.xlu2 %1237 }
 0x35f   : > { %v1303_v33 = vmul.f32 %v3890_v25, %v1238_v51 }
 0x361   : > { %v1339_v30 = vadd.f32 %v1303_v33, %v1122_v44  ;;  %v1459_v44 = vpop.permute.xlu0 %1458 }
 0x363   : > { %v1556_v34 = vadd.f32 %v1520_v15, %v1339_v30 }
 0x365   : > { %v1593_v4 = vadd.f32 %v3896_v47, %v1556_v34  ;;  %2056 = vrot.lane.b32.xlu2 %v1955_v50, %s3422_s8  ;;  %v1860_v10 = vpop.permute.xlu1 %1859  ;;  %v4700_v50 = vpop.f32.mrf.mxu2 }
 0x366   : > { %v1947_v52 = vadd.f32 %v1860_v10, %v1767_v2  ;;  %v2031_v11 = vpop.permute.xlu2 %2030  ;;  %v1123_v2 = vmul.f32 %v3884_v21, %v4342_v37 }
 0x367   : > { %v4682_v41 = vadd.f32 %v1593_v4, %v849_v48  ;;  %3155 = vmatmul.msk.f32.gmra.mxu1 %vm645_vm0, %v2031_v11  ;;  %1871 = vrot.lane.b32.xlu0 %v1593_v4, %s3421_s7  ;;  %v1521_v4 = vmul.f32 %v3887_v22, %v1459_v44  ;;  %v1312_v44 = vmul.f32 %v3890_v25, %v4669_v31 }
 0x368   : > { %2040 = vrot.lane.b32.xlu1 %v1947_v52, %s3422_s8 }
 0x369   : > { %5502 = vst [vmem:[#allocation44_spill] sm:$0xff] %v4682_v41 }
 0x36d   : > { %1707 = vrot.lane.b32.xlu2 %v873_v17, %s3420_s29  ;;  %v1487_v61 = vpop.permute.xlu1 %1486 }
 0x36e   : > { %v1528_v1 = vmul.f32 %v3887_v22, %v1487_v61  ;;  %v1682_v48 = vpop.permute.xlu2 %1681 }
 0x36f   : > { %1693 = vrot.lane.b32.xlu0 %v852_v39, %s3420_s29  ;;  %v1768_v5 = vsub.f32 %v3831_v59, %v1682_v48 }
 0x370   : > { %v1564_v12 = vadd.f32 %v1528_v1, %v1347_v0 }
 0x372   : > { %v1601_v58 = vadd.f32 %v3896_v47, %v1564_v12 }
 0x374   : > { %v4693_v45 = vadd.f32 %v1601_v58, %v873_v17  ;;  %1887 = vrot.lane.b32.xlu1 %v1601_v58, %s3421_s7  ;;  %v4711_v58 = vpop.f32.mrf.mxu3 }
 0x375   : > { %v1698_v28 = vpop.permute.xlu1 %1697  ;;  %5504 = vst [vmem:[#allocation46_spill] sm:$0xff] %v4711_v58 }
 0x376   : > { %5503 = vst [vmem:[#allocation45_spill] sm:$0xff] %v4693_v45  ;;  %v1093_v60 = vpop.permute.xlu2 %1092  ;;  %v1776_v51 = vsub.f32 %v3831_v59, %v1698_v28 }
 0x377   : > { %v1131_v48 = vmul.f32 %v3884_v21, %v1093_v60 }
 0x37b   : > { %v2194_v26 = vpop.f32.mrf.mxu1 }
 0x37c   : > { %v2195_v32 = vadd.f32 %v2194_v26, %v4419_v7 }
 0x37d   : > { %v1878_v33 = vpop.permute.xlu1 %1877 }
 0x37e   : > { %v2280_v15 = vmax.f32 %v2195_v32, 0.0  ;;  %v1956_v30 = vadd.f32 %v1878_v33, %v1776_v51  ;;  %v1348_v33 = vadd.f32 %v1312_v44, %v1131_v48 }
 0x37f   : > { %v1242_v34 = vpop.permute.xlu2 %1241 }
 0x380   : > { %v1304_v10 = vmul.f32 %v3890_v25, %v1242_v34  ;;  %3187 = vmatmul.msk.f32.gmra.mxu2 %vm645_vm0, %v2280_v15  ;;  %2058 = vrot.lane.b32.xlu2 %v1956_v30, %s3422_s8 }
 0x382   : > { %v1340_v52 = vadd.f32 %v1304_v10, %v1123_v2  ;;  %v2035_v1 = vpop.permute.xlu0 %2034 }
 0x383   : > { %v2197_v11 = vpop.f32.mrf.mxu1 }
 0x384   : > { %v1557_v17 = vadd.f32 %v1521_v4, %v1340_v52  ;;  %v2198_v29 = vadd.f32 %v2197_v11, %v4419_v7 }
 0x385   : > { %v1862_v61 = vpop.permute.xlu1 %1861 }
 0x386   : > { %v1594_v0 = vadd.f32 %v3896_v47, %v1557_v17  ;;  %v2281_v37 = vmax.f32 %v2198_v29, 0.0  ;;  %v1948_v12 = vadd.f32 %v1862_v61, %v1768_v5 }
 0x387   : > { %v2033_v28 = vpop.permute.xlu2 %2032  ;;  %v4713_v26 = vpop.f32.mrf.mxu2 }
 0x388   : > { %v4715_v51 = vadd.f32 %v1594_v0, %v852_v39  ;;  %3156 = vmatmul.msk.f32.gmra.mxu1 %vm645_vm0, %v2033_v28  ;;  %3188 = vmatmul.msk.f32.gmra.mxu2 %vm645_vm0, %v2281_v37 }
 0x389   : > { %1873 = vrot.lane.b32.xlu0 %v1594_v0, %s3421_s7  ;;  %1709 = vrot.lane.b32.xlu2 %v4711_v58, %s3420_s29  ;;  %s3102_s29 = sshll.u32 %s3093_s21, 2 }
 0x38a   : > { %5505 = vst [vmem:[#allocation47_spill] sm:$0xff] %v4715_v51  ;;  %2042 = vrot.lane.b32.xlu1 %v1948_v12, %s3422_s8  ;;  %p595_p8 = scmp.lt.s32.totalorder %s3102_s29, 7 }
 0x38c   : > { %s5572_s29 = smov (!%p595_p8, %s3102_s29), 7 }
 0x38d   : > { %v1491_v32 = vpop.permute.xlu1 %1490 }
 0x38e   : > { %v1529_v39 = vmul.f32 %v3887_v22, %v1491_v32  ;;  %v1882_v15 = vpop.permute.xlu0 %1881 }
 0x38f   : > { %v1684_v30 = vpop.permute.xlu2 %1683  ;;  %v4727_v34 = vpop.f32.mrf.mxu2 }
 0x390   : > { %v1565_v2 = vadd.f32 %v1529_v39, %v1348_v33  ;;  %3157 = vmatmul.msk.f32.gmra.mxu1 %vm645_vm0, %v2035_v1  ;;  %v1769_v10 = vsub.f32 %v3838_v63, %v1684_v30 }
 0x392   : > { %v4731_v4 = vadd.f32 %v3896_v47, %v1565_v2 }
 0x394   : > { %5506 = vst [vmem:[#allocation48_spill] sm:$0xff] %v4731_v4  ;;  %1889 = vrot.lane.b32.xlu1 %v4731_v4, %s3421_s7  ;;  %s3103_s7 = sshll.u32 %s5572_s29, 3 }
 0x395   : > { %v1700_v21 = vpop.permute.xlu1 %1699  ;;  %s598_s10 = scalar_lea.vmem %s5406_s5, %s3103_s7 }
 0x396   : > { %v1704_v60 = vpop.permute.xlu0 %1703  ;;  %v1777_v52 = vsub.f32 %v3838_v63, %v1700_v21 }
 0x397   : > { %v1864_v25 = vpop.permute.xlu2 %1863  ;;  %v2443_v31 = vpop.f32.mrf.mxu2  ;;  %v1779_v39 = vsub.f32 %v3822_v56, %v1704_v60 }
 0x398   : > { %v1949_v22 = vadd.f32 %v1864_v25, %v1769_v10 }
 0x39c   : > { %2044 = vrot.lane.b32.xlu1 %v1949_v22, %s3422_s8 }
 0x39d   : > { %v1880_v11 = vpop.permute.xlu1 %1879 }
 0x39e   : > { %v1957_v5 = vadd.f32 %v1880_v11, %v1777_v52  ;;  %v1868_v47 = vpop.permute.xlu0 %1867 }
 0x39f   : > { %v1686_v17 = vpop.permute.xlu2 %1685 }
 0x3a0   : > { %v2446_v29 = vpop.f32.mrf.mxu2  ;;  %2060 = vrot.lane.b32.xlu2 %v1957_v5, %s3422_s8  ;;  %v1770_v44 = vsub.f32 %v3846_v3, %v1686_v17 }
 0x3a5   : > { %v1702_v61 = vpop.permute.xlu1 %1701 }
 0x3a6   : > { %v1778_v0 = vsub.f32 %v3846_v3, %v1702_v61  ;;  %v1690_v28 = vpop.permute.xlu0 %1689 }
 0x3a7   : > { %v2037_v1 = vpop.permute.xlu2 %2036 }
 0x3a8   : > { %v1958_v37 = vadd.f32 %v1882_v15, %v1778_v0  ;;  %3158 = vmatmul.msk.f32.gmra.mxu1 %vm645_vm0, %v2037_v1  ;;  %v2449_v12 = vpop.f32.mrf.mxu2  ;;  %v3387_v15 = vld [vmem:[%s5405_s4] sm:$0xff]  ;;  %v1772_v0 = vsub.f32 %v3831_v59, %v1690_v28 }
 0x3a9   : > { %v4752_v22 = vperm.slane %v3387_v15, 5 }
 0x3aa   : > { %2062 = vrot.lane.b32.xlu2 %v1958_v37, %s3422_s8 }
 0x3ab   : > { %v2200_v48 = vpop.f32.mrf.mxu1  ;;  %v4756_v60 = vadd.f32 %v2443_v31, %v4752_v22  ;;  %v4761_v5 = vadd.f32 %v4696_v9, %v4752_v22  ;;  %v4776_v28 = vadd.f32 %v2446_v29, %v4752_v22 }
 0x3ac   : > { %v2201_v32 = vadd.f32 %v2200_v48, %v4419_v7 }
 0x3ad   : > { %v1866_v33 = vpop.permute.xlu1 %1865  ;;  %v2540_v48 = vsel %vm645_vm0, %v4756_v60, -inf  ;;  %v2539_v9 = vsel %vm645_vm0, %v4761_v5, -inf  ;;  %v2557_v15 = vsel %vm645_vm0, %v4776_v28, -inf }
 0x3ae   : > { %v2282_v30 = vmax.f32 %v2201_v32, 0.0  ;;  %v1950_v2 = vadd.f32 %v1866_v33, %v1770_v44  ;;  %v1870_v17 = vpop.permute.xlu0 %1869 }
 0x3af   : > { %v1884_v21 = vpop.permute.xlu2 %1883  ;;  %v1952_v31 = vadd.f32 %v1870_v17, %v1772_v0 }
 0x3b0   : > { %v1959_v25 = vadd.f32 %v1884_v21, %v1779_v39  ;;  %v4745_v10 = vpop.f32.mrf.mxu2  ;;  %3189 = vmatmul.msk.f32.gmra.mxu2 %vm645_vm0, %v2282_v30  ;;  %2046 = vrot.lane.b32.xlu0 %v1950_v2, %s3422_s8  ;;  %v2541_v30 = vmax.f32 %v2539_v9, %v2540_v48  ;;  %v4784_v21 = vadd.f32 %v4700_v50, %v4752_v22 }
 0x3b1   : > { %v4796_v50 = vadd.f32 %v2449_v12, %v4752_v22  ;;  %v4805_v48 = vadd.f32 %v4713_v26, %v4752_v22 }
 0x3b2   : > { %2064 = vrot.lane.b32.xlu1 %v1959_v25, %s3422_s8 }
 0x3b3   : > { %v2203_v52 = vpop.f32.mrf.mxu1  ;;  %v2573_v12 = vsel %vm645_vm0, %v4805_v48, -inf }
 0x3b4   : > { %v2204_v11 = vadd.f32 %v2203_v52, %v4419_v7 }
 0x3b5   : > { %v1688_v61 = vpop.permute.xlu1 %1687 }
 0x3b6   : > { %v2283_v1 = vmax.f32 %v2204_v11, 0.0  ;;  %v1771_v37 = vsub.f32 %v3822_v56, %v1688_v61  ;;  %v2556_v11 = vsel %vm645_vm0, %v4784_v21, -inf }
 0x3b7   : > { %v1706_v44 = vpop.permute.xlu2 %1705  ;;  %v2558_v61 = vmax.f32 %v2556_v11, %v2557_v15 }
 0x3b8   : > { %v1951_v32 = vadd.f32 %v1868_v47, %v1771_v37  ;;  %v2455_v33 = vpop.f32.mrf.mxu2  ;;  %3190 = vmatmul.msk.f32.gmra.mxu2 %vm645_vm0, %v2283_v1  ;;  %v1780_v1 = vsub.f32 %v3831_v59, %v1706_v44 }
 0x3b9   : > { %v4771_v39 = vadd.f32 %v2455_v33, %v4752_v22  ;;  %v2574_v33 = vsel %vm645_vm0, %v4796_v50, -inf }
 0x3ba   : > { %2050 = vrot.lane.b32.xlu1 %v1952_v31, %s3422_s8  ;;  %2048 = vrot.lane.b32.xlu2 %v1951_v32, %s3422_s8  ;;  %v2575_v44 = vmax.f32 %v2573_v12, %v2574_v33 }
 0x3bb   : > { %v2542_v47 = vsel %vm645_vm0, %v4771_v39, -inf }
 0x3bc   : > { %v4780_v2 = vmax.f32 %v2541_v30, %v2542_v47 }
 0x3bd   : > { %v2039_v25 = vpop.permute.xlu1 %2038 }
 0x3be   : > { %3159 = vmatmul.msk.f32.gmra.mxu1 %vm645_vm0, %v2039_v25  ;;  %v1692_v25 = vpop.permute.xlu0 %1691 }
 0x3bf   : > { %v2057_v52 = vpop.permute.xlu2 %2056 }
 0x3c0   : > { %3168 = vmatmul.msk.f32.vlgmr.msrb.gmra.mxu3 %vm645_vm0, %v2057_v52  ;;  %v2458_v29 = vpop.f32.mrf.mxu2  ;;  %v1773_v52 = vsub.f32 %v3838_v63, %v1692_v25 }
 0x3c1   : > { %v4793_v17 = vadd.f32 %v2458_v29, %v4752_v22 }
 0x3c3   : > { %v2559_v0 = vsel %vm645_vm0, %v4793_v17, -inf }
 0x3c4   : > { %v4801_v37 = vmax.f32 %v2558_v61, %v2559_v0 }
 0x3c5   : > { %v1886_v31 = vpop.permute.xlu1 %1885 }
 0x3c6   : > { %v1960_v32 = vadd.f32 %v1886_v31, %v1780_v1 }
 0x3c7   : > { %v1708_v15 = vpop.permute.xlu2 %1707 }
 0x3c8   : > { %v2461_v9 = vpop.f32.mrf.mxu2  ;;  %2066 = vrot.lane.b32.xlu0 %v1960_v32, %s3422_s8  ;;  %v1781_v31 = vsub.f32 %v3838_v63, %v1708_v15  ;;  %v4832_v15 = vadd.f32 %v4745_v10, %v4752_v22 }
 0x3c9   : > { %v4813_v30 = vadd.f32 %v2461_v9, %v4752_v22 }
 0x3ca   : > { %5507 = vst [vmem:[#allocation49_spill] sm:$0xff] %v4832_v15 }
 0x3cb   : > { %v2576_v47 = vsel %vm645_vm0, %v4813_v30, -inf }
 0x3cc   : > { %v4817_v26 = vmax.f32 %v2575_v44, %v2576_v47 }
 0x3d9   : > { %v1872_v29 = vpop.permute.xlu0 %1871 }
 0x3da   : > { %v1953_v11 = vadd.f32 %v1872_v29, %v1773_v52  ;;  %v2059_v61 = vpop.permute.xlu2 %2058  ;;  %v2041_v0 = vpop.permute.xlu1 %2040 }
 0x3db   : > { %3160 = vmatmul.msk.f32.gmra.mxu1 %vm645_vm0, %v2041_v0  ;;  %3169 = vmatmul.msk.f32.gmra.mxu3 %vm645_vm0, %v2059_v61  ;;  %v4837_v0 = vadd.f32 %v4727_v34, %v4752_v22 }
 0x3dc   : > { %2052 = vrot.lane.b32.xlu0 %v1953_v11, %s3422_s8 }
 0x3dd   : > { %5508 = vst [vmem:[#allocation50_spill] sm:$0xff] %v4837_v0 }
 0x3e1   : > { %v1694_v47 = vpop.permute.xlu0 %1693 }
 0x3e2   : > { %v1774_v25 = vsub.f32 %v3846_v3, %v1694_v47 }
 0x3e3   : > { %v1710_v44 = vpop.permute.xlu2 %1709 }
 0x3e4   : > { %v2206_v1 = vpop.f32.mrf.mxu1  ;;  %v1782_v10 = vsub.f32 %v3846_v3, %v1710_v44 }
 0x3e5   : > { %v2207_v32 = vadd.f32 %v2206_v1, %v4419_v7  ;;  %v2591_v1 = vsel %vm645_vm0, %v4832_v15, -inf }
 0x3e6   : > { %v1888_v33 = vpop.permute.xlu1 %1887 }
 0x3e7   : > { %v2284_v9 = vmax.f32 %v2207_v32, 0.0  ;;  %v1961_v12 = vadd.f32 %v1888_v33, %v1781_v31  ;;  %v2590_v32 = vsel %vm645_vm0, %v4837_v0, -inf }
 0x3e9   : > { %3191 = vmatmul.msk.f32.gmra.mxu2 %vm645_vm0, %v2284_v9  ;;  %2068 = vrot.lane.b32.xlu2 %v1961_v12, %s3422_s8  ;;  %v2592_v12 = vmax.f32 %v2590_v32, %v2591_v1 }
 0x3fa   : > { %v2061_v52 = vpop.permute.xlu2 %2060 }
 0x3fb   : > { %v1874_v29 = vpop.permute.xlu0 %1873  ;;  %3170 = vmatmul.msk.f32.gmra.mxu3 %vm645_vm0, %v2061_v52 }
 0x3fc   : > { %v1954_v11 = vadd.f32 %v1874_v29, %v1774_v25  ;;  %v2043_v61 = vpop.permute.xlu1 %2042 }
 0x3fd   : > { %3161 = vmatmul.msk.f32.gmra.mxu1 %vm645_vm0, %v2043_v61 }
 0x3fe   : > { %2054 = vrot.lane.b32.xlu2 %v1954_v11, %s3422_s8 }
 0x403   : > { %v2464_v31 = vpop.f32.mrf.mxu2 }
 0x404   : > { %v4844_v33 = vadd.f32 %v2464_v31, %v4752_v22  ;;  %v2063_v9 = vpop.permute.xlu2 %2062 }
 0x405   : > { %v2209_v47 = vpop.f32.mrf.mxu1  ;;  %3171 = vmatmul.msk.f32.gmra.mxu3 %vm645_vm0, %v2063_v9 }
 0x406   : > { %5509 = vst [vmem:[#allocation51_spill] sm:$0xff] %v4844_v33  ;;  %v2593_v34 = vsel %vm645_vm0, %v4844_v33, -inf  ;;  %v2210_v25 = vadd.f32 %v2209_v47, %v4419_v7  ;;  %v1890_v52 = vpop.permute.xlu1 %1889 }
 0x407   : > { %v4851_v29 = vmax.f32 %v2592_v12, %v2593_v34  ;;  %v1962_v11 = vadd.f32 %v1890_v52, %v1782_v10 }
 0x408   : > { %v2285_v61 = vmax.f32 %v2210_v25, 0.0 }
 0x409   : > { %2070 = vrot.lane.b32.xlu1 %v1962_v11, %s3422_s8 }
 0x40a   : > { %3192 = vmatmul.msk.f32.gmra.mxu2 %vm645_vm0, %v2285_v61 }
 0x40b   : > { %v2467_v1 = vpop.f32.mrf.mxu2 }
 0x40c   : > { %v4856_v44 = vadd.f32 %v2467_v1, %v4752_v22 }
 0x40d   : > { %v2212_v31 = vpop.f32.mrf.mxu1 }
 0x40e   : > { %v4860_v32 = vsel %vm645_vm0, %v4856_v44, -inf  ;;  %v2213_v9 = vadd.f32 %v2212_v31, %v4419_v7  ;;  %v2045_v47 = vpop.permute.xlu1 %2044 }
 0x40f   : > { %3162 = vmatmul.msk.f32.gmra.mxu1 %vm645_vm0, %v2045_v47  ;;  %v5514_v49 = vmax.f32 %v4780_v2, %v4860_v32 }
 0x410   : > { %v2286_v10 = vmax.f32 %v2213_v9, 0.0 }
 0x412   : > { %3193 = vmatmul.msk.f32.gmra.mxu2 %vm645_vm0, %v2286_v10 }
 0x414   : > { %v2049_v1 = vpop.permute.xlu2 %2048 }
 0x422   : > { %v2047_v34 = vpop.permute.xlu0 %2046 }
 0x423   : > { %3163 = vmatmul.msk.f32.gmra.mxu1 %vm645_vm0, %v2047_v34 }
 0x424   : > { %v2065_v25 = vpop.permute.xlu1 %2064 }
 0x425   : > { %v2215_v52 = vpop.f32.mrf.mxu1  ;;  %3172 = vmatmul.msk.f32.gmra.mxu3 %vm645_vm0, %v2065_v25 }
 0x426   : > { %v2216_v11 = vadd.f32 %v2215_v52, %v4419_v7 }
 0x428   : > { %v2287_v61 = vmax.f32 %v2216_v11, 0.0 }
 0x42a   : > { %3194 = vmatmul.msk.f32.gmra.mxu2 %vm645_vm0, %v2287_v61 }
 0x42b   : > { %3164 = vmatmul.msk.f32.gmra.mxu1 %vm645_vm0, %v2049_v1 }
 0x42c   : > { %v2051_v31 = vpop.permute.xlu1 %2050 }
 0x433   : > { %v2470_v47 = vpop.f32.mrf.mxu2  ;;  %3165 = vmatmul.msk.f32.gmra.mxu1 %vm645_vm0, %v2051_v31 }
 0x434   : > { %v4874_v9 = vadd.f32 %v2470_v47, %v4752_v22 }
 0x436   : > { %v2561_v10 = vsel %vm645_vm0, %v4874_v9, -inf }
 0x437   : > { %v2562_v34 = vmax.f32 %v4801_v37, %v2561_v10 }
 0x43a   : > { %v2067_v25 = vpop.permute.xlu0 %2066 }
 0x43b   : > { %v2473_v52 = vpop.f32.mrf.mxu2  ;;  %v2218_v11 = vpop.f32.mrf.mxu1  ;;  %3173 = vmatmul.msk.f32.gmra.mxu3 %vm645_vm0, %v2067_v25 }
 0x43c   : > { %v4881_v61 = vadd.f32 %v2473_v52, %v4752_v22  ;;  %v2219_v1 = vadd.f32 %v2218_v11, %v4419_v7 }
 0x43e   : > { %v4886_v31 = vsel %vm645_vm0, %v4881_v61, -inf  ;;  %v2288_v47 = vmax.f32 %v2219_v1, 0.0 }
 0x440   : > { %3195 = vmatmul.msk.f32.gmra.mxu2 %vm645_vm0, %v2288_v47 }
 0x443   : > { %v2069_v37 = vpop.permute.xlu2 %2068 }
 0x444   : > { %3174 = vmatmul.msk.f32.gmra.mxu3 %vm645_vm0, %v2069_v37 }
 0x44e   : > { %v2053_v10 = vpop.permute.xlu0 %2052 }
 0x44f   : > { %3166 = vmatmul.msk.f32.gmra.mxu1 %vm645_vm0, %v2053_v10  ;;  %v2245_v10 = vpop.f32.mrf.mxu3 }
 0x458   : > { %v2055_v25 = vpop.permute.xlu2 %2054  ;;  %v2221_v52 = vpop.f32.mrf.mxu1 }
 0x459   : > { %3167 = vmatmul.msk.f32.gmra.mxu1 %vm645_vm0, %v2055_v25  ;;  %v2222_v11 = vadd.f32 %v2221_v52, %v4419_v7  ;;  %v2246_v52 = vadd.f32 %v2245_v10, %v4419_v7 }
 0x45b   : > { %v2289_v36 = vmax.f32 %v2222_v11, 0.0 }
 0x45d   : > { %3196 = vmatmul.msk.f32.gmra.mxu2 %vm645_vm0, %v2289_v36  ;;  %v2297_v36 = vmax.f32 %v2246_v52, 0.0 }
 0x45e   : > { %v2248_v11 = vpop.f32.mrf.mxu3 }
 0x46c   : > { %v2476_v1 = vpop.f32.mrf.mxu2 }
 0x46d   : > { %v4897_v12 = vadd.f32 %v2476_v1, %v4752_v22  ;;  %v2249_v1 = vadd.f32 %v2248_v11, %v4419_v7 }
 0x46f   : > { %5510 = vst [vmem:[#allocation52_spill] sm:$0xff] %v4897_v12  ;;  %v2595_v47 = vsel %vm645_vm0, %v4897_v12, -inf  ;;  %v2298_v58 = vmax.f32 %v2249_v1, 0.0 }
 0x470   : > { %v2596_v37 = vmax.f32 %v4851_v29, %v2595_v47 }
 0x47a   : > { %v2224_v57 = vpop.f32.mrf.mxu1 }
 0x47b   : > { %v2225_v51 = vadd.f32 %v2224_v57, %v4419_v7  ;;  %v2071_v4 = vpop.permute.xlu1 %2070 }
 0x47c   : > { %3175 = vmatmul.msk.f32.gmra.mxu3 %vm645_vm0, %v2071_v4 }
 0x47d   : > { %v2290_v25 = vmax.f32 %v2225_v51, 0.0 }
 0x47e   : > { %v2251_v29 = vpop.f32.mrf.mxu3 }
 0x47f   : > { %3197 = vmatmul.msk.f32.gmra.mxu2 %vm645_vm0, %v2290_v25  ;;  %v2252_v51 = vadd.f32 %v2251_v29, %v4419_v7 }
 0x481   : > { %v2299_v10 = vmax.f32 %v2252_v51, 0.0 }
 0x484   : > { %3204 = vmatmul.msk.f32.vlgmr.msra.gmra.mxu3 %vm645_vm0, %v2297_v36 }
 0x488   : > { %v2254_v25 = vpop.f32.mrf.mxu3 }
 0x489   : > { %v2255_v36 = vadd.f32 %v2254_v25, %v4419_v7 }
 0x48c   : > { %v2227_v47 = vpop.f32.mrf.mxu1  ;;  %3205 = vmatmul.msk.f32.gmra.mxu3 %vm645_vm0, %v2298_v58 }
 0x48d   : > { %v2228_v57 = vadd.f32 %v2227_v47, %v4419_v7  ;;  %v4910_v27 = vpop.f32.mrf.mxu2  ;;  %v2300_v47 = vmax.f32 %v2255_v36, 0.0 }
 0x48f   : > { %v2291_v4 = vmax.f32 %v2228_v57, 0.0 }
 0x491   : > { %3198 = vmatmul.msk.f32.gmra.mxu2 %vm645_vm0, %v2291_v4 }
 0x494   : > { %3206 = vmatmul.msk.f32.gmra.mxu3 %vm645_vm0, %v2299_v10 }
 0x495   : > { %v2482_v52 = vpop.f32.mrf.mxu2 }
 0x496   : > { %v4917_v11 = vadd.f32 %v2482_v52, %v4752_v22 }
 0x498   : > { %v2563_v58 = vsel %vm645_vm0, %v4917_v11, -inf }
 0x499   : > { %v4921_v1 = vmax.f32 %v2562_v34, %v2563_v58 }
 0x49c   : > { %3207 = vmatmul.msk.f32.gmra.mxu3 %vm645_vm0, %v2300_v47  ;;  %v5511_v47 = vmax.f32 %v4817_v26, %v4886_v31 }
 0x4a0   : > { %v2230_v29 = vpop.f32.mrf.mxu1 }
 0x4a1   : > { %v2231_v57 = vadd.f32 %v2230_v29, %v4419_v7 }
 0x4a3   : > { %v2292_v51 = vmax.f32 %v2231_v57, 0.0 }
 0x4a5   : > { %3199 = vmatmul.msk.f32.gmra.mxu2 %vm645_vm0, %v2292_v51 }
 0x4a8   : > { %v2257_v4 = vpop.f32.mrf.mxu3  ;;  %v2233_v10 = vpop.f32.mrf.mxu1 }
 0x4a9   : > { %v2258_v25 = vadd.f32 %v2257_v4, %v4419_v7  ;;  %v2234_v52 = vadd.f32 %v2233_v10, %v4419_v7 }
 0x4ab   : > { %v2301_v40 = vmax.f32 %v2258_v25, 0.0  ;;  %v2293_v3 = vmax.f32 %v2234_v52, 0.0 }
 0x4ad   : > { %v2485_v19 = vpop.f32.mrf.mxu2  ;;  %3208 = vmatmul.msk.f32.gmra.mxu3 %vm645_vm0, %v2301_v40  ;;  %3200 = vmatmul.msk.f32.gmra.mxu2 %vm645_vm0, %v2293_v3 }
 0x4ae   : > { %v4931_v34 = vadd.f32 %v2485_v19, %v4752_v22 }
 0x4b0   : > { %v2580_v36 = vsel %vm645_vm0, %v4931_v34, -inf  ;;  %v2236_v58 = vpop.f32.mrf.mxu1 }
 0x4b1   : > { %v4938_v29 = vmax.f32 %v5511_v47, %v2580_v36  ;;  %v2237_v57 = vadd.f32 %v2236_v58, %v4419_v7 }
 0x4b3   : > { %v2294_v51 = vmax.f32 %v2237_v57, 0.0 }
 0x4b5   : > { %3201 = vmatmul.msk.f32.gmra.mxu2 %vm645_vm0, %v2294_v51 }
 0x4be   : > { %v2260_v40 = vpop.f32.mrf.mxu3 }
 0x4bf   : > { %v2261_v3 = vadd.f32 %v2260_v40, %v4419_v7 }
 0x4c1   : > { %v2302_v4 = vmax.f32 %v2261_v3, 0.0 }
 0x4c3   : > { %v2488_v19 = vpop.f32.mrf.mxu2  ;;  %3209 = vmatmul.msk.f32.gmra.mxu3 %vm645_vm0, %v2302_v4 }
 0x4c4   : > { %v4945_v10 = vadd.f32 %v2488_v19, %v4752_v22 }
 0x4c6   : > { %5512 = vst [vmem:[#allocation53_spill] sm:$0xff] %v4945_v10  ;;  %v2597_v26 = vsel %vm645_vm0, %v4945_v10, -inf }
 0x4c7   : > { %v4949_v31 = vmax.f32 %v2596_v37, %v2597_v26  ;;  %v2263_v25 = vpop.f32.mrf.mxu3 }
 0x4c8   : > { %v2264_v52 = vadd.f32 %v2263_v25, %v4419_v7 }
 0x4ca   : > { %v2303_v36 = vmax.f32 %v2264_v52, 0.0 }
 0x4cc   : > { %v2239_v58 = vpop.f32.mrf.mxu1  ;;  %3210 = vmatmul.msk.f32.gmra.mxu3 %vm645_vm0, %v2303_v36 }
 0x4cd   : > { %v2240_v47 = vadd.f32 %v2239_v58, %v4419_v7 }
 0x4cf   : > { %v2295_v57 = vmax.f32 %v2240_v47, 0.0 }
 0x4d1   : > { %3202 = vmatmul.msk.f32.gmra.mxu2 %vm645_vm0, %v2295_v57 }
 0x4d6   : > { %v2242_v51 = vpop.f32.mrf.mxu1 }
 0x4d7   : > { %v2243_v40 = vadd.f32 %v2242_v51, %v4419_v7 }
 0x4d9   : > { %v2296_v3 = vmax.f32 %v2243_v40, 0.0 }
 0x4db   : > { %3203 = vmatmul.msk.f32.gmra.mxu2 %vm645_vm0, %v2296_v3 }
 0x4e0   : > { %v2491_v26 = vpop.f32.mrf.mxu2 }
 0x4ff   : > { %v2266_v37 = vpop.f32.mrf.mxu3 }
 0x500   : > { %v2267_v4 = vadd.f32 %v2266_v37, %v4419_v7  ;;  %v2480_v37 = vadd.f32 %v4910_v27, %v4752_v22 }
 0x502   : > { %v2304_v19 = vmax.f32 %v2267_v4, 0.0  ;;  %v2494_v52 = vpop.f32.mrf.mxu2  ;;  %v2546_v35 = vsel %vm645_vm0, %v2480_v37, -inf }
 0x503   : > { %v2547_v27 = vmax.f32 %v5514_v49, %v2546_v35 }
 0x504   : > { %3211 = vmatmul.msk.f32.gmra.mxu3 %vm645_vm0, %v2304_v19  ;;  %v2492_v19 = vadd.f32 %v2491_v26, %v4752_v22 }
 0x506   : > { %v2548_v55 = vsel %vm645_vm0, %v2492_v19, -inf }
 0x507   : > { %v2515_v25 = vpop.f32.mrf.mxu3  ;;  %v2549_v10 = vmax.f32 %v2547_v27, %v2548_v55 }
 0x508   : > { %v2516_v63 = vadd.f32 %v2515_v25, %v4752_v22 }
 0x50a   : > { %v2552_v33 = vsel %vm645_vm0, %v2516_v63, -inf }
 0x50f   : > { %v2518_v36 = vpop.f32.mrf.mxu3 }
 0x514   : > { %v2497_v58 = vpop.f32.mrf.mxu2 }
 0x515   : > { %v4960_v47 = vadd.f32 %v2497_v58, %v4752_v22 }
 0x517   : > { %v4964_v57 = vsel %vm645_vm0, %v4960_v47, -inf  ;;  %v4968_v40 = vpop.f32.mrf.mxu3 }
 0x51f   : > { %v4970_v7 = vpop.f32.mrf.mxu3 }
 0x528   : > { %v2500_v3 = vpop.f32.mrf.mxu2 }
 0x529   : > { %v4975_v4 = vadd.f32 %v2500_v3, %v4752_v22 }
 0x52b   : > { %5513 = vst [vmem:[#allocation54_spill] sm:$0xff] %v4975_v4  ;;  %v4980_v58 = vsel %vm645_vm0, %v4975_v4, -inf }
 0x530   : > { %v2527_v45 = vpop.f32.mrf.mxu3  ;;  %v2503_v3 = vpop.f32.mrf.mxu2 }
 0x531   : > { %v2504_v26 = vadd.f32 %v2503_v3, %v4752_v22  ;;  %v2528_v4 = vadd.f32 %v2527_v45, %v4752_v22  ;;  %v5000_v45 = vadd.f32 %v2494_v52, %v4752_v22 }
 0x533   : > { %v2550_v12 = vsel %vm645_vm0, %v2504_v26, -inf  ;;  %v2554_v0 = vsel %vm645_vm0, %v2528_v4, -inf }
 0x534   : > { %v2551_v51 = vmax.f32 %v2549_v10, %v2550_v12 }
 0x536   : > { %v2553_v15 = vmax.f32 %v2551_v51, %v2552_v33 }
 0x538   : > { %v2555_v41 = vmax.f32 %v2553_v15, %v2554_v0  ;;  %v2506_v55 = vpop.f32.mrf.mxu2 }
 0x539   : > { %v5003_v15 = vadd.f32 %v2506_v55, %v4752_v22 }
 0x53a   : > { %v2607_v49 = vsub.f32 %v4761_v5, %v2555_v41  ;;  %v2611_v35 = vsub.f32 %v4756_v60, %v2555_v41  ;;  %v2615_v2 = vsub.f32 %v4771_v39, %v2555_v41  ;;  %v2619_v32 = vsub.f32 %v4856_v44, %v2555_v41 }
 0x53b   : > { %v2623_v25 = vsub.f32 %v2480_v37, %v2555_v41  ;;  %v2627_v33 = vsub.f32 %v2492_v19, %v2555_v41  ;;  %v2565_v60 = vsel %vm645_vm0, %v5000_v45, -inf  ;;  %v2631_v5 = vsub.f32 %v2504_v26, %v2555_v41 }
 0x53c   : > { %v2643_v12 = vmul.f32 1.442695, %v2607_v49  ;;  %v2651_v10 = vmul.f32 1.442695, %v2611_v35  ;;  %v2659_v27 = vmul.f32 1.442695, %v2615_v2  ;;  %v2635_v0 = vsub.f32 %v2516_v63, %v2555_v41 }
 0x53d   : > { %v2667_v51 = vmul.f32 1.442695, %v2619_v32  ;;  %v2675_v39 = vmul.f32 1.442695, %v2623_v25  ;;  %v2683_v44 = vmul.f32 1.442695, %v2627_v33  ;;  %v2566_v37 = vmax.f32 %v4921_v1, %v2565_v60 }
 0x53e   : > { %3305 = vpow2.f32 %v2643_v12  ;;  %v2567_v52 = vsel %vm645_vm0, %v5003_v15, -inf  ;;  %v5011_v19 = vadd.f32 %v2518_v36, %v4752_v22  ;;  %v2639_v3 = vsub.f32 %v2528_v4, %v2555_v41 }
 0x53f   : > { %3307 = vpow2.f32 %v2651_v10  ;;  %v2691_v49 = vmul.f32 1.442695, %v2631_v5  ;;  %v2568_v26 = vmax.f32 %v2566_v37, %v2567_v52  ;;  %v2699_v63 = vmul.f32 1.442695, %v2635_v0 }
 0x540   : > { %3309 = vpow2.f32 %v2659_v27  ;;  %v2569_v1 = vsel %vm645_vm0, %v5011_v19, -inf  ;;  %v2707_v25 = vmul.f32 1.442695, %v2639_v3 }
 0x541   : > { %3311 = vpow2.f32 %v2667_v51  ;;  %v2570_v33 = vmax.f32 %v2568_v26, %v2569_v1 }
 0x542   : > { %3313 = vpow2.f32 %v2675_v39 }
 0x543   : > { %3315 = vpow2.f32 %v2683_v44 }
 0x544   : > { %v5013_v35 = vpop.eup %3305  ;;  %3317 = vpow2.f32 %v2691_v49 }
 0x545   : > { %v5015_v2 = vpop.eup %3307  ;;  %v2715_v32 = vsel %vm645_vm0, %v5013_v35, 0.0  ;;  %3319 = vpow2.f32 %v2699_v63 }
 0x546   : > { %v5019_v55 = vpop.eup %3309  ;;  %v2716_v41 = vsel %vm645_vm0, %v5015_v2, 0.0  ;;  %v2530_v36 = vpop.f32.mrf.mxu3  ;;  %3321 = vpow2.f32 %v2707_v25 }
 0x547   : > { %v5025_v4 = vpop.eup %3311  ;;  %v2717_v12 = vadd.f32 %v2716_v41, %v2715_v32  ;;  %v5028_v10 = vadd.f32 %v2530_v36, %v4752_v22  ;;  %v2718_v27 = vsel %vm645_vm0, %v5019_v55, 0.0 }
 0x548   : > { %v5032_v51 = vpop.eup %3313  ;;  %v2720_v39 = vsel %vm645_vm0, %v5025_v4, 0.0 }
 0x549   : > { %v2719_v60 = vadd.f32 %v2718_v27, %v2717_v12  ;;  %v2571_v5 = vsel %vm645_vm0, %v5028_v10, -inf  ;;  %v5040_v44 = vpop.eup %3315  ;;  %v2722_v37 = vsel %vm645_vm0, %v5032_v51, 0.0 }
 0x54a   : > { %v5038_v0 = vmax.f32 %v2570_v33, %v2571_v5  ;;  %v5050_v63 = vpop.eup %3317  ;;  %v2724_v36 = vsel %vm645_vm0, %v5040_v44, 0.0 }
 0x54b   : > { %v2721_v52 = vadd.f32 %v2720_v39, %v2719_v60  ;;  %v5058_v25 = vpop.eup %3319 }
 0x54c   : > { %v2608_v3 = vsub.f32 %v4784_v21, %v5038_v0  ;;  %v2612_v49 = vsub.f32 %v4776_v28, %v5038_v0  ;;  %v2616_v26 = vsub.f32 %v4793_v17, %v5038_v0  ;;  %v2620_v1 = vsub.f32 %v4874_v9, %v5038_v0  ;;  %v5062_v33 = vpop.eup %3321 }
 0x54d   : > { %v2723_v32 = vadd.f32 %v2722_v37, %v2721_v52  ;;  %v2624_v41 = vsub.f32 %v4917_v11, %v5038_v0  ;;  %v2726_v17 = vsel %vm645_vm0, %v5050_v63, 0.0  ;;  %v2728_v9 = vsel %vm645_vm0, %v5058_v25, 0.0 }
 0x54e   : > { %v2645_v12 = vmul.f32 1.442695, %v2608_v3  ;;  %v2653_v28 = vmul.f32 1.442695, %v2612_v49  ;;  %v2661_v27 = vmul.f32 1.442695, %v2616_v26  ;;  %v5068_v11 = vadd.f32 %v4968_v40, %v4752_v22 }
 0x54f   : > { %v2725_v21 = vadd.f32 %v2724_v36, %v2723_v32  ;;  %v2628_v39 = vsub.f32 %v5000_v45, %v5038_v0  ;;  %v2730_v52 = vsel %vm645_vm0, %v5062_v33, 0.0  ;;  %v2632_v37 = vsub.f32 %v5003_v15, %v5038_v0  ;;  %v2533_v36 = vpop.f32.mrf.mxu3 }
 0x550   : > { %3323 = vpow2.f32 %v2645_v12  ;;  %v2636_v26 = vsub.f32 %v5011_v19, %v5038_v0  ;;  %v2669_v32 = vmul.f32 1.442695, %v2620_v1  ;;  %v2823_v45 = vadd.f32 %v3901_v38, %v3822_v56 }
 0x551   : > { %v2727_v60 = vadd.f32 %v2726_v17, %v2725_v21  ;;  %3325 = vpow2.f32 %v2653_v28  ;;  %v2677_v21 = vmul.f32 1.442695, %v2624_v41  ;;  %v2586_v28 = vsel %vm645_vm0, %v5068_v11, -inf }
 0x552   : > { %3327 = vpow2.f32 %v2661_v27  ;;  %v2685_v15 = vmul.f32 1.442695, %v2628_v39  ;;  %v2693_v1 = vmul.f32 1.442695, %v2632_v37  ;;  %v5515_v38 = vmax.f32 %v4938_v29, %v4964_v57 }
 0x553   : > { %v2729_v5 = vadd.f32 %v2728_v9, %v2727_v60  ;;  %v5094_v60 = vadd.f32 %v2533_v36, %v4752_v22  ;;  %v2640_v9 = vsub.f32 %v5028_v10, %v5038_v0  ;;  %v2835_v29 = vadd.f32 %v4092_v16, %v4013_v24  ;;  %v5516_v0 = vld [vmem:[#allocation35_spill] sm:$0xff]  ;;  %v5518_v36 = vld [vmem:[#allocation29_spill] sm:$0xff] }
 0x554   : > { %v2509_v3 = vpop.f32.mrf.mxu2  ;;  %v2839_v57 = vadd.f32 %v4327_v62, %v4276_v23 }
 0x555   : > { %v2731_v49 = vadd.f32 %v2730_v52, %v2729_v5  ;;  %v5079_v40 = vadd.f32 %v2509_v3, %v4752_v22  ;;  %v2701_v5 = vmul.f32 1.442695, %v2636_v26  ;;  %v2831_v52 = vadd.f32 %v3945_v43, %v3950_v53 }
 0x556   : > { %v5083_v12 = vpop.eup %3323  ;;  %v2588_v43 = vsel %vm645_vm0, %v5094_v60, -inf  ;;  %v2709_v16 = vmul.f32 1.442695, %v2640_v9  ;;  %v5520_v9 = vld [vmem:[#allocation12_spill] sm:$0xff] }
 0x557   : > { %3329 = vrcp.f32 %v2731_v49  ;;  %v2584_v27 = vsel %vm645_vm0, %v5079_v40, -inf  ;;  %v5089_v19 = vpop.eup %3325  ;;  %v2732_v17 = vsel %vm645_vm0, %v5083_v12, 0.0  ;;  %v5517_v49 = vld [vmem:[#allocation31_spill] sm:$0xff] }
 0x558   : > { %v2585_v56 = vmax.f32 %v5515_v38, %v2584_v27  ;;  %v5099_v41 = vpop.eup %3327  ;;  %3331 = vpow2.f32 %v2669_v32  ;;  %v2733_v39 = vsel %vm645_vm0, %v5089_v19, 0.0  ;;  %v2851_v26 = vadd.f32 %v5517_v49, %v5516_v0 }
 0x559   : > { %3333 = vpow2.f32 %v2677_v21  ;;  %v2734_v37 = vadd.f32 %v2733_v39, %v2732_v17  ;;  %v2735_v10 = vsel %vm645_vm0, %v5099_v41, 0.0  ;;  %v5519_v21 = vld [vmem:[#allocation34_spill] sm:$0xff] }
 0x55a   : > { %v2587_v3 = vmax.f32 %v2585_v56, %v2586_v28  ;;  %3335 = vpow2.f32 %v2685_v15  ;;  %v2843_v24 = vadd.f32 %v5519_v21, %v5518_v36 }
 0x55b   : > { %3337 = vpow2.f32 %v2693_v1  ;;  %v2736_v32 = vadd.f32 %v2735_v10, %v2734_v37 }
 0x55c   : > { %3339 = vpow2.f32 %v2701_v5  ;;  %v5121_v23 = vmax.f32 %v2587_v3, %v2588_v43 }
 0x55d   : > { %v5117_v53 = vpop.eup %3329  ;;  %3341 = vpow2.f32 %v2709_v16 }
 0x55e   : > { %v2787_v62 = vmul.f32 %v5117_v53, %v5013_v35  ;;  %v2791_v28 = vmul.f32 %v5117_v53, %v5015_v2  ;;  %v2795_v15 = vmul.f32 %v5117_v53, %v5019_v55  ;;  %v2799_v27 = vmul.f32 %v5117_v53, %v5025_v4  ;;  %v5131_v1 = vpop.eup %3331 }
 0x55f   : > { %v2803_v17 = vmul.f32 %v5117_v53, %v5032_v51  ;;  %v2807_v38 = vmul.f32 %v5117_v53, %v5040_v44  ;;  %v2811_v35 = vmul.f32 %v5117_v53, %v5050_v63  ;;  %v2815_v2 = vmul.f32 %v5117_v53, %v5058_v25  ;;  %v5141_v56 = vpop.eup %3333  ;;  %v606_v51 = vld [vmem:[%s5404_s3 + $0x28] sm:$0xff] }
 0x560   : > { %v2859_v55 = vmul.f32 %v2823_v45, %v2787_v62  ;;  %v2863_v5 = vmul.f32 %v5520_v9, %v2791_v28  ;;  %v2867_v4 = vmul.f32 %v2831_v52, %v2795_v15  ;;  %v2871_v39 = vmul.f32 %v2835_v29, %v2799_v27  ;;  %v5147_v37 = vpop.eup %3335  ;;  %2990 = vmatpush.msrb.mxu3 %v606_v51 }
 0x561   : > { %v2875_v44 = vmul.f32 %v2839_v57, %v2803_v17  ;;  %v2879_v3 = vmul.f32 %v2843_v24, %v2807_v38  ;;  %v2883_v63 = vmul.f32 %v4529_v8, %v2811_v35  ;;  %v2887_v10 = vmul.f32 %v2851_v26, %v2815_v2  ;;  %v5150_v25 = vpop.eup %3337  ;;  %v605_v57 = vld [vmem:[%s5404_s3 + $0x20] sm:$0xff] }
 0x562   : > { %v2855_v45 = vadd.f32 %v4666_v42, %v4577_v54  ;;  %v5156_v52 = vadd.f32 %v4970_v7, %v4752_v22  ;;  %v2895_v29 = vsel %vm645_vm0, %v2859_v55, 0.0  ;;  %v2896_v0 = vsel %vm645_vm0, %v2863_v5, 0.0  ;;  %v5163_v8 = vpop.eup %3339  ;;  %2991 = vmatpush.msrb.mxu3 %v605_v57 }
 0x563   : > { %v2897_v49 = vadd.f32 %v2896_v0, %v2895_v29  ;;  %v2737_v26 = vsel %vm645_vm0, %v5131_v1, 0.0  ;;  %v2739_v54 = vsel %vm645_vm0, %v5141_v56, 0.0  ;;  %v2898_v42 = vsel %vm645_vm0, %v2867_v4, 0.0  ;;  %v3342_v9 = vpop.eup %3341 }
 0x564   : > { %v2900_v7 = vsel %vm645_vm0, %v2871_v39, 0.0  ;;  %v2738_v43 = vadd.f32 %v2737_v26, %v2736_v32  ;;  %v2741_v36 = vsel %vm645_vm0, %v5147_v37, 0.0  ;;  %v2902_v24 = vsel %vm645_vm0, %v2875_v44, 0.0  ;;  %v2512_v39 = vpop.f32.mrf.mxu2 }
 0x565   : > { %v2899_v21 = vadd.f32 %v2898_v42, %v2897_v49  ;;  %v2609_v16 = vsub.f32 %v4805_v48, %v5121_v23  ;;  %v2613_v62 = vsub.f32 %v4796_v50, %v5121_v23  ;;  %v2617_v15 = vsub.f32 %v4813_v30, %v5121_v23 }
 0x566   : > { %v2740_v28 = vadd.f32 %v2739_v54, %v2738_v43  ;;  %v2621_v27 = vsub.f32 %v4881_v61, %v5121_v23  ;;  %v2625_v32 = vsub.f32 %v4931_v34, %v5121_v23  ;;  %v2904_v38 = vsel %vm645_vm0, %v2879_v3, 0.0 }
 0x567   : > { %v2901_v17 = vadd.f32 %v2900_v7, %v2899_v21  ;;  %v2629_v35 = vsub.f32 %v4960_v47, %v5121_v23  ;;  %v2637_v48 = vsub.f32 %v5068_v11, %v5121_v23  ;;  %v2906_v50 = vsel %vm645_vm0, %v2883_v63, 0.0 }
 0x568   : > { %v2742_v2 = vadd.f32 %v2741_v36, %v2740_v28  ;;  %v2647_v55 = vmul.f32 1.442695, %v2609_v16  ;;  %v2655_v30 = vmul.f32 1.442695, %v2613_v62  ;;  %v2743_v61 = vsel %vm645_vm0, %v5150_v25, 0.0 }
 0x569   : > { %v2903_v5 = vadd.f32 %v2902_v24, %v2901_v17  ;;  %v2663_v34 = vmul.f32 1.442695, %v2617_v15  ;;  %v2671_v4 = vmul.f32 1.442695, %v2621_v27  ;;  %v2908_v51 = vsel %vm645_vm0, %v2887_v10, 0.0 }
 0x56a   : > { %v2744_v44 = vadd.f32 %v2743_v61, %v2742_v2  ;;  %v2745_v47 = vsel %vm645_vm0, %v5163_v8, 0.0  ;;  %3343 = vpow2.f32 %v2647_v55  ;;  %v2633_v3 = vsub.f32 %v5079_v40, %v5121_v23  ;;  %v5523_v55 = vld [vmem:[#allocation6_spill] sm:$0xff]  ;;  %v5525_v61 = vld [vmem:[#allocation13_spill] sm:$0xff] }
 0x56b   : > { %v2905_v11 = vadd.f32 %v2904_v38, %v2903_v5  ;;  %3345 = vpow2.f32 %v2655_v30  ;;  %v2679_v63 = vmul.f32 1.442695, %v2625_v32  ;;  %v5198_v0 = vadd.f32 %v2512_v39, %v4752_v22  ;;  %v5524_v30 = vld [vmem:[#allocation15_spill] sm:$0xff] }
 0x56c   : > { %v2746_v29 = vadd.f32 %v2745_v47, %v2744_v44  ;;  %3347 = vpow2.f32 %v2663_v34  ;;  %v2819_v57 = vmul.f32 %v5117_v53, %v5062_v33  ;;  %v2747_v49 = vsel %vm645_vm0, %v3342_v9, 0.0  ;;  %v5526_v34 = vld [vmem:[#allocation19_spill] sm:$0xff] }
 0x56d   : > { %v2907_v10 = vadd.f32 %v2906_v50, %v2905_v11  ;;  %3349 = vpow2.f32 %v2671_v4  ;;  %v2687_v26 = vmul.f32 1.442695, %v2629_v35  ;;  %v2641_v42 = vsub.f32 %v5094_v60, %v5121_v23  ;;  %v5522_v35 = vld [vmem:[#allocation9_spill] sm:$0xff] }
 0x56e   : > { %v2748_v54 = vadd.f32 %v2747_v49, %v2746_v29  ;;  %v2601_v40 = vsel %vm645_vm0, %v5198_v0, -inf  ;;  %v2891_v7 = vmul.f32 %v2855_v45, %v2819_v57  ;;  %3351 = vpow2.f32 %v2679_v63 }
 0x56f   : > { %v2909_v43 = vadd.f32 %v2908_v51, %v2907_v10  ;;  %v2695_v36 = vmul.f32 1.442695, %v2633_v3  ;;  %v5521_v21 = vmax.f32 %v4949_v31, %v4980_v58  ;;  %v5216_v24 = vsel %vm645_vm0, %v5156_v52, -inf }
 0x570   : > { %v5212_v53 = vpop.eup %3343  ;;  %3353 = vrcp.f32 %v2748_v54  ;;  %v2703_v60 = vmul.f32 1.442695, %v2637_v48  ;;  %v2910_v23 = vsel %vm645_vm0, %v2891_v7, 0.0  ;;  %v2711_v28 = vmul.f32 1.442695, %v2641_v42  ;;  %v5527_v7 = vld [vmem:[#allocation22_spill] sm:$0xff] }
 0x571   : > { %v5210_v33 = vmax.f32 %v5521_v21, %v2601_v40  ;;  %v5219_v16 = vpop.eup %3345  ;;  %3355 = vpow2.f32 %v2687_v26  ;;  %v2749_v45 = vsel %vm645_vm0, %v5212_v53, 0.0  ;;  %v2911_v62 = vadd.f32 %v2910_v23, %v2909_v43  ;;  %v5528_v21 = vld [vmem:[#allocation25_spill] sm:$0xff] }
 0x572   : > { %v5225_v58 = vpop.eup %3347  ;;  %v2750_v15 = vsel %vm645_vm0, %v5219_v16, 0.0  ;;  %3357 = vpow2.f32 %v2695_v36  ;;  %v2824_v48 = vadd.f32 %v5522_v35, %v3831_v59  ;;  %v2828_v5 = vadd.f32 %v5524_v30, %v5523_v55 }
 0x573   : > { %v2604_v31 = vmax.f32 %v5210_v33, %v5216_v24  ;;  %v5229_v27 = vpop.eup %3349  ;;  %v2751_v32 = vadd.f32 %v2750_v15, %v2749_v45  ;;  %3212 = vmatmul.msk.f32.vlgmr.msrb.gmra.mxu3 %vm645_vm0, %v2911_v62  ;;  %v2752_v17 = vsel %vm645_vm0, %v5225_v58, 0.0  ;;  %3359 = vpow2.f32 %v2703_v60  ;;  %v5529_v60 = vld [vmem:[#allocation30_spill] sm:$0xff]  ;;  %v5533_v33 = vld [vmem:[#allocation51_spill] sm:$0xff] }
 0x574   : > { %v5234_v38 = vpop.eup %3351  ;;  %v2832_v4 = vadd.f32 %v5526_v34, %v5525_v61  ;;  %3361 = vpow2.f32 %v2711_v28  ;;  %v2754_v39 = vsel %vm645_vm0, %v5229_v27, 0.0  ;;  %v2852_v49 = vadd.f32 %v4524_v14, %v4499_v46 }
 0x575   : > { %v2753_v50 = vadd.f32 %v2752_v17, %v2751_v32  ;;  %v2756_v3 = vsel %vm645_vm0, %v5234_v38, 0.0  ;;  %v2844_v32 = vadd.f32 %v4542_v20, %v4463_v18 }
 0x576   : > { %v3354_v2 = vpop.eup %3353 }
 0x577   : > { %v5244_v51 = vpop.eup %3355  ;;  %v2820_v44 = vmul.f32 %v3354_v2, %v3342_v9  ;;  %v2755_v47 = vadd.f32 %v2754_v39, %v2753_v50  ;;  %v2788_v11 = vmul.f32 %v3354_v2, %v5083_v12  ;;  %v2792_v59 = vmul.f32 %v3354_v2, %v5089_v19 }
 0x578   : > { %v2796_v63 = vmul.f32 %v3354_v2, %v5099_v41  ;;  %v2800_v29 = vmul.f32 %v3354_v2, %v5131_v1  ;;  %v2804_v57 = vmul.f32 %v3354_v2, %v5141_v56  ;;  %v3358_v10 = vpop.eup %3357  ;;  %v2808_v9 = vmul.f32 %v3354_v2, %v5147_v37 }
 0x579   : > { %v2757_v26 = vadd.f32 %v2756_v3, %v2755_v47  ;;  %v2812_v12 = vmul.f32 %v3354_v2, %v5150_v25  ;;  %v2758_v19 = vsel %vm645_vm0, %v5244_v51, 0.0  ;;  %v2816_v54 = vmul.f32 %v3354_v2, %v5163_v8  ;;  %v5260_v40 = vpop.eup %3359 }
 0x57a   : > { %v2860_v42 = vmul.f32 %v2824_v48, %v2788_v11  ;;  %v2864_v41 = vmul.f32 %v2828_v5, %v2792_v59  ;;  %v2868_v56 = vmul.f32 %v2832_v4, %v2796_v63  ;;  %v2872_v43 = vmul.f32 %v5527_v7, %v2800_v29  ;;  %v5263_v36 = vpop.eup %3361  ;;  %v5536_v7 = vld [vmem:[#allocation54_spill] sm:$0xff] }
 0x57b   : > { %v2759_v1 = vadd.f32 %v2758_v19, %v2757_v26  ;;  %v2760_v46 = vsel %vm645_vm0, %v3358_v10, 0.0  ;;  %v2884_v14 = vmul.f32 %v4584_v6, %v2812_v12  ;;  %v2888_v37 = vmul.f32 %v2852_v49, %v2816_v54  ;;  %v5530_v12 = vld [vmem:[#allocation44_spill] sm:$0xff] }
 0x57c   : > { %v2892_v25 = vmul.f32 %v4662_v13, %v2820_v44  ;;  %v2840_v8 = vadd.f32 %v5529_v60, %v5528_v21  ;;  %v2912_v45 = vsel %vm645_vm0, %v2860_v42, 0.0  ;;  %v2913_v62 = vsel %vm645_vm0, %v2864_v41, 0.0  ;;  %v5531_v41 = vld [vmem:[#allocation50_spill] sm:$0xff]  ;;  %v5539_v60 = vld [vmem:[#allocation7_spill] sm:$0xff] }
 0x57d   : > { %v2761_v23 = vadd.f32 %v2760_v46, %v2759_v1  ;;  %v2762_v28 = vsel %vm645_vm0, %v5260_v40, 0.0  ;;  %v2914_v15 = vadd.f32 %v2913_v62, %v2912_v45  ;;  %v2915_v35 = vsel %vm645_vm0, %v2868_v56, 0.0  ;;  %v5532_v1 = vld [vmem:[#allocation49_spill] sm:$0xff]  ;;  %v5541_v45 = vld [vmem:[#allocation14_spill] sm:$0xff]  ;;  %v5542_v62 = vld [vmem:[#allocation20_spill] sm:$0xff] }
 0x57e   : > { %v2876_v6 = vmul.f32 %v2840_v8, %v2804_v57  ;;  %v2764_v13 = vsel %vm645_vm0, %v5263_v36, 0.0  ;;  %v2880_v2 = vmul.f32 %v2844_v32, %v2808_v9  ;;  %v2917_v55 = vsel %vm645_vm0, %v2872_v43, 0.0  ;;  %v5540_v8 = vld [vmem:[#allocation17_spill] sm:$0xff] }
 0x57f   : > { %v2763_v17 = vadd.f32 %v2762_v28, %v2761_v23  ;;  %v2916_v48 = vadd.f32 %v2915_v35, %v2914_v15  ;;  %v2923_v20 = vsel %vm645_vm0, %v2884_v14, 0.0  ;;  %v2925_v11 = vsel %vm645_vm0, %v2888_v37, 0.0  ;;  %v5537_v14 = vld [vmem:[#allocation4_spill] sm:$0xff] }
 0x580   : > { %v2919_v5 = vsel %vm645_vm0, %v2876_v6, 0.0  ;;  %v2921_v34 = vsel %vm645_vm0, %v2880_v2, 0.0  ;;  %v2927_v59 = vsel %vm645_vm0, %v2892_v25, 0.0  ;;  %v2829_v23 = vadd.f32 %v5540_v8, %v5539_v60  ;;  %v5544_v6 = vld [vmem:[#allocation32_spill] sm:$0xff] }
 0x581   : > { %v2765_v50 = vadd.f32 %v2764_v13, %v2763_v17  ;;  %v2918_v30 = vadd.f32 %v2917_v55, %v2916_v48  ;;  %v2833_v28 = vadd.f32 %v5542_v62, %v5541_v45  ;;  %v5543_v17 = vld [vmem:[#allocation27_spill] sm:$0xff] }
 0x582   : > { %v2841_v35 = vadd.f32 %v5544_v6, %v5543_v17 }
 0x583   : > { %3363 = vrcp.f32 %v2765_v50  ;;  %v2920_v61 = vadd.f32 %v2919_v5, %v2918_v30  ;;  %v5545_v30 = vld [vmem:[#allocation23_spill] sm:$0xff] }
 0x585   : > { %v2922_v18 = vadd.f32 %v2921_v34, %v2920_v61 }
 0x587   : > { %v2536_v4 = vpop.f32.mrf.mxu3  ;;  %v2924_v39 = vadd.f32 %v2923_v20, %v2922_v18 }
 0x588   : > { %v5284_v44 = vadd.f32 %v2536_v4, %v4752_v22 }
 0x589   : > { %v3364_v47 = vpop.eup %3363  ;;  %v2926_v63 = vadd.f32 %v2925_v11, %v2924_v39  ;;  %v5547_v11 = vld [vmem:[#allocation36_spill] sm:$0xff] }
 0x58a   : > { %v2813_v3 = vmul.f32 %v3364_v47, %v3358_v10  ;;  %v2605_v29 = vsel %vm645_vm0, %v5284_v44, -inf  ;;  %v2789_v57 = vmul.f32 %v3364_v47, %v5212_v53  ;;  %v2793_v26 = vmul.f32 %v3364_v47, %v5219_v16 }
 0x58b   : > { %v2606_v49 = vmax.f32 %v2604_v31, %v2605_v29  ;;  %v2797_v22 = vmul.f32 %v3364_v47, %v5225_v58  ;;  %v2801_v9 = vmul.f32 %v3364_v47, %v5229_v27  ;;  %v2928_v10 = vadd.f32 %v2927_v59, %v2926_v63  ;;  %v5534_v31 = vld [vmem:[#allocation52_spill] sm:$0xff]  ;;  %v5535_v58 = vld [vmem:[#allocation53_spill] sm:$0xff]  ;;  %v5548_v59 = vld [vmem:[#allocation43_spill] sm:$0xff] }
 0x58c   : > { %v5298_v19 = vmul.f32 %v5530_v12, %v2813_v3  ;;  %v2805_v54 = vmul.f32 %v3364_v47, %v5234_v38  ;;  %v2809_v42 = vmul.f32 %v3364_v47, %v5244_v51  ;;  %v5538_v38 = vld [vmem:[#allocation10_spill] sm:$0xff]  ;;  %v2817_v32 = vmul.f32 %v3364_v47, %v5260_v40  ;;  %v5546_v40 = vld [vmem:[#allocation45_spill] sm:$0xff] }
 0x58d   : > { %v2610_v53 = vsub.f32 %v5531_v41, %v2606_v49  ;;  %v2614_v56 = vsub.f32 %v5532_v1, %v2606_v49  ;;  %v2618_v24 = vsub.f32 %v5533_v33, %v2606_v49  ;;  %v2622_v16 = vsub.f32 %v5534_v31, %v2606_v49  ;;  %3213 = vmatmul.msk.f32.gmra.mxu3 %vm645_vm0, %v2928_v10  ;;  %v5549_v1 = vld [vmem:[#allocation38_spill] sm:$0xff] }
 0x58e   : > { %v2626_v27 = vsub.f32 %v5535_v58, %v2606_v49  ;;  %v2630_v43 = vsub.f32 %v5536_v7, %v2606_v49  ;;  %v2638_v46 = vsub.f32 %v5156_v52, %v2606_v49  ;;  %v2825_v37 = vadd.f32 %v5538_v38, %v5537_v14 }
 0x58f   : > { %v2649_v51 = vmul.f32 1.442695, %v2610_v53  ;;  %v2657_v25 = vmul.f32 1.442695, %v2614_v56  ;;  %v2665_v21 = vmul.f32 1.442695, %v2618_v24  ;;  %v2634_v52 = vsub.f32 %v5198_v0, %v2606_v49 }
 0x590   : > { %v2673_v15 = vmul.f32 1.442695, %v2622_v16  ;;  %v2681_v13 = vmul.f32 1.442695, %v2626_v27  ;;  %v2821_v48 = vmul.f32 %v3364_v47, %v5263_v36  ;;  %v2861_v50 = vmul.f32 %v2825_v37, %v2789_v57  ;;  %v5550_v56 = vld [vmem:[#allocation41_spill] sm:$0xff] }
 0x591   : > { %3365 = vpow2.f32 %v2649_v51  ;;  %v2865_v2 = vmul.f32 %v2829_v23, %v2793_v26  ;;  %v2869_v55 = vmul.f32 %v2833_v28, %v2797_v22  ;;  %v2873_v5 = vmul.f32 %v5545_v30, %v2801_v9  ;;  %v5553_v30 = vld [vmem:[#allocation8_spill] sm:$0xff] }
 0x592   : > { %3367 = vpow2.f32 %v2657_v25  ;;  %v2877_v61 = vmul.f32 %v2841_v35, %v2805_v54  ;;  %v2689_v34 = vmul.f32 1.442695, %v2630_v43  ;;  %v2893_v18 = vmul.f32 %v5546_v40, %v2821_v48  ;;  %v5555_v40 = vld [vmem:[#allocation16_spill] sm:$0xff] }
 0x593   : > { %3369 = vpow2.f32 %v2665_v21  ;;  %v2929_v20 = vsel %vm645_vm0, %v2861_v50, 0.0  ;;  %v2930_v0 = vsel %vm645_vm0, %v2865_v2, 0.0  ;;  %v2642_v4 = vsub.f32 %v5284_v44, %v2606_v49  ;;  %v5551_v50 = vld [vmem:[#allocation5_spill] sm:$0xff]  ;;  %v5552_v2 = vld [vmem:[#allocation11_spill] sm:$0xff] }
 0x594   : > { %3371 = vpow2.f32 %v2673_v15  ;;  %v2697_v39 = vmul.f32 1.442695, %v2634_v52  ;;  %v2931_v36 = vadd.f32 %v2930_v0, %v2929_v20  ;;  %v2845_v3 = vadd.f32 %v5548_v59, %v5547_v11  ;;  %v5557_v0 = vld [vmem:[#allocation24_spill] sm:$0xff] }
 0x595   : > { %3373 = vpow2.f32 %v2681_v13  ;;  %v2932_v63 = vsel %vm645_vm0, %v2869_v55, 0.0  ;;  %v2705_v57 = vmul.f32 1.442695, %v2638_v46  ;;  %v2934_v44 = vsel %vm645_vm0, %v2873_v5, 0.0  ;;  %v5554_v5 = vld [vmem:[#allocation18_spill] sm:$0xff]  ;;  %v5560_v11 = vld [vmem:[#allocation40_spill] sm:$0xff] }
 0x596   : > { %3375 = vpow2.f32 %v2689_v34  ;;  %v2933_v22 = vadd.f32 %v2932_v63, %v2931_v36  ;;  %v2881_v10 = vmul.f32 %v2845_v3, %v2809_v42  ;;  %v2713_v54 = vmul.f32 1.442695, %v2642_v4  ;;  %v5558_v4 = vld [vmem:[#allocation26_spill] sm:$0xff]  ;;  %v5559_v36 = vld [vmem:[#allocation39_spill] sm:$0xff]  ;;  %v5562_v63 = vld [vmem:[#allocation48_spill] sm:$0xff] }
 0x597   : > { %v3366_v47 = vpop.eup %3365  ;;  %3377 = vpow2.f32 %v2697_v39  ;;  %v2853_v33 = vadd.f32 %v5550_v56, %v5549_v1  ;;  %v2936_v31 = vsel %vm645_vm0, %v2877_v61, 0.0  ;;  %v2940_v51 = vsel %vm645_vm0, %v5298_v19, 0.0  ;;  %v5561_v3 = vld [vmem:[#allocation46_spill] sm:$0xff] }
 0x598   : > { %v3368_v29 = vpop.eup %3367  ;;  %v2766_v26 = vsel %vm645_vm0, %v3366_v47, 0.0  ;;  %v2935_v53 = vadd.f32 %v2934_v44, %v2933_v22  ;;  %3379 = vpow2.f32 %v2705_v57  ;;  %v2938_v43 = vsel %vm645_vm0, %v2881_v10, 0.0 }
 0x599   : > { %v3370_v9 = vpop.eup %3369  ;;  %v2767_v12 = vsel %vm645_vm0, %v3368_v29, 0.0  ;;  %v2889_v7 = vmul.f32 %v2853_v33, %v2817_v32  ;;  %3381 = vpow2.f32 %v2713_v54  ;;  %v2944_v32 = vsel %vm645_vm0, %v2893_v18, 0.0  ;;  %v5556_v18 = vld [vmem:[#allocation21_spill] sm:$0xff] }
 0x59a   : > { %v3372_v49 = vpop.eup %3371  ;;  %v2768_v41 = vadd.f32 %v2767_v12, %v2766_v26  ;;  %v2769_v24 = vsel %vm645_vm0, %v3370_v9, 0.0  ;;  %v2937_v27 = vadd.f32 %v2936_v31, %v2935_v53  ;;  %v2826_v55 = vadd.f32 %v5552_v2, %v5551_v50  ;;  %v5563_v31 = vld [vmem:[#allocation28_spill] sm:$0xff] }
 0x59b   : > { %v3374_v16 = vpop.eup %3373  ;;  %v2771_v42 = vsel %vm645_vm0, %v3372_v49, 0.0  ;;  %v2942_v23 = vsel %vm645_vm0, %v2889_v7, 0.0  ;;  %v2830_v61 = vadd.f32 %v5554_v5, %v5553_v30  ;;  %v2834_v20 = vadd.f32 %v5556_v18, %v5555_v40  ;;  %v5565_v7 = vld [vmem:[#allocation47_spill] sm:$0xff]  ;;  %v3389_v2 = vld [vmem:[%s3672_s18] sm:$0xff] }
 0x59c   : > { %v2770_v58 = vadd.f32 %v2769_v24, %v2768_v41  ;;  %v3376_v46 = vpop.eup %3375  ;;  %v2939_v38 = vadd.f32 %v2938_v43, %v2937_v27  ;;  %v2773_v37 = vsel %vm645_vm0, %v3374_v16, 0.0  ;;  %v2838_v39 = vadd.f32 %v5558_v4, %v5557_v0 }
 0x59d   : > { %v3378_v25 = vpop.eup %3377  ;;  %v2775_v8 = vsel %vm645_vm0, %v3376_v46, 0.0  ;;  %v2854_v59 = vadd.f32 %v5560_v11, %v5559_v36  ;;  %v2858_v57 = vadd.f32 %v5562_v63, %v5561_v3  ;;  %v3392_v36 = vld [vmem:[%s3672_s18 + $0x18] sm:$0xff] }
 0x59e   : > { %v2772_v14 = vadd.f32 %v2771_v42, %v2770_v58  ;;  %v2941_v60 = vadd.f32 %v2940_v51, %v2939_v38  ;;  %v3380_v45 = vpop.eup %3379  ;;  %v2777_v15 = vsel %vm645_vm0, %v3378_v25, 0.0  ;;  %v5564_v58 = vld [vmem:[#allocation33_spill] sm:$0xff] }
 0x59f   : > { %v3382_v17 = vpop.eup %3381  ;;  %v2779_v52 = vsel %vm645_vm0, %v3380_v45, 0.0  ;;  %v2842_v27 = vadd.f32 %v5564_v58, %v5563_v31 }
 0x5a0   : > { %v2774_v21 = vadd.f32 %v2773_v37, %v2772_v14  ;;  %v2943_v28 = vadd.f32 %v2942_v23, %v2941_v60  ;;  %v2781_v13 = vsel %vm645_vm0, %v3382_v17, 0.0 }
 0x5a2   : > { %v2776_v62 = vadd.f32 %v2775_v8, %v2774_v21  ;;  %v2945_v35 = vadd.f32 %v2944_v32, %v2943_v28 }
 0x5a4   : > { %v2778_v6 = vadd.f32 %v2777_v15, %v2776_v62  ;;  %3214 = vmatmul.msk.f32.gmra.mxu3 %vm645_vm0, %v2945_v35 }
 0x5a6   : > { %v2780_v19 = vadd.f32 %v2779_v52, %v2778_v6 }
 0x5a8   : > { %v2782_v48 = vadd.f32 %v2781_v13, %v2780_v19  ;;  %v3388_v19 = vld [vmem:[%s5405_s4] sm:$0xff] }
 0x5a9   : > { %v2963_v13 = vperm.slane %v3388_v19, 6 }
 0x5aa   : > { %3383 = vrcp.f32 %v2782_v48 }
 0x5b0   : > { %v3384_v34 = vpop.eup %3383 }
 0x5b1   : > { %v2822_v26 = vmul.f32 %v3384_v34, %v3382_v17  ;;  %v2790_v22 = vmul.f32 %v3384_v34, %v3366_v47  ;;  %v2794_v12 = vmul.f32 %v3384_v34, %v3368_v29  ;;  %v2798_v10 = vmul.f32 %v3384_v34, %v3370_v9 }
 0x5b2   : > { %v2802_v44 = vmul.f32 %v3384_v34, %v3372_v49  ;;  %v2806_v54 = vmul.f32 %v3384_v34, %v3374_v16  ;;  %v2810_v41 = vmul.f32 %v3384_v34, %v3376_v46  ;;  %v2814_v53 = vmul.f32 %v3384_v34, %v3378_v25  ;;  %v5566_v49 = vld [vmem:[#allocation37_spill] sm:$0xff]  ;;  %v5567_v16 = vld [vmem:[#allocation42_spill] sm:$0xff] }
 0x5b3   : > { %v2818_v1 = vmul.f32 %v3384_v34, %v3380_v45  ;;  %v2862_v56 = vmul.f32 %v2826_v55, %v2790_v22  ;;  %v2866_v33 = vmul.f32 %v2830_v61, %v2794_v12  ;;  %v2870_v24 = vmul.f32 %v2834_v20, %v2798_v10  ;;  %v3390_v61 = vld [vmem:[%s3672_s18 + $0x8] sm:$0xff]  ;;  %v3391_v20 = vld [vmem:[%s3672_s18 + $0x10] sm:$0xff] }
 0x5b4   : > { %v2874_v42 = vmul.f32 %v2838_v39, %v2802_v44  ;;  %v2886_v43 = vmul.f32 %v5565_v7, %v2814_v53  ;;  %v2894_v38 = vmul.f32 %v2858_v57, %v2822_v26  ;;  %v2846_v46 = vadd.f32 %v5567_v16, %v5566_v49 }
 0x5b5   : > { %v2890_v14 = vmul.f32 %v2854_v59, %v2818_v1  ;;  %v2946_v47 = vsel %vm645_vm0, %v2862_v56, 0.0  ;;  %v2947_v29 = vsel %vm645_vm0, %v2866_v33, 0.0  ;;  %v2878_v37 = vmul.f32 %v2842_v27, %v2806_v54 }
 0x5b6   : > { %v2948_v9 = vadd.f32 %v2947_v29, %v2946_v47  ;;  %v2949_v51 = vsel %vm645_vm0, %v2870_v24, 0.0  ;;  %v2882_v21 = vmul.f32 %v2846_v46, %v2810_v41  ;;  %v2951_v60 = vsel %vm645_vm0, %v2874_v42, 0.0 }
 0x5b7   : > { %v2953_v23 = vsel %vm645_vm0, %v2878_v37, 0.0  ;;  %v2957_v15 = vsel %vm645_vm0, %v2886_v43, 0.0  ;;  %v2959_v17 = vsel %vm645_vm0, %v2890_v14, 0.0  ;;  %v2961_v35 = vsel %vm645_vm0, %v2894_v38, 0.0 }
 0x5b8   : > { %v2950_v25 = vadd.f32 %v2949_v51, %v2948_v9  ;;  %v2955_v62 = vsel %vm645_vm0, %v2882_v21, 0.0 }
 0x5ba   : > { %v2952_v8 = vadd.f32 %v2951_v60, %v2950_v25 }
 0x5bc   : > { %v2954_v45 = vadd.f32 %v2953_v23, %v2952_v8 }
 0x5be   : > { %v2956_v28 = vadd.f32 %v2955_v62, %v2954_v45 }
 0x5c0   : > { %v2958_v32 = vadd.f32 %v2957_v15, %v2956_v28 }
 0x5c2   : > { %v2960_v6 = vadd.f32 %v2959_v17, %v2958_v32 }
 0x5c4   : > { %v2962_v52 = vadd.f32 %v2961_v35, %v2960_v6 }
 0x5c6   : > { %3215 = vmatmul.msk.f32.gmra.mxu3 %vm645_vm0, %v2962_v52 }
 0x5f6   : > { %v2993_v48 = vpop.f32.mrf.mxu3 }
 0x5f7   : > { %v2994_v50 = vadd.f32 %v2993_v48, %v2963_v13 }
 0x5f9   : > { %v3005_v55 = vadd.f32 %v3389_v2, %v2994_v50 }
 0x5fb   : > { %3009 = vst.msk [vmem:[%s598_s10] sm:$0xff] %vm645_vm0, %v3005_v55 }
 0x610   : > { %v2996_v30 = vpop.f32.mrf.mxu3 }
 0x611   : > { %v2997_v5 = vadd.f32 %v2996_v30, %v2963_v13 }
 0x613   : > { %v3006_v34 = vadd.f32 %v3390_v61, %v2997_v5 }
 0x615   : > { %3010 = vst.msk [vmem:[%s598_s10 + $0x8] sm:$0xff] %vm645_vm0, %v3006_v34 }
 0x627   : > { %v2999_v40 = vpop.f32.mrf.mxu3 }
 0x628   : > { %v3000_v18 = vadd.f32 %v2999_v40, %v2963_v13 }
 0x62a   : > { %v3007_v0 = vadd.f32 %v3391_v20, %v3000_v18 }
 0x62c   : > { %3011 = vst.msk [vmem:[%s598_s10 + $0x10] sm:$0xff] %vm645_vm0, %v3007_v0 }
 0x649   : > { %v3002_v4 = vpop.f32.mrf.mxu3 }
 0x64a   : > { %v3003_v39 = vadd.f32 %v3002_v4, %v2963_v13 }
 0x64c   : > { %v3008_v11 = vadd.f32 %v3392_v36, %v3003_v39 }
 0x64e   : > { %3012 = vst.msk [vmem:[%s598_s10 + $0x18] sm:$0xff] %vm645_vm0, %v3008_v11 }
 0x64f PF: > { %p12_p9 = scmp.ge.s32.totalorder %s3470_s22, 4   ;;  %s5568_s18 = smov %s3411_s19 }
 0x650   : > { %s5569_s19 = smov %s3479_s25  ;;  %s5570_s20 = smov %s3470_s22 }
 0x651   :  { %14 = sbr.rel (!%p12_p9) target bundleno = 2 (0x2), region = 159 }

</bundles_post_ra>
